<compile_context>
chip_gen: v5e
topology: v5e:2x2
jax: 0.10.0
libtpu: 0.0.40
codegen_flags: <defaults>
</compile_context>

<pallas_src>
import functools

import jax
import jax.numpy as jnp
from jax.experimental import pallas as pl
from jax.experimental.pallas import tpu as pltpu

NEG_SLOPE = 0.01          # F.leaky_relu / nn.LeakyReLU default
BN_EPS = 1e-5
LANE = 128                # padded lane width for hidden / classifier / logits
TM_PROJ = 512             # node row tile, projection kernel
TM_AGG = 256              # node row tile, aggregation kernel
TK_AGG = 512              # neighbor-column tile, aggregation kernel
PAD = 512                 # node padding granularity (lcm of the tiles above)
XR_RESIDENT_BYTES = 8 << 20   # resident-xr threshold, conservative for v7x (64 MiB VMEM)


def _leaky_relu(x):
    return jnp.where(x > 0, x, NEG_SLOPE * x)


def _round_up(x, m):
    return ((x + m - 1) // m) * m


def _vmem_limit(total_bytes):
    # Generous headroom, capped so it is safe on v7x's 64 MiB/TC physical VMEM
    # as well as v5e/v6e's 128 MiB.
    return int(min(max(2 * total_bytes, 16 << 20), 48 << 20))


# --------------------------------------------------------------------------
# Kernel 1: fused feature projections + packed per-relation linear transform.
#   x  = lrelu(des @ Wd') + lrelu(num @ Wn') + lrelu(cat @ Wc')   (BN folded)
#   xr = x @ [W0.T/R | W1.T/R]  -> packed [TM, 128]               (mean folded)
# Grid: (N_pad // TM_PROJ,), row-parallel.
# --------------------------------------------------------------------------
def fusion_proj_kernel(des_ref, nc_ref, wd_ref, bd_ref,
                       wnc_ref, bnc_ref, wr_ref, xr_ref):
    des_a = _leaky_relu(
        jnp.dot(des_ref[...], wd_ref[...],
                preferred_element_type=jnp.float32) + bd_ref[...])
    nc_a = _leaky_relu(
        jnp.dot(nc_ref[...], wnc_ref[...],
                preferred_element_type=jnp.float32) + bnc_ref[...])
    # s lanes 0:H = des+num activations, lanes H:2H = cat activations (des_a's
    # padded lanes are exactly zero).  wr_ref has identical row blocks 0:H and
    # H:2H, so the cat half is folded back onto the packed relation weights by
    # the matmul itself -- no cross-lane shuffle needed.
    s = (des_a + nc_a).astype(jnp.bfloat16)
    xr_ref[...] = jnp.dot(s, wr_ref[...],
                          preferred_element_type=jnp.float32).astype(xr_ref.dtype)


# --------------------------------------------------------------------------
# Kernel 2: mean-aggregation over incoming edges (row-normalized adjacency
# matmul) reduced over 512-wide neighbor-column tiles, then leaky_relu +
# classifier MLP.  xr is lane-packed: lanes 0:H hold the relation-0 transform,
# lanes H:2H the relation-1 transform; relation r uses accumulator r and the
# two halves are recombined once at finalize.
# Grid: (N_pad // TM_AGG, N_pad // TK_AGG) -> ("parallel", "arbitrary").
# --------------------------------------------------------------------------
def rgcn_classifier_kernel(hidden, tk, xr_resident,
                           adj_ref, xr_ref, w1_ref, b1_ref, w2_ref, b2_ref,
                           out_ref, acc0_ref, acc1_ref):
    k = pl.program_id(1)

    @pl.when(k == 0)
    def _():
        acc0_ref[...] = jnp.zeros_like(acc0_ref)
        acc1_ref[...] = jnp.zeros_like(acc1_ref)

    if xr_resident:
        # xr is fully VMEM-resident (fetched once); slice the current K tile.
        xr_tile = xr_ref[pl.ds(k * tk, tk), :]
    else:
        xr_tile = xr_ref[...]

    # Two 512-deep MXU matmuls per step; relation-0 result is valid in acc0
    # lanes 0:H, relation-1 result in acc1 lanes H:2H (other lanes are junk).
    acc0_ref[...] += jnp.dot(adj_ref[0], xr_tile, preferred_element_type=jnp.float32)
    acc1_ref[...] += jnp.dot(adj_ref[1], xr_tile, preferred_element_type=jnp.float32)

    @pl.when(k == pl.num_programs(1) - 1)
    def _():
        acc0 = acc0_ref[...]
        acc1 = acc1_ref[...]
        # Fold acc1's valid half (lanes H:2H) onto lanes 0:H; the remaining junk
        # in lanes H:2H is annihilated by the zero rows of w1.
        agg = acc0 + jnp.concatenate([acc1[:, hidden:], acc1[:, :hidden]], axis=1)
        h = _leaky_relu(agg)
        # F.dropout(p=0.5, training=False) and classifier Dropout -> identity.
        h1 = _leaky_relu(
            jnp.dot(h.astype(jnp.bfloat16), w1_ref[...],
                    preferred_element_type=jnp.float32) + b1_ref[...])
        out_ref[...] = (jnp.dot(h1.astype(jnp.bfloat16), w2_ref[...],
                                preferred_element_type=jnp.float32)
                        + b2_ref[...]).astype(out_ref.dtype)


# --------------------------------------------------------------------------
# Wrappers
# --------------------------------------------------------------------------
def fused_projection(des_p, nc_p, p):
    n_pad, des_dim = des_p.shape
    tm = min(TM_PROJ, n_pad)
    vmem = (2 * tm * des_dim * 2 + 2 * tm * LANE * 2 + 2 * tm * LANE * 2
            + 2 * (des_dim * LANE + 2 * LANE * LANE) * 2 + 4 * LANE * 4)
    return pl.pallas_call(
        fusion_proj_kernel,
        out_shape=jax.ShapeDtypeStruct((n_pad, LANE), jnp.bfloat16),
        grid=(n_pad // tm,),
        in_specs=[
            pl.BlockSpec((tm, des_dim), lambda i: (i, 0)),
            pl.BlockSpec((tm, LANE), lambda i: (i, 0)),
            pl.BlockSpec((des_dim, LANE), lambda i: (0, 0)),
            pl.BlockSpec((1, LANE), lambda i: (0, 0)),
            pl.BlockSpec((LANE, LANE), lambda i: (0, 0)),
            pl.BlockSpec((1, LANE), lambda i: (0, 0)),
            pl.BlockSpec((LANE, LANE), lambda i: (0, 0)),
        ],
        out_specs=pl.BlockSpec((tm, LANE), lambda i: (i, 0)),
        compiler_params=pltpu.CompilerParams(
            dimension_semantics=("parallel",),
            vmem_limit_bytes=_vmem_limit(vmem)),
    )(des_p, nc_p, p["wd_t"], p["bd"], p["wnc_t"], p["bnc"], p["wr_t"])


def rgcn_and_classify(xr, adj, p, hidden):
    num_relations, n_pad, _ = adj.shape
    assert num_relations == 2
    tm = min(TM_AGG, n_pad)
    tk = min(TK_AGG, n_pad)

    xr_bytes = n_pad * LANE * 2
    xr_resident = xr_bytes <= XR_RESIDENT_BYTES
    if xr_resident:
        # Full-array block with constant index_map: fetched into VMEM once,
        # never re-read across the row-tile loop.
        xr_spec = pl.BlockSpec((n_pad, LANE), lambda i, k: (0, 0))
        xr_buf_bytes = 2 * xr_bytes
    else:
        xr_spec = pl.BlockSpec((tk, LANE), lambda i, k: (k, 0))
        xr_buf_bytes = 2 * tk * LANE * 2

    vmem = (2 * num_relations * tm * tk * 2 + xr_buf_bytes
            + 2 * tm * LANE * 2 + 2 * 2 * LANE * LANE * 2
            + 2 * tm * LANE * 4 + 4 * LANE * 4)

    kernel = functools.partial(rgcn_classifier_kernel, hidden, tk, xr_resident)
    return pl.pallas_call(
        kernel,
        out_shape=jax.ShapeDtypeStruct((n_pad, LANE), jnp.bfloat16),
        grid=(n_pad // tm, n_pad // tk),
        in_specs=[
            pl.BlockSpec((num_relations, tm, tk), lambda i, k: (0, i, k)),
            xr_spec,
            pl.BlockSpec((LANE, LANE), lambda i, k: (0, 0)),
            pl.BlockSpec((1, LANE), lambda i, k: (0, 0)),
            pl.BlockSpec((LANE, LANE), lambda i, k: (0, 0)),
            pl.BlockSpec((1, LANE), lambda i, k: (0, 0)),
        ],
        out_specs=pl.BlockSpec((tm, LANE), lambda i, k: (i, 0)),
        scratch_shapes=[pltpu.VMEM((tm, LANE), jnp.float32),
                        pltpu.VMEM((tm, LANE), jnp.float32)],
        compiler_params=pltpu.CompilerParams(
            dimension_semantics=("parallel", "arbitrary"),
            vmem_limit_bytes=_vmem_limit(vmem)),
    )(adj, xr, p["w1_t"], p["b1"], p["w2_t"], p["b2"])


def build_adjacency(edge_index, edge_type, num_nodes_padded, num_relations):
    """adj[r, i, j] = (# type-r edges j->i) / max(# type-r incoming edges at i, 1)."""
    # TODO(synk): for production graph sizes replace this dense O(R*N^2) adjacency
    # with a CSR / PrefetchScalarGridSpec sparse-gather aggregation kernel.
    src, dst = edge_index[0], edge_index[1]
    adj = jnp.zeros((num_relations, num_nodes_padded, num_nodes_padded), jnp.float32)
    adj = adj.at[edge_type, dst, src].add(1.0)
    deg = adj.sum(axis=2, keepdims=True)
    adj = adj / jnp.maximum(deg, 1.0)
    return adj.astype(jnp.bfloat16)


def bot_rgcn_forward(des, num, cat, edge_index, edge_type, params,
                     hidden_dim, num_relations):
    n = des.shape[0]
    n_pad = _round_up(n, PAD)
    num_dim, cat_dim = num.shape[1], cat.shape[1]

    des_p = jnp.zeros((n_pad, des.shape[1]), jnp.float32).at[:n].set(des)
    # merged [num | cat | zero-pad] input, 128 lanes wide
    nc_p = jnp.zeros((n_pad, LANE), jnp.float32)
    nc_p = nc_p.at[:n, :num_dim].set(num)
    nc_p = nc_p.at[:n, num_dim:num_dim + cat_dim].set(cat)

    xr = fused_projection(des_p.astype(jnp.bfloat16), nc_p.astype(jnp.bfloat16),
                          params)
    adj = build_adjacency(edge_index, edge_type, n_pad, num_relations)
    logits_padded = rgcn_and_classify(xr, adj, params, hidden_dim)
    return logits_padded[:n, :2].astype(jnp.float32)


# --------------------------------------------------------------------------
# Deterministic parameter construction (shapes from BotRGCN.__init__).
# Eval-mode BatchNorm (fresh running stats) and 1/num_relations folded in;
# everything padded to 128 lanes with exactly-zero padding.
# --------------------------------------------------------------------------
def init_params(key, des_dim, num_dim, cat_dim, hidden_dim, num_relations):
    assert num_relations == 2, "lane-packed relation path assumes 2 relations"
    assert 2 * hidden_dim == LANE, "lane packing requires 2*hidden == 128"
    assert num_dim + cat_dim <= LANE
    half = hidden_dim // 2
    ks = jax.random.split(key, 11)
    gain = jnp.sqrt(2.0 / (1.0 + NEG_SLOPE ** 2))

    def linear(kw, kb, in_dim, out_dim):
        w = (gain / jnp.sqrt(in_dim)) * jax.random.normal(
            kw, (out_dim, in_dim), jnp.float32)            # PyTorch [out, in] layout
        b = 0.01 * jax.random.normal(kb, (out_dim,), jnp.float32)
        return w.T, b                                       # [in, out], [out]

    # Fresh eval-mode BatchNorm1d: gamma=1, beta=0, running_mean=0, running_var=1.
    bn_scale = (1.0 + BN_EPS) ** -0.5

    def fold_bn(wt, b):
        return wt * bn_scale, b * bn_scale

    wd_t, bd = fold_bn(*linear(ks[0], ks[1], des_dim, hidden_dim))
    wn_t, bn_ = fold_bn(*linear(ks[2], ks[3], num_dim, hidden_dim))
    wc_t, bc = fold_bn(*linear(ks[4], ks[5], cat_dim, hidden_dim))

    p = {}
    p["wd_t"] = (jnp.zeros((des_dim, LANE), jnp.float32)
                 .at[:, :hidden_dim].set(wd_t).astype(jnp.bfloat16))
    p["bd"] = jnp.zeros((1, LANE), jnp.float32).at[0, :hidden_dim].set(bd)

    # merged num|cat weight: num rows -> lanes 0:H, cat rows -> lanes H:2H
    wnc = jnp.zeros((LANE, LANE), jnp.float32)
    wnc = wnc.at[:num_dim, :hidden_dim].set(wn_t)
    wnc = wnc.at[num_dim:num_dim + cat_dim, hidden_dim:2 * hidden_dim].set(wc_t)
    p["wnc_t"] = wnc.astype(jnp.bfloat16)
    bnc = jnp.zeros((1, LANE), jnp.float32)
    bnc = bnc.at[0, :hidden_dim].set(bn_)
    bnc = bnc.at[0, hidden_dim:2 * hidden_dim].set(bc)
    p["bnc"] = bnc

    # SimpleRGCNConv.weight: [R, in, out]; F.linear(x, weight[r]) = x @ weight[r].T.
    # Packed: cols 0:H = W0.T / R, cols H:2H = W1.T / R; the row block is
    # duplicated (rows H:2H == rows 0:H) so the cat-activation lanes fold back
    # onto the same weights inside kernel 1's single matmul.
    wr = (gain / jnp.sqrt(hidden_dim)) * jax.random.normal(
        ks[6], (num_relations, hidden_dim, hidden_dim), jnp.float32)
    wr_rows = jnp.zeros((hidden_dim, LANE), jnp.float32)
    for r in range(num_relations):
        wr_rows = wr_rows.at[:, r * hidden_dim:(r + 1) * hidden_dim].set(
            wr[r].T / num_relations)
    p["wr_t"] = jnp.concatenate([wr_rows, wr_rows], axis=0).astype(jnp.bfloat16)

    # classifier: Linear(H, H//2) -> LeakyReLU -> Dropout -> Linear(H//2, 2)
    # w1's rows H:128 stay zero: they annihilate the junk lanes of the packed acc.
    w1_t, b1 = linear(ks[7], ks[8], hidden_dim, half)
    w2_t, b2 = linear(ks[9], ks[10], half, 2)
    p["w1_t"] = (jnp.zeros((LANE, LANE), jnp.float32)
                 .at[:hidden_dim, :half].set(w1_t).astype(jnp.bfloat16))
    p["b1"] = jnp.zeros((1, LANE), jnp.float32).at[0, :half].set(b1)
    p["w2_t"] = (jnp.zeros((LANE, LANE), jnp.float32)
                 .at[:half, :2].set(w2_t).astype(jnp.bfloat16))
    p["b2"] = jnp.zeros((1, LANE), jnp.float32).at[0, :2].set(b2)
    return p


if __name__ == "__main__":
    # Small deterministic problem: 600 nodes (padded to 1024 -> aggregation grid
    # 4x2, exercising the k-reduction and resident-xr paths), 2000 edges.
    N, E = 600, 2000
    DES, NUM, CAT, H, R = 768, 5, 6, 64, 2

    key = jax.random.PRNGKey(0)
    k_des, k_num, k_cat, k_src, k_dst, k_typ, k_par = jax.random.split(key, 7)

    des = jax.random.normal(k_des, (N, DES), jnp.float32)
    num = jax.random.normal(k_num, (N, NUM), jnp.float32)
    cat = jax.random.normal(k_cat, (N, CAT), jnp.float32)
    edge_index = jnp.stack([jax.random.randint(k_src, (E,), 0, N),
                            jax.random.randint(k_dst, (E,), 0, N)])
    edge_type = jax.random.randint(k_typ, (E,), 0, R)

    params = init_params(k_par, DES, NUM, CAT, H, R)

    logits = bot_rgcn_forward(des, num, cat, edge_index, edge_type, params, H, R)
    logits = jax.block_until_ready(logits)

    assert logits.shape == (N, 2) and logits.dtype == jnp.float32
    assert bool(jnp.all(jnp.isfinite(logits)))
    print("KERNEL_OK")
</pallas_src>

<mosaic_0001>
module attributes {stable_mosaic.version = 11 : i64} {
  func.func @fusion_proj_kernel(%arg0: i32, %arg1: memref<512x768xbf16, #tpu.memory_space<vmem>>, %arg2: memref<512x128xbf16, #tpu.memory_space<vmem>>, %arg3: memref<768x128xbf16, #tpu.memory_space<vmem>>, %arg4: memref<1x128xf32, #tpu.memory_space<vmem>>, %arg5: memref<128x128xbf16, #tpu.memory_space<vmem>>, %arg6: memref<1x128xf32, #tpu.memory_space<vmem>>, %arg7: memref<128x128xbf16, #tpu.memory_space<vmem>>, %arg8: memref<512x128xbf16, #tpu.memory_space<vmem>>) attributes {dimension_semantics = [#tpu.dimension_semantics<parallel>], iteration_bounds = array<i64: 2>, scalar_prefetch = 0 : i64, scratch_operands = 0 : i64, tpu.core_type = #tpu.core_type<tc>, window_params = [{transform_indices = @transform_0, window_bounds = array<i64: 512, 768>}, {transform_indices = @transform_1, window_bounds = array<i64: 512, 128>}, {pipeline_mode = #tpu.pipeline_mode<synchronous>, transform_indices = @transform_2, window_bounds = array<i64: 768, 128>}, {pipeline_mode = #tpu.pipeline_mode<synchronous>, transform_indices = @transform_3, window_bounds = array<i64: 1, 128>}, {pipeline_mode = #tpu.pipeline_mode<synchronous>, transform_indices = @transform_4, window_bounds = array<i64: 128, 128>}, {pipeline_mode = #tpu.pipeline_mode<synchronous>, transform_indices = @transform_5, window_bounds = array<i64: 1, 128>}, {pipeline_mode = #tpu.pipeline_mode<synchronous>, transform_indices = @transform_6, window_bounds = array<i64: 128, 128>}, {transform_indices = @transform_7, window_bounds = array<i64: 512, 128>}]} {
    %c0 = arith.constant 0 : index
    %c0_0 = arith.constant 0 : index
    %0 = vector.load %arg1[%c0, %c0_0] : memref<512x768xbf16, #tpu.memory_space<vmem>>, vector<512x768xbf16>
    %c0_1 = arith.constant 0 : index
    %c0_2 = arith.constant 0 : index
    %1 = vector.load %arg3[%c0_1, %c0_2] : memref<768x128xbf16, #tpu.memory_space<vmem>>, vector<768x128xbf16>
    %cst = arith.constant dense<0.000000e+00> : vector<512x128xf32>
    %2 = tpu.matmul %0, %1, %cst {dimension_numbers = #tpu.dot_dimension_numbers<[1], [0], [0], [1], [0, 0, 1, 1], [], []>} : vector<512x768xbf16>, vector<768x128xbf16>, vector<512x128xf32> -> vector<512x128xf32>
    %c0_3 = arith.constant 0 : index
    %c0_4 = arith.constant 0 : index
    %3 = vector.load %arg4[%c0_3, %c0_4] : memref<1x128xf32, #tpu.memory_space<vmem>>, vector<1x128xf32>
    %4 = vector.broadcast %3 : vector<1x128xf32> to vector<512x128xf32>
    %5 = arith.addf %2, %4 : vector<512x128xf32>
    %cst_5 = arith.constant 0.000000e+00 : f32
    %6 = vector.broadcast %cst_5 : f32 to vector<512x128xf32>
    %7 = arith.cmpf ogt, %5, %6 : vector<512x128xf32>
    %cst_6 = arith.constant 0.00999999977 : f32
    %8 = vector.broadcast %cst_6 : f32 to vector<512x128xf32>
    %9 = arith.mulf %8, %5 : vector<512x128xf32>
    %10 = arith.select %7, %5, %9 : vector<512x128xi1>, vector<512x128xf32>
    %c0_7 = arith.constant 0 : index
    %c0_8 = arith.constant 0 : index
    %11 = vector.load %arg2[%c0_7, %c0_8] : memref<512x128xbf16, #tpu.memory_space<vmem>>, vector<512x128xbf16>
    %c0_9 = arith.constant 0 : index
    %c0_10 = arith.constant 0 : index
    %12 = vector.load %arg5[%c0_9, %c0_10] : memref<128x128xbf16, #tpu.memory_space<vmem>>, vector<128x128xbf16>
    %cst_11 = arith.constant dense<0.000000e+00> : vector<512x128xf32>
    %13 = tpu.matmul %11, %12, %cst_11 {dimension_numbers = #tpu.dot_dimension_numbers<[1], [0], [0], [1], [0, 0, 1, 1], [], []>} : vector<512x128xbf16>, vector<128x128xbf16>, vector<512x128xf32> -> vector<512x128xf32>
    %c0_12 = arith.constant 0 : index
    %c0_13 = arith.constant 0 : index
    %14 = vector.load %arg6[%c0_12, %c0_13] : memref<1x128xf32, #tpu.memory_space<vmem>>, vector<1x128xf32>
    %15 = vector.broadcast %14 : vector<1x128xf32> to vector<512x128xf32>
    %16 = arith.addf %13, %15 : vector<512x128xf32>
    %cst_14 = arith.constant 0.000000e+00 : f32
    %17 = vector.broadcast %cst_14 : f32 to vector<512x128xf32>
    %18 = arith.cmpf ogt, %16, %17 : vector<512x128xf32>
    %cst_15 = arith.constant 0.00999999977 : f32
    %19 = vector.broadcast %cst_15 : f32 to vector<512x128xf32>
    %20 = arith.mulf %19, %16 : vector<512x128xf32>
    %21 = arith.select %18, %16, %20 : vector<512x128xi1>, vector<512x128xf32>
    %22 = arith.addf %10, %21 : vector<512x128xf32>
    %23 = arith.truncf %22 : vector<512x128xf32> to vector<512x128xbf16>
    %c0_16 = arith.constant 0 : index
    %c0_17 = arith.constant 0 : index
    %24 = vector.load %arg7[%c0_16, %c0_17] : memref<128x128xbf16, #tpu.memory_space<vmem>>, vector<128x128xbf16>
    %cst_18 = arith.constant dense<0.000000e+00> : vector<512x128xf32>
    %25 = tpu.matmul %23, %24, %cst_18 {dimension_numbers = #tpu.dot_dimension_numbers<[1], [0], [0], [1], [0, 0, 1, 1], [], []>} : vector<512x128xbf16>, vector<128x128xbf16>, vector<512x128xf32> -> vector<512x128xf32>
    %26 = arith.truncf %25 : vector<512x128xf32> to vector<512x128xbf16>
    %c0_19 = arith.constant 0 : index
    %c0_20 = arith.constant 0 : index
    %27 = vector.load %arg8[%c0_19, %c0_20] : memref<512x128xbf16, #tpu.memory_space<vmem>>, vector<512x128xbf16>
    tpu.vector_store %arg8[%c0_19, %c0_20], %26 {strides = array<i32>} : memref<512x128xbf16, #tpu.memory_space<vmem>>, vector<512x128xbf16>,
    return
  }
  func.func @transform_0(%arg0: i32) -> (i32, i32) {
    %c0_i32 = arith.constant 0 : i32
    %c0_i32_0 = arith.constant 0 : i32
    return %arg0, %c0_i32 : i32, i32
  }
  func.func @transform_1(%arg0: i32) -> (i32, i32) {
    %c0_i32 = arith.constant 0 : i32
    %c0_i32_0 = arith.constant 0 : i32
    return %arg0, %c0_i32 : i32, i32
  }
  func.func @transform_2(%arg0: i32) -> (i32, i32) {
    %c0_i32 = arith.constant 0 : i32
    %c0_i32_0 = arith.constant 0 : i32
    %c0_i32_1 = arith.constant 0 : i32
    return %c0_i32, %c0_i32_0 : i32, i32
  }
  func.func @transform_3(%arg0: i32) -> (i32, i32) {
    %c0_i32 = arith.constant 0 : i32
    %c0_i32_0 = arith.constant 0 : i32
    %c0_i32_1 = arith.constant 0 : i32
    return %c0_i32, %c0_i32_0 : i32, i32
  }
  func.func @transform_4(%arg0: i32) -> (i32, i32) {
    %c0_i32 = arith.constant 0 : i32
    %c0_i32_0 = arith.constant 0 : i32
    %c0_i32_1 = arith.constant 0 : i32
    return %c0_i32, %c0_i32_0 : i32, i32
  }
  func.func @transform_5(%arg0: i32) -> (i32, i32) {
    %c0_i32 = arith.constant 0 : i32
    %c0_i32_0 = arith.constant 0 : i32
    %c0_i32_1 = arith.constant 0 : i32
    return %c0_i32, %c0_i32_0 : i32, i32
  }
  func.func @transform_6(%arg0: i32) -> (i32, i32) {
    %c0_i32 = arith.constant 0 : i32
    %c0_i32_0 = arith.constant 0 : i32
    %c0_i32_1 = arith.constant 0 : i32
    return %c0_i32, %c0_i32_0 : i32, i32
  }
  func.func @transform_7(%arg0: i32) -> (i32, i32) {
    %c0_i32 = arith.constant 0 : i32
    %c0_i32_0 = arith.constant 0 : i32
    return %arg0, %c0_i32 : i32, i32
  }
}

</mosaic_0001>

<bundles_post_ra>
// kernel: tpu_custom_call.1
= control target key start
LH: loop header
LB: loop body
LE: loop exit
PB: predicated region body
PF: predicated region fallthrough
CT: control target
= control target key end

     0   :  { %s7628_s0 = inlined_call_operand.hbm [shape: bf16[1024,768], index: 0, kind: input, shape index: {}]   ;;  %s7629_s1 = inlined_call_operand.hbm [shape: bf16[1024,128], index: 1, kind: input, shape index: {}]   ;;  %s7630_s2 = inlined_call_operand.hbm [shape: bf16[768,128], index: 2, kind: input, shape index: {}]   ;;  %s7631_s3 = inlined_call_operand.hbm [shape: f32[1,128], index: 3, kind: input, shape index: {}]   ;;  %s7632_s4 = inlined_call_operand.hbm [shape: bf16[128,128], index: 4, kind: input, shape index: {}]   ;;  %s7633_s5 = inlined_call_operand.hbm [shape: f32[1,128], index: 5, kind: input, shape index: {}]   ;;  %s7634_s6 = inlined_call_operand.hbm [shape: bf16[128,128], index: 6, kind: input, shape index: {}]   ;;  %s7635_s7 = inlined_call_operand.hbm [shape: bf16[1024,128], index: 7, kind: output, shape index: {}]  }
   0x1   :  { %7638 = sst [smem:[#allocation55_spill]] %s7628_s0 }
   0x2   :  { %7639 = sst [smem:[#allocation56_spill]] %s7630_s2 }
   0x3   :  { %7640 = sst [smem:[#allocation57_spill]] %s7631_s3 }
   0x4   :  { %7641 = sst [smem:[#allocation58_spill]] %s7632_s4 }
   0x5   :  { %7642 = sst [smem:[#allocation59_spill]] %s7633_s5 }
   0x6   :  { %7643 = sst [smem:[#allocation60_spill]] %s7634_s6 }
   0x7   :  { %12 = vsyncpa [#allocation3], 0 }
   0x8   :  { %14 = vsyncpa [#allocation3 + $0x1], 0 }
   0x9   :  { %15 = vsyncpa [#allocation6], 0 }
   0xa   :  { %17 = vsyncpa [#allocation6 + $0x1], 0 }
   0xb   :  { %18 = vsyncpa [#allocation9], 0 }
   0xc   :  { %19 = vsyncpa [#allocation12], 0 }
   0xd   :  { %20 = vsyncpa [#allocation4], 0 }
   0xe   :  { %22 = vsyncpa [#allocation4 + $0x1], 0  ;;  %s6591_s24 = smov 0   ;;  %s6593_s25 = smov 0  }
   0xf   :  { %s6595_s26 = smov 0   ;;  %s6597_s27 = smov 0  }
  0x10 LB: > { %s7644_s2 = sld [smem:[#allocation56_spill]]  ;;  %s6615_s8 = sadd.s32 4294967295, %s6538_s27   ;;  %s6538_s27 = sphi %s6597_s27, %s7730_s27   ;;  %s6534_s26 = sphi %s6595_s26, %s7729_s26   ;;  %s6530_s25 = sphi %s6593_s25, %s7728_s25   ;;  %s6526_s24 = sphi %s6591_s24, %s7727_s24  }
  0x11   : > { %p4471_p0 = scmp.ge.s32.totalorder %s6538_s27, 1  ;;  %p49_p1 = scmp.eq.s32.totalorder %s6615_s8, 0 }
  0x12   : > { %p216_p2 = scmp.lt.s32.totalorder %s6538_s27, 3  ;;  %s6540_s10 = smov [#allocation7]  }
  0x13   : > { %s229_s11 = sshll.u32 %s6540_s10, 4  ;;  %s7646_s3 = sld [smem:[#allocation57_spill]]  ;;  %s230_s11 = int_to_ptr.vmem [resolvable:$true] %s229_s11 }
  0x14   : > { %p6620_p3 = pnand %p4471_p0, %p216_p2  ;;  %s7648_s5 = sld [smem:[#allocation59_spill]] }
  0x15   : > { %s6541_s19 = smov [#allocation8]   ;;  %s7636_s21 = smov 64  }
  0x16   : > { %s227_s30 = sshll.u32 %s7644_s2, 4  ;;  %p6159_p4 = pneg %p6620_p3  ;;  %s228_s30 = int_to_ptr.hbm [resolvable:$true] %s227_s30 }
  0x17   : > { %s244_s20 = sshll.u32 %s6541_s19, 4  ;;  %s7637_s22 = smov 4   ;;  %s245_s20 = int_to_ptr.vmem [resolvable:$true] %s244_s20 }
  0x18   : > { %p6632_p6 = pnand %p6159_p4, %p49_p1  ;;  %s7649_s4 = sld [smem:[#allocation58_spill]] }
  0x19   : > { %s242_s14 = sshll.u32 %s7646_s3, 4  ;;  %s6544_s10 = smov [#allocation11]   ;;  %s243_s14 = int_to_ptr.hbm [resolvable:$true] %s242_s14 }
  0x1a   : > { %s268_s18 = sshll.u32 %s7648_s5, 4  ;;  %s270_s12 = sshll.u32 %s6544_s10, 4  ;;  %s269_s18 = int_to_ptr.hbm [resolvable:$true] %s268_s18  ;;  %s271_s12 = int_to_ptr.vmem [resolvable:$true] %s270_s12 }
  0x1b   : > { %6162 = dma.hbm_to_vmem [thread:$0]  (!%p6632_p6), %s228_s30, 6144, %s230_s11, [#allocation6], %s7636_s21, %s7636_s21, %s7637_s22  }
  0x1c   : > { %6165 = dma.hbm_to_vmem [thread:$0]  (!%p6632_p6), %s243_s14, 16, %s245_s20, [#allocation9]  }
  0x1d   : > { %6171 = dma.hbm_to_vmem [thread:$0]  (!%p6632_p6), %s269_s18, 16, %s271_s12, [#allocation12]  }
  0x1e   : > { %s253_s29 = sshll.u32 %s7649_s4, 4  ;;  %s6545_s30 = smov [#allocation10]   ;;  %s254_s29 = int_to_ptr.hbm [resolvable:$true] %s253_s29 }
  0x1f   : > { %s255_s11 = sshll.u32 %s6545_s30, 4  ;;  %s7650_s6 = sld [smem:[#allocation60_spill]]  ;;  %s256_s11 = int_to_ptr.vmem [resolvable:$true] %s255_s11 }
  0x20   : > { %6168 = dma.hbm_to_vmem [thread:$0]  (!%p6632_p6), %s254_s29, 1024, %s256_s11, [#allocation9], %s7636_s21, %s7636_s21, %s7637_s22  }
  0x21   : > { %s6546_s17 = smov [#allocation13]   ;;  %s4470_s19 = sadd.s32 4294967294, %s6538_s27  }
  0x22   : > { %s281_s18 = sshll.u32 %s6546_s17, 4  ;;  %s6666_s20 = sadd.s32 1, %s6538_s27   ;;  %s282_s18 = int_to_ptr.vmem [resolvable:$true] %s281_s18 }
  0x23   : > { %s35_s23 = sadd.s32 1, %s6534_s26  ;;  %s32_s28 = ssub.s32 %s6538_s27, %s6666_s20 }
  0x24   : > { %p42_p7 = scmp.ne.s32.totalorder %s6534_s26, %s6530_s25  ;;  %p33_p8 = scmp.eq.s32.totalorder %s32_s28, 0 }
  0x25   : > { %s279_s16 = sshll.u32 %s7650_s6, 4  ;;  %p43_p9 = scmp.eq.s32.totalorder %s6538_s27, 0  ;;  %s280_s16 = int_to_ptr.hbm [resolvable:$true] %s279_s16 }
  0x26   : > { %6174 = dma.hbm_to_vmem [thread:$0]  (!%p6632_p6), %s280_s16, 1024, %s282_s18, [#allocation12], %s7636_s21, %s7636_s21, %s7637_s22  }
  0x27   : > { %p48_p10 = scmp.ne.s32.totalorder %s6530_s25, %s6526_s24  ;;  %p203_p11 = scmp.eq.s32.totalorder %s6615_s8, 1 }
  0x28   : > { %s6678_s29 = scalar_select %p33_p8, %s6534_s26, %s35_s23  }
  0x29   : > { %p44_p12 = por %p43_p9, %p42_p7  ;;  %p6682_p13 = por %p49_p1, %p48_p10 }
  0x2a   : > { %7651 = sst [smem:[#allocation21_spill]] %s6678_s29  ;;  %p6686_p0 = por %p203_p11, %p42_p7 }
  0x2b   : > { %p209_p2 = scmp.eq.s32.totalorder %s4470_s19, 1  ;;  %p6191_p4 = scmp.lt.s32.totalorder %s6538_s27, 2 }
  0x2c   : > { %s6692_s12 = sand.u32 1, %s6534_s26   ;;  %s6131_s14 = smul.u32 1536, %s6538_s27 }
  0x2d   : > { %p6694_p6 = por %p209_p2, %p48_p10  ;;  %s6130_s11 = smul.u32 1536, %s6692_s12 }
  0x2e   : > { %p6699_p8 = pnand %p6191_p4, %p44_p12  ;;  %s7656_s0 = sld [smem:[#allocation55_spill]] }
  0x2f   : > { %s299_s19 = scalar_lea.vmem [#allocation2], %s6130_s11  ;;  %s296_s21 = scalar_lea.sflag [#allocation3], %s6692_s12 }
  0x30   : > { %s308_s23 = sshll.u32 %s299_s19, 4  ;;  %p6400_p9 = pneg %p6699_p8  ;;  %s309_s23 = int_to_ptr.vmem [resolvable:$true] %s308_s23 }
  0x34   : > { %s305_s18 = scalar_lea.hbm %s7656_s0, %s6131_s14  ;;  %s6403_s14 = scalar_lea.hbm %s7656_s0, 3072 }
  0x35   : > { %s306_s28 = sshll.u32 %s305_s18, 4  ;;  %s307_s28 = int_to_ptr.hbm [resolvable:$true] %s306_s28 }
  0x36   : > { %s6396_s22 = sshra.s32 %s307_s28, 4  ;;  %s6397_s22 = int_to_ptr.hbm [resolvable:$true] %s6396_s22 }
  0x37   : > { %s6398_s2 = scalar_lea.hbm %s6397_s22, 1536  ;;  %p6404_p12 = scmp.lt.s32.totalorder %s6397_s22, %s7656_s0 }
  0x38   : > { %p6399_p7 = scmp.ne.s32.totalorder %s6397_s22, %s6398_s2  ;;  %p6405_p2 = scmp.lt.s32.totalorder %s6403_s14, %s6398_s2 }
  0x3a   : > { %p6401_p10 = pnand %p6400_p9, %p6399_p7  ;;  %p6406_p4 = por %p6405_p2, %p6404_p12 }
  0x3c   : > { %p6402_p11 = pneg %p6401_p10 }
  0x3e   : > { %p6407_p5 = pnand %p6406_p4, %p6402_p11 }
  0x40   : > { %6410 = shalt.err (!%p6407_p5)
}
  0x41   : > { %s6547_s17 = smov 384   ;;  %s6548_s18 = smov 24  }
  0x42   : > { %6178 = dma.hbm_to_vmem [thread:$0]  (!%p6699_p8), %s307_s28, 24576, %s309_s23, %s296_s21, %s6547_s17, %s6547_s17, %s6548_s18  }
  0x43   : > { %s318_s19 = sand.u32 1, %s6538_s27   ;;  %s4481_s3 = sshll.u32 %s6692_s12, 8 }
  0x44   : > { %s5649_s4 = sshll.u32 %s6538_s27, 8  ;;  %s322_s5 = scalar_lea.vmem [#allocation5], %s4481_s3 }
  0x45   : > { %s330_s6 = sshll.u32 %s322_s5, 4  ;;  %s327_s2 = scalar_lea.hbm %s7629_s1, %s5649_s4  ;;  %s331_s6 = int_to_ptr.vmem [resolvable:$true] %s330_s6 }
  0x46   : > { %s328_s14 = sshll.u32 %s327_s2, 4  ;;  %s319_s16 = scalar_lea.sflag [#allocation6], %s318_s19  ;;  %s329_s14 = int_to_ptr.hbm [resolvable:$true] %s328_s14 }
  0x47   : > { %s6426_s0 = sshra.s32 %s329_s14, 4  ;;  %s6433_s5 = scalar_lea.hbm %s7629_s1, 512  ;;  %s6427_s0 = int_to_ptr.hbm [resolvable:$true] %s6426_s0 }
  0x48   : > { %s6428_s29 = scalar_lea.hbm %s6427_s0, 256  ;;  %p6434_p11 = scmp.lt.s32.totalorder %s6427_s0, %s7629_s1 }
  0x49   : > { %p6429_p5 = scmp.ne.s32.totalorder %s6427_s0, %s6428_s29  ;;  %p6435_p12 = scmp.lt.s32.totalorder %s6433_s5, %s6428_s29 }
  0x4b   : > { %p6431_p7 = pnand %p6429_p5, %p6400_p9  ;;  %p6436_p2 = por %p6435_p12, %p6434_p11 }
  0x4d   : > { %p6432_p10 = pneg %p6431_p7 }
  0x4f   : > { %p6437_p4 = pnand %p6436_p2, %p6432_p10 }
  0x51   : > { %6440 = shalt.err (!%p6437_p4)
}
  0x52   : > { %s7657_s17 = smov 4   ;;  %s7658_s18 = smov 64  }
  0x53   : > { %6181 = dma.hbm_to_vmem [thread:$0]  (!%p6699_p8), %s329_s14, 4096, %s331_s6, %s319_s16, %s7658_s18, %s7658_s18, %s7657_s17  }
  0x54   : > { %342 = sbr.rel (%p6620_p3) target bundleno = 1440 (0x5a0), region = 48 }
  0x59   : > { %s6744_s19 = sand.u32 1, %s6530_s25  }
  0x5a   : > { %s6132_s0 = smul.u32 1536, %s6744_s19  ;;  %s345_s29 = scalar_lea.sflag [#allocation3], %s6744_s19 }
  0x5c   : > { %s6748_s3 = scalar_lea.vmem [#allocation2], %s6132_s0 }
  0x5d   : > { %6501 = dma.done.wait (%p6682_p13), %s345_s29, 24576  }
  0x5e   : > { %6503 = vsyncadd (%p6682_p13), %s345_s29, 4294942720  ;;  %s354_s6 = sand.u32 1, %s6615_s8   ;;  %s4485_s9 = sshll.u32 %s6744_s19, 8 }
  0x5f   : > { %s355_s13 = scalar_lea.sflag [#allocation6], %s354_s6  ;;  %s6758_s4 = scalar_lea.vmem [#allocation5], %s4485_s9 }
  0x60   : > { %6505 = dma.done.wait (%p6682_p13), %s355_s13, 4096  }
  0x61   : > { %6507 = vsyncadd (%p6682_p13), %s355_s13, 4294963200 }
  0x62   : > { %6509 = dma.done.wait (%p49_p1), [#allocation6], 6144  }
  0x63   : > { %6511 = vsyncadd (%p49_p1), [#allocation6], 4294961152 }
  0x64   : > { %6513 = dma.done.wait (%p49_p1), [#allocation9], 1040  }
  0x65   : > { %6515 = vsyncadd (%p49_p1), [#allocation9], 4294966256 }
  0x66   : > { %6517 = dma.done.wait (%p49_p1), [#allocation12], 1040  }
  0x67   : > { %6519 = vsyncadd (%p49_p1), [#allocation12], 4294966256  ;;  %v5849_v0 = vld [vmem:[#allocation7 + $0x38] sm:$0xff]  ;;  %v5848_v4 = vld [vmem:[#allocation7 + $0x30] sm:$0xff]  ;;  %s7391_s15 = scalar_lea.vmem [#allocation14], %s4485_s9  ;;  %s5938_s11 = sshll.u32 %s6615_s8, 8 }
  0x68   : > { %v5857_v1 = vld [vmem:[#allocation7 + $0x78] sm:$0xff]  ;;  %1963 = vmatpush.bf16.msra.mxu0 %v5849_v0  ;;  %v5856_v5 = vld [vmem:[#allocation7 + $0x70] sm:$0xff]  ;;  %v5847_v8 = vld [vmem:[#allocation7 + $0x28] sm:$0xff]  ;;  %s4323_s14 = scalar_lea.hbm %s7635_s7, %s5938_s11  ;;  %s4324_s16 = sshll.u32 %s7391_s15, 4  ;;  %s4325_s16 = int_to_ptr.vmem [resolvable:$true] %s4324_s16 }
  0x69   : > { %v5865_v2 = vld [vmem:[#allocation7 + $0xb8] sm:$0xff]  ;;  %2132 = vmatpush.bf16.msra.mxu1 %v5857_v1  ;;  %v5864_v6 = vld [vmem:[#allocation7 + $0xb0] sm:$0xff]  ;;  %v5855_v9 = vld [vmem:[#allocation7 + $0x68] sm:$0xff]  ;;  %s4326_s21 = sshll.u32 %s4323_s14, 4  ;;  %s4312_s12 = scalar_lea.sflag [#allocation4], %s6744_s19  ;;  %s4327_s21 = int_to_ptr.hbm [resolvable:$true] %s4326_s21 }
  0x6a   : > { %v5873_v3 = vld [vmem:[#allocation7 + $0xf8] sm:$0xff]  ;;  %2301 = vmatpush.bf16.msra.mxu2 %v5865_v2  ;;  %v5872_v7 = vld [vmem:[#allocation7 + $0xf0] sm:$0xff]  ;;  %v5863_v10 = vld [vmem:[#allocation7 + $0xa8] sm:$0xff]  ;;  %s6470_s5 = sshra.s32 %s4327_s21, 4  ;;  %s6476_s17 = scalar_lea.hbm %s7635_s7, 512  ;;  %s6471_s5 = int_to_ptr.hbm [resolvable:$true] %s6470_s5 }
  0x6b   : > { %2470 = vmatpush.bf16.msra.mxu3 %v5873_v3  ;;  %v5871_v11 = vld [vmem:[#allocation7 + $0xe8] sm:$0xff]  ;;  %v5846_v12 = vld [vmem:[#allocation7 + $0x20] sm:$0xff]  ;;  %v5845_v16 = vld [vmem:[#allocation7 + $0x18] sm:$0xff]  ;;  %s6472_s23 = scalar_lea.hbm %s6471_s5, 256  ;;  %p6477_p8 = scmp.lt.s32.totalorder %s6471_s5, %s7635_s7 }
  0x6c   : > { %1964 = vmatpush.bf16.msra.mxu0 %v5848_v4  ;;  %v5854_v13 = vld [vmem:[#allocation7 + $0x60] sm:$0xff]  ;;  %v5853_v17 = vld [vmem:[#allocation7 + $0x58] sm:$0xff]  ;;  %v5844_v20 = vld [vmem:[#allocation7 + $0x10] sm:$0xff]  ;;  %p6473_p1 = scmp.ne.s32.totalorder %s6471_s5, %s6472_s23  ;;  %p6478_p9 = scmp.lt.s32.totalorder %s6476_s17, %s6472_s23 }
  0x6d   : > { %2133 = vmatpush.bf16.msra.mxu1 %v5856_v5  ;;  %v5862_v14 = vld [vmem:[#allocation7 + $0xa0] sm:$0xff]  ;;  %v5861_v18 = vld [vmem:[#allocation7 + $0x98] sm:$0xff]  ;;  %v5852_v21 = vld [vmem:[#allocation7 + $0x50] sm:$0xff] }
  0x6e   : > { %2302 = vmatpush.bf16.msra.mxu2 %v5864_v6  ;;  %v5870_v15 = vld [vmem:[#allocation7 + $0xe0] sm:$0xff]  ;;  %v5869_v19 = vld [vmem:[#allocation7 + $0xd8] sm:$0xff]  ;;  %v5860_v22 = vld [vmem:[#allocation7 + $0x90] sm:$0xff]  ;;  %p6474_p3 = pnand %p6473_p1, %p6686_p0  ;;  %p6479_p5 = por %p6478_p9, %p6477_p8 }
  0x6f   : > { %2471 = vmatpush.bf16.msra.mxu3 %v5872_v7  ;;  %v5868_v23 = vld [vmem:[#allocation7 + $0xd0] sm:$0xff]  ;;  %v5843_v24 = vld [vmem:[#allocation7 + $0x8] sm:$0xff]  ;;  %v5842_v28 = vld [vmem:[#allocation7] sm:$0xff] }
  0x70   : > { %1965 = vmatpush.bf16.msra.mxu0 %v5847_v8  ;;  %v5851_v25 = vld [vmem:[#allocation7 + $0x48] sm:$0xff]  ;;  %v5850_v29 = vld [vmem:[#allocation7 + $0x40] sm:$0xff]  ;;  %v5653_v33 = vld [vmem:[%s6748_s3 + $0x14] sm:$0xf0]  ;;  %p6475_p13 = pneg %p6474_p3 }
  0x71   : > { %2134 = vmatpush.bf16.msra.mxu1 %v5855_v9  ;;  %v5859_v26 = vld [vmem:[#allocation7 + $0x88] sm:$0xff]  ;;  %v5858_v30 = vld [vmem:[#allocation7 + $0x80] sm:$0xff]  ;;  %v4496_v35 = vld [vmem:[%s6748_s3 + $0x18] sm:$0xf0] }
  0x72   : > { %2303 = vmatpush.bf16.msra.mxu2 %v5863_v10  ;;  %v5867_v27 = vld [vmem:[#allocation7 + $0xc8] sm:$0xff]  ;;  %v5866_v31 = vld [vmem:[#allocation7 + $0xc0] sm:$0xff]  ;;  %v5881_v41 = vld [vmem:[#allocation7 + $0x138] sm:$0xff]  ;;  %p6480_p7 = pnand %p6479_p5, %p6475_p13 }
  0x73   : > { %2472 = vmatpush.bf16.msra.mxu3 %v5871_v11  ;;  %v4494_v32 = vld [vmem:[%s6748_s3] sm:$0xf]  ;;  %v5650_v34 = vld [vmem:[%s6748_s3 + $0x4] sm:$0xf]  ;;  %v4502_v36 = vld [vmem:[%s6748_s3 + $0x8] sm:$0xf] }
  0x74   : > { %1966 = vmatpush.bf16.msra.mxu0 %v5846_v12  ;;  %v5654_v37 = vld [vmem:[%s6748_s3 + $0x1c] sm:$0xf0]  ;;  %v5651_v38 = vld [vmem:[%s6748_s3 + $0xc] sm:$0xf]  ;;  %v4504_v39 = vld [vmem:[%s6748_s3 + $0x20] sm:$0xf0]  ;;  %v4495_v42 = vor.u32 %v5653_v33, %v4494_v32  ;;  %v4499_v43 = vor.u32 %v5650_v34, %v4496_v35 }
  0x75   : > { %2135 = vmatpush.bf16.msra.mxu1 %v5854_v13  ;;  %v5929_v40 = vld [vmem:[#allocation10 + $0x38] sm:$0xff]  ;;  %v4503_v44 = vor.u32 %v5654_v37, %v4502_v36  ;;  %v4507_v45 = vor.u32 %v5651_v38, %v4504_v39  ;;  %v4518_v47 = vld [vmem:[%s6748_s3 + $0x30] sm:$0xf]  ;;  %v5659_v48 = vld [vmem:[%s6748_s3 + $0x44] sm:$0xf0] }
  0x76   : > { %2304 = vmatpush.bf16.msra.mxu2 %v5862_v14  ;;  %v5889_v46 = vld [vmem:[#allocation7 + $0x178] sm:$0xff]  ;;  %v5656_v49 = vld [vmem:[%s6748_s3 + $0x34] sm:$0xf]  ;;  %v4520_v50 = vld [vmem:[%s6748_s3 + $0x48] sm:$0xf0]  ;;  %v4519_v55 = vor.u32 %v5659_v48, %v4518_v47 }
  0x77   : > { %2473 = vmatpush.bf16.msra.mxu3 %v5870_v15  ;;  %v4526_v51 = vld [vmem:[%s6748_s3 + $0x38] sm:$0xf]  ;;  %v5660_v52 = vld [vmem:[%s6748_s3 + $0x4c] sm:$0xf0]  ;;  %v5657_v53 = vld [vmem:[%s6748_s3 + $0x3c] sm:$0xf]  ;;  %v4523_v56 = vor.u32 %v5656_v49, %v4520_v50 }
  0x78   : > { %1967 = vmatpush.bf16.msra.mxu0 %v5845_v16  ;;  %v4528_v54 = vld [vmem:[%s6748_s3 + $0x50] sm:$0xf0]  ;;  %v4527_v57 = vor.u32 %v5660_v52, %v4526_v51  ;;  %v4542_v59 = vld [vmem:[%s6748_s3 + $0x60] sm:$0xf]  ;;  %v5665_v60 = vld [vmem:[%s6748_s3 + $0x74] sm:$0xf0] }
  0x79   : > { %2136 = vmatpush.bf16.msra.mxu1 %v5853_v17  ;;  %v4531_v58 = vor.u32 %v5657_v53, %v4528_v54  ;;  %v5662_v61 = vld [vmem:[%s6748_s3 + $0x64] sm:$0xf]  ;;  %v4544_v62 = vld [vmem:[%s6748_s3 + $0x78] sm:$0xf0]  ;;  %v4550_v63 = vld [vmem:[%s6748_s3 + $0x68] sm:$0xf]  ;;  %v4543_v3 = vor.u32 %v5665_v60, %v4542_v59 }
  0x7a   : > { %2305 = vmatpush.bf16.msra.mxu2 %v5861_v18  ;;  %v5666_v0 = vld [vmem:[%s6748_s3 + $0x7c] sm:$0xf0]  ;;  %v5663_v1 = vld [vmem:[%s6748_s3 + $0x6c] sm:$0xf]  ;;  %v4552_v2 = vld [vmem:[%s6748_s3 + $0x80] sm:$0xf0]  ;;  %v4547_v4 = vor.u32 %v5662_v61, %v4544_v62 }
  0x7b   : > { %2474 = vmatpush.bf16.msra.mxu3 %v5869_v19  ;;  %v4551_v5 = vor.u32 %v5666_v0, %v4550_v63  ;;  %v4555_v6 = vor.u32 %v5663_v1, %v4552_v2  ;;  %v5928_v7 = vld [vmem:[#allocation10 + $0x30] sm:$0xff]  ;;  %v5671_v11 = vld [vmem:[%s6748_s3 + $0xa4] sm:$0xf0]  ;;  %v4568_v13 = vld [vmem:[%s6748_s3 + $0xa8] sm:$0xf0] }
  0x7c   : > { %1968 = vmatpush.bf16.msra.mxu0 %v5844_v20  ;;  %v5880_v8 = vld [vmem:[#allocation7 + $0x130] sm:$0xff]  ;;  %v4574_v14 = vld [vmem:[%s6748_s3 + $0x98] sm:$0xf]  ;;  %v5669_v16 = vld [vmem:[%s6748_s3 + $0x9c] sm:$0xf] }
  0x7d   : > { %2137 = vmatpush.bf16.msra.mxu1 %v5852_v21  ;;  %v5888_v9 = vld [vmem:[#allocation7 + $0x170] sm:$0xff]  ;;  %v5683_v35 = vld [vmem:[%s6748_s3 + $0x104] sm:$0xf0]  ;;  %v4616_v37 = vld [vmem:[%s6748_s3 + $0x108] sm:$0xf0] }
  0x7e   : > { %2306 = vmatpush.bf16.msra.mxu2 %v5860_v22  ;;  %v4566_v10 = vld [vmem:[%s6748_s3 + $0x90] sm:$0xf]  ;;  %v5668_v12 = vld [vmem:[%s6748_s3 + $0x94] sm:$0xf]  ;;  %v4590_v22 = vld [vmem:[%s6748_s3 + $0xc0] sm:$0xf] }
  0x7f   : > { %2475 = vmatpush.bf16.msra.mxu3 %v5868_v23  ;;  %v5672_v15 = vld [vmem:[%s6748_s3 + $0xac] sm:$0xf0]  ;;  %v4576_v17 = vld [vmem:[%s6748_s3 + $0xb0] sm:$0xf0]  ;;  %v4567_v18 = vor.u32 %v5671_v11, %v4566_v10  ;;  %v4571_v19 = vor.u32 %v5668_v12, %v4568_v13  ;;  %v5677_v23 = vld [vmem:[%s6748_s3 + $0xd4] sm:$0xf0] }
  0x80   : > { %1969 = vmatpush.bf16.msra.mxu0 %v5843_v24  ;;  %v4575_v20 = vor.u32 %v5672_v15, %v4574_v14  ;;  %v4579_v21 = vor.u32 %v5669_v16, %v4576_v17  ;;  %v5674_v24 = vld [vmem:[%s6748_s3 + $0xc4] sm:$0xf]  ;;  %v4614_v34 = vld [vmem:[%s6748_s3 + $0xf0] sm:$0xf]  ;;  %v5680_v36 = vld [vmem:[%s6748_s3 + $0xf4] sm:$0xf] }
  0x81   : > { %2138 = vmatpush.bf16.msra.mxu1 %v5851_v25  ;;  %v4592_v25 = vld [vmem:[%s6748_s3 + $0xd8] sm:$0xf0]  ;;  %v4622_v38 = vld [vmem:[%s6748_s3 + $0xf8] sm:$0xf]  ;;  %v5684_v39 = vld [vmem:[%s6748_s3 + $0x10c] sm:$0xf0] }
  0x82   : > { %2307 = vmatpush.bf16.msra.mxu2 %v5859_v26  ;;  %v4598_v26 = vld [vmem:[%s6748_s3 + $0xc8] sm:$0xf]  ;;  %v5689_v47 = vld [vmem:[%s6748_s3 + $0x134] sm:$0xf0]  ;;  %v5686_v48 = vld [vmem:[%s6748_s3 + $0x124] sm:$0xf] }
  0x83   : > { %2476 = vmatpush.bf16.msra.mxu3 %v5867_v27  ;;  %v5678_v27 = vld [vmem:[%s6748_s3 + $0xdc] sm:$0xf0]  ;;  %v4640_v49 = vld [vmem:[%s6748_s3 + $0x138] sm:$0xf0]  ;;  %v4646_v50 = vld [vmem:[%s6748_s3 + $0x128] sm:$0xf] }
  0x84   : > { %1970 = vmatpush.bf16.msra.mxu0 %v5842_v28  ;;  %v5675_v28 = vld [vmem:[%s6748_s3 + $0xcc] sm:$0xf]  ;;  %v4599_v32 = vor.u32 %v5678_v27, %v4598_v26  ;;  %v5690_v51 = vld [vmem:[%s6748_s3 + $0x13c] sm:$0xf0]  ;;  %v4648_v53 = vld [vmem:[%s6748_s3 + $0x140] sm:$0xf0] }
  0x85   : > { %2139 = vmatpush.bf16.msra.mxu1 %v5850_v29  ;;  %v4600_v29 = vld [vmem:[%s6748_s3 + $0xe0] sm:$0xf0]  ;;  %v5687_v52 = vld [vmem:[%s6748_s3 + $0x12c] sm:$0xf]  ;;  %v4662_v60 = vld [vmem:[%s6748_s3 + $0x150] sm:$0xf] }
  0x86   : > { %2308 = vmatpush.bf16.msra.mxu2 %v5858_v30  ;;  %v4591_v30 = vor.u32 %v5677_v23, %v4590_v22  ;;  %v4603_v33 = vor.u32 %v5675_v28, %v4600_v29  ;;  %v5879_v59 = vld [vmem:[#allocation7 + $0x128] sm:$0xff]  ;;  %v5692_v63 = vld [vmem:[%s6748_s3 + $0x154] sm:$0xf]  ;;  %v4670_v1 = vld [vmem:[%s6748_s3 + $0x158] sm:$0xf] }
  0x87   : > { %2477 = vmatpush.bf16.msra.mxu3 %v5866_v31  ;;  %1971 = vmatmul.bf16.vlgmr.msra.gmra.mxu0 %v4495_v42  ;;  %v4595_v31 = vor.u32 %v5674_v24, %v4592_v25  ;;  %v4615_v42 = vor.u32 %v5683_v35, %v4614_v34  ;;  %v5695_v61 = vld [vmem:[%s6748_s3 + $0x164] sm:$0xf0]  ;;  %v4664_v0 = vld [vmem:[%s6748_s3 + $0x168] sm:$0xf0]  ;;  %v5696_v2 = vld [vmem:[%s6748_s3 + $0x16c] sm:$0xf0] }
  0x88   : > { %2639 = vmatpush.bf16.msrb.mxu0 %v5881_v41  ;;  %2140 = vmatmul.bf16.vlgmr.msra.gmra.mxu1 %v4499_v43  ;;  %v4624_v41 = vld [vmem:[%s6748_s3 + $0x110] sm:$0xf0]  ;;  %v4619_v43 = vor.u32 %v5680_v36, %v4616_v37  ;;  %v5887_v62 = vld [vmem:[#allocation7 + $0x168] sm:$0xff]  ;;  %v4686_v10 = vld [vmem:[%s6748_s3 + $0x180] sm:$0xf] }
  0x89   : > { %2309 = vmatmul.bf16.vlgmr.msra.gmra.mxu2 %v4503_v44  ;;  %2808 = vmatpush.bf16.msrb.mxu1 %v5889_v46  ;;  %v4623_v44 = vor.u32 %v5684_v39, %v4622_v38  ;;  %v4638_v46 = vld [vmem:[%s6748_s3 + $0x120] sm:$0xf]  ;;  %v5701_v11 = vld [vmem:[%s6748_s3 + $0x194] sm:$0xf0]  ;;  %v5698_v13 = vld [vmem:[%s6748_s3 + $0x184] sm:$0xf] }
  0x8a   : > { %3493 = vmatpush.bf16.msrb.mxu2 %v5929_v40  ;;  %2478 = vmatmul.bf16.vlgmr.msra.gmra.mxu3 %v4507_v45  ;;  %v5681_v40 = vld [vmem:[%s6748_s3 + $0xfc] sm:$0xf]  ;;  %v4639_v54 = vor.u32 %v5689_v47, %v4638_v46  ;;  %v4694_v15 = vld [vmem:[%s6748_s3 + $0x188] sm:$0xf]  ;;  %v5702_v16 = vld [vmem:[%s6748_s3 + $0x19c] sm:$0xf0] }
  0x8b   : > { %v4627_v45 = vor.u32 %v5681_v40, %v4624_v41  ;;  %v5937_v12 = vld [vmem:[#allocation13 + $0x38] sm:$0xff]  ;;  %v5699_v17 = vld [vmem:[%s6748_s3 + $0x18c] sm:$0xf]  ;;  %v4695_v23 = vor.u32 %v5702_v16, %v4694_v15  ;;  %v4710_v35 = vld [vmem:[%s6748_s3 + $0x1b0] sm:$0xf] }
  0x8c   : > { %2640 = vmatpush.bf16.msrb.mxu0 %v5880_v8  ;;  %v4688_v14 = vld [vmem:[%s6748_s3 + $0x198] sm:$0xf0]  ;;  %4014 = vmatpush.bf16.msrb.mxu3 %v5937_v12  ;;  %v5707_v36 = vld [vmem:[%s6748_s3 + $0x1c4] sm:$0xf0]  ;;  %v5704_v37 = vld [vmem:[%s6748_s3 + $0x1b4] sm:$0xf] }
  0x8d   : > { %2809 = vmatpush.bf16.msrb.mxu1 %v5888_v9  ;;  %v6840_v9 = vld [vmem:[#allocation8] ss:$0 sm:$0xff]  ;;  %v4712_v38 = vld [vmem:[%s6748_s3 + $0x1c8] sm:$0xf0]  ;;  %v4718_v39 = vld [vmem:[%s6748_s3 + $0x1b8] sm:$0xf] }
  0x8e   : > { %3494 = vmatpush.bf16.msrb.mxu2 %v5928_v7  ;;  %v4671_v7 = vor.u32 %v5696_v2, %v4670_v1  ;;  %v5708_v40 = vld [vmem:[%s6748_s3 + $0x1cc] sm:$0xf0]  ;;  %v5705_v41 = vld [vmem:[%s6748_s3 + $0x1bc] sm:$0xf]  ;;  %v4715_v46 = vor.u32 %v5704_v37, %v4712_v38  ;;  %v5710_v1 = vld [vmem:[%s6748_s3 + $0x1e4] sm:$0xf] }
  0x8f   : > { %v4736_v2 = vld [vmem:[%s6748_s3 + $0x1f8] sm:$0xf0]  ;;  %v5720_v37 = vld [vmem:[%s6748_s3 + $0x22c] sm:$0xf0] }
  0x90   : > { %2641 = vmatpush.bf16.msrb.mxu0 %v5879_v59  ;;  %v5717_v38 = vld [vmem:[%s6748_s3 + $0x21c] sm:$0xf] }
  0x91   : > { %2810 = vmatpush.bf16.msrb.mxu1 %v5887_v62 }
  0x97   : > { %1976 = vmatmul.bf16.gmra.mxu0 %v4519_v55  ;;  %v4643_v55 = vor.u32 %v5686_v48, %v4640_v49 }
  0x98   : > { %2145 = vmatmul.bf16.gmra.mxu1 %v4523_v56  ;;  %v4647_v56 = vor.u32 %v5690_v51, %v4646_v50  ;;  %v4719_v50 = vor.u32 %v5708_v40, %v4718_v39  ;;  %v4768_v39 = vld [vmem:[%s6748_s3 + $0x230] sm:$0xf0] }
  0x99   : > { %2314 = vmatmul.bf16.gmra.mxu2 %v4527_v57  ;;  %v4651_v57 = vor.u32 %v5687_v52, %v4648_v53 }
  0x9a   : > { %2483 = vmatmul.bf16.gmra.mxu3 %v4531_v58  ;;  %v5927_v58 = vld [vmem:[#allocation10 + $0x28] sm:$0xff] }
  0x9b   : > { %3495 = vmatpush.bf16.msrb.mxu2 %v5927_v58 }
  0xa7   : > { %1981 = vmatmul.bf16.gmra.mxu0 %v4543_v3  ;;  %v5693_v3 = vld [vmem:[%s6748_s3 + $0x15c] sm:$0xf] }
  0xa8   : > { %2150 = vmatmul.bf16.gmra.mxu1 %v4547_v4  ;;  %v4672_v4 = vld [vmem:[%s6748_s3 + $0x170] sm:$0xf0] }
  0xa9   : > { %2319 = vmatmul.bf16.gmra.mxu2 %v4551_v5  ;;  %v4663_v5 = vor.u32 %v5695_v61, %v4662_v60  ;;  %v4675_v8 = vor.u32 %v5693_v3, %v4672_v4  ;;  %v4742_v3 = vld [vmem:[%s6748_s3 + $0x1e8] sm:$0xf]  ;;  %v5714_v4 = vld [vmem:[%s6748_s3 + $0x1fc] sm:$0xf0] }
  0xaa   : > { %2488 = vmatmul.bf16.gmra.mxu3 %v4555_v6  ;;  %v4667_v6 = vor.u32 %v5692_v63, %v4664_v0  ;;  %v4734_v63 = vld [vmem:[%s6748_s3 + $0x1e0] sm:$0xf]  ;;  %v5713_v0 = vld [vmem:[%s6748_s3 + $0x1f4] sm:$0xf0]  ;;  %v4743_v15 = vor.u32 %v5714_v4, %v4742_v3  ;;  %v4790_v3 = vld [vmem:[%s6748_s3 + $0x248] sm:$0xf] }
  0xab   : > { %v5726_v4 = vld [vmem:[%s6748_s3 + $0x25c] sm:$0xf0] }
  0xb7   : > { %1986 = vmatmul.bf16.gmra.mxu0 %v4567_v18  ;;  %v4696_v18 = vld [vmem:[%s6748_s3 + $0x1a0] sm:$0xf0] }
  0xb8   : > { %2155 = vmatmul.bf16.gmra.mxu1 %v4571_v19  ;;  %v4687_v19 = vor.u32 %v5701_v11, %v4686_v10  ;;  %v4699_v24 = vor.u32 %v5699_v17, %v4696_v18  ;;  %v4735_v10 = vor.u32 %v5713_v0, %v4734_v63  ;;  %v4739_v11 = vor.u32 %v5710_v1, %v4736_v2  ;;  %v5725_v63 = vld [vmem:[%s6748_s3 + $0x254] sm:$0xf0]  ;;  %v5722_v1 = vld [vmem:[%s6748_s3 + $0x244] sm:$0xf]  ;;  %v4784_v2 = vld [vmem:[%s6748_s3 + $0x258] sm:$0xf0] }
  0xb9   : > { %2324 = vmatmul.bf16.gmra.mxu2 %v4575_v20  ;;  %v4691_v20 = vor.u32 %v5698_v13, %v4688_v14  ;;  %v5936_v0 = vld [vmem:[#allocation13 + $0x30] sm:$0xff] }
  0xba   : > { %2493 = vmatmul.bf16.gmra.mxu3 %v4579_v21 }
  0xbb   : > { %4015 = vmatpush.bf16.msrb.mxu3 %v5936_v0  ;;  %v5737_v0 = vld [vmem:[%s6748_s3 + $0x2b4] sm:$0xf0] }
  0xc7   : > { %1991 = vmatmul.bf16.gmra.mxu0 %v4591_v30 }
  0xc8   : > { %2160 = vmatmul.bf16.gmra.mxu1 %v4595_v31 }
  0xc9   : > { %2329 = vmatmul.bf16.gmra.mxu2 %v4599_v32 }
  0xca   : > { %2498 = vmatmul.bf16.gmra.mxu3 %v4603_v33 }
  0xd7   : > { %1996 = vmatmul.bf16.gmra.mxu0 %v4615_v42  ;;  %v4720_v42 = vld [vmem:[%s6748_s3 + $0x1d0] sm:$0xf0] }
  0xd8   : > { %2165 = vmatmul.bf16.gmra.mxu1 %v4619_v43  ;;  %v4723_v51 = vor.u32 %v5705_v41, %v4720_v42 }
  0xd9   : > { %2334 = vmatmul.bf16.gmra.mxu2 %v4623_v44 }
  0xda   : > { %2503 = vmatmul.bf16.gmra.mxu3 %v4627_v45  ;;  %v4711_v45 = vor.u32 %v5707_v36, %v4710_v35  ;;  %v4760_v35 = vld [vmem:[%s6748_s3 + $0x228] sm:$0xf0]  ;;  %v4766_v36 = vld [vmem:[%s6748_s3 + $0x218] sm:$0xf] }
  0xe7   : > { %2001 = vmatmul.bf16.gmra.mxu0 %v4639_v54 }
  0xe8   : > { %2170 = vmatmul.bf16.gmra.mxu1 %v4643_v55 }
  0xe9   : > { %2339 = vmatmul.bf16.gmra.mxu2 %v4647_v56 }
  0xea   : > { %2508 = vmatmul.bf16.gmra.mxu3 %v4651_v57 }
  0xf7   : > { %2006 = vmatmul.bf16.gmra.mxu0 %v4663_v5  ;;  %v5711_v5 = vld [vmem:[%s6748_s3 + $0x1ec] sm:$0xf] }
  0xf8   : > { %2175 = vmatmul.bf16.gmra.mxu1 %v4667_v6  ;;  %v4744_v6 = vld [vmem:[%s6748_s3 + $0x200] sm:$0xf0] }
  0xf9   : > { %2344 = vmatmul.bf16.gmra.mxu2 %v4671_v7  ;;  %v4747_v16 = vor.u32 %v5711_v5, %v4744_v6  ;;  %v5723_v5 = vld [vmem:[%s6748_s3 + $0x24c] sm:$0xf]  ;;  %v4792_v6 = vld [vmem:[%s6748_s3 + $0x260] sm:$0xf0] }
  0xfa   : > { %2513 = vmatmul.bf16.gmra.mxu3 %v4675_v8 }
 0x104   : > { %v1972_v21 = vpop.f32.mrf.mxu0 }
 0x105   : > { %v2141_v22 = vpop.f32.mrf.mxu1  ;;  %v1973_v25 = vadd.f32 %v6840_v9, %v1972_v21 }
 0x107   : > { %v2142_v26 = vadd.f32 %v2141_v22, %v1973_v25  ;;  %2011 = vmatmul.bf16.gmra.mxu0 %v4687_v19 }
 0x108   : > { %2180 = vmatmul.bf16.gmra.mxu1 %v4691_v20  ;;  %v5926_v20 = vld [vmem:[#allocation10 + $0x20] sm:$0xff] }
 0x109   : > { %2349 = vmatmul.bf16.gmra.mxu2 %v4695_v23 }
 0x10a   : > { %2518 = vmatmul.bf16.gmra.mxu3 %v4699_v24  ;;  %3496 = vmatpush.bf16.msrb.mxu2 %v5926_v20 }
 0x10c   : > { %v2310_v27 = vpop.f32.mrf.mxu2  ;;  %v1974_v30 = vpop.f32.mrf.mxu0 }
 0x10d   : > { %v2479_v28 = vpop.f32.mrf.mxu3  ;;  %v2311_v29 = vadd.f32 %v2310_v27, %v2142_v26  ;;  %v2143_v31 = vpop.f32.mrf.mxu1  ;;  %v1975_v32 = vadd.f32 %v6840_v9, %v1974_v30  ;;  %v5878_v26 = vld [vmem:[#allocation7 + $0x120] sm:$0xff]  ;;  %v4758_v30 = vld [vmem:[%s6748_s3 + $0x210] sm:$0xf] }
 0x10e   : > { %2642 = vmatpush.bf16.msrb.mxu0 %v5878_v26 }
 0x10f   : > { %v6852_v33 = vadd.f32 %v2479_v28, %v2311_v29  ;;  %v2144_v34 = vadd.f32 %v2143_v31, %v1975_v32  ;;  %v5719_v31 = vld [vmem:[%s6748_s3 + $0x224] sm:$0xf0]  ;;  %v5886_v32 = vld [vmem:[#allocation7 + $0x160] sm:$0xff] }
 0x110   : > { %2811 = vmatpush.bf16.msrb.mxu1 %v5886_v32  ;;  %v4759_v42 = vor.u32 %v5719_v31, %v4758_v30  ;;  %v4806_v30 = vld [vmem:[%s6748_s3 + $0x270] sm:$0xf]  ;;  %v5731_v31 = vld [vmem:[%s6748_s3 + $0x284] sm:$0xf0]  ;;  %v5728_v32 = vld [vmem:[%s6748_s3 + $0x274] sm:$0xf] }
 0x114   : > { %v2312_v43 = vpop.f32.mrf.mxu2  ;;  %v1977_v48 = vpop.f32.mrf.mxu0 }
 0x115   : > { %v2481_v44 = vpop.f32.mrf.mxu3  ;;  %v2313_v47 = vadd.f32 %v2312_v43, %v2144_v34  ;;  %v2146_v49 = vpop.f32.mrf.mxu1  ;;  %v1978_v52 = vadd.f32 %v6840_v9, %v1977_v48  ;;  %v5716_v34 = vld [vmem:[%s6748_s3 + $0x214] sm:$0xf]  ;;  %v4771_v48 = vor.u32 %v5717_v38, %v4768_v39 }
 0x116   : > { %v4763_v43 = vor.u32 %v5716_v34, %v4760_v35  ;;  %v4808_v34 = vld [vmem:[%s6748_s3 + $0x288] sm:$0xf0]  ;;  %v4814_v35 = vld [vmem:[%s6748_s3 + $0x278] sm:$0xf]  ;;  %v4816_v38 = vld [vmem:[%s6748_s3 + $0x290] sm:$0xf0] }
 0x117   : > { %v6863_v53 = vadd.f32 %v2481_v44, %v2313_v47  ;;  %v2147_v54 = vadd.f32 %v2146_v49, %v1978_v52  ;;  %2016 = vmatmul.bf16.gmra.mxu0 %v4711_v45  ;;  %v4767_v47 = vor.u32 %v5720_v37, %v4766_v36  ;;  %v5732_v36 = vld [vmem:[%s6748_s3 + $0x28c] sm:$0xf0]  ;;  %v5729_v37 = vld [vmem:[%s6748_s3 + $0x27c] sm:$0xf] }
 0x118   : > { %2185 = vmatmul.bf16.gmra.mxu1 %v4715_v46 }
 0x119   : > { %2354 = vmatmul.bf16.gmra.mxu2 %v4719_v50 }
 0x11a   : > { %2523 = vmatmul.bf16.gmra.mxu3 %v4723_v51 }
 0x11c   : > { %v2315_v55 = vpop.f32.mrf.mxu2  ;;  %v1979_v58 = vpop.f32.mrf.mxu0 }
 0x11d   : > { %v2484_v56 = vpop.f32.mrf.mxu3  ;;  %v2316_v57 = vadd.f32 %v2315_v55, %v2147_v54  ;;  %v2148_v59 = vpop.f32.mrf.mxu1  ;;  %v1980_v60 = vadd.f32 %v6840_v9, %v1979_v58 }
 0x11f   : > { %v6866_v61 = vadd.f32 %v2484_v56, %v2316_v57  ;;  %v2149_v62 = vadd.f32 %v2148_v59, %v1980_v60 }
 0x124   : > { %v2317_v7 = vpop.f32.mrf.mxu2  ;;  %v1982_v13 = vpop.f32.mrf.mxu0 }
 0x125   : > { %v2486_v8 = vpop.f32.mrf.mxu3  ;;  %v2318_v12 = vadd.f32 %v2317_v7, %v2149_v62  ;;  %v2151_v14 = vpop.f32.mrf.mxu1  ;;  %v1983_v17 = vadd.f32 %v6840_v9, %v1982_v13  ;;  %v4782_v62 = vld [vmem:[%s6748_s3 + $0x240] sm:$0xf] }
 0x127   : > { %v6877_v18 = vadd.f32 %v2486_v8, %v2318_v12  ;;  %v2152_v19 = vadd.f32 %v2151_v14, %v1983_v17  ;;  %2021 = vmatmul.bf16.gmra.mxu0 %v4735_v10  ;;  %v4783_v10 = vor.u32 %v5725_v63, %v4782_v62  ;;  %v4830_v63 = vld [vmem:[%s6748_s3 + $0x2a0] sm:$0xf] }
 0x128   : > { %2190 = vmatmul.bf16.gmra.mxu1 %v4739_v11  ;;  %v4787_v11 = vor.u32 %v5722_v1, %v4784_v2  ;;  %v5734_v1 = vld [vmem:[%s6748_s3 + $0x2a4] sm:$0xf]  ;;  %v4832_v2 = vld [vmem:[%s6748_s3 + $0x2b8] sm:$0xf0] }
 0x129   : > { %2359 = vmatmul.bf16.gmra.mxu2 %v4743_v15  ;;  %v4791_v15 = vor.u32 %v5726_v4, %v4790_v3  ;;  %v4838_v3 = vld [vmem:[%s6748_s3 + $0x2a8] sm:$0xf]  ;;  %v5738_v4 = vld [vmem:[%s6748_s3 + $0x2bc] sm:$0xf0] }
 0x12a   : > { %2528 = vmatmul.bf16.gmra.mxu3 %v4747_v16  ;;  %v4795_v16 = vor.u32 %v5723_v5, %v4792_v6  ;;  %v5735_v5 = vld [vmem:[%s6748_s3 + $0x2ac] sm:$0xf]  ;;  %v4840_v6 = vld [vmem:[%s6748_s3 + $0x2c0] sm:$0xf0] }
 0x12c   : > { %v2320_v21 = vpop.f32.mrf.mxu2  ;;  %v1984_v24 = vpop.f32.mrf.mxu0 }
 0x12d   : > { %v2489_v22 = vpop.f32.mrf.mxu3  ;;  %v2321_v23 = vadd.f32 %v2320_v21, %v2152_v19  ;;  %v2153_v25 = vpop.f32.mrf.mxu1  ;;  %v1985_v27 = vadd.f32 %v6840_v9, %v1984_v24 }
 0x12f   : > { %v6880_v28 = vadd.f32 %v2489_v22, %v2321_v23  ;;  %v2154_v29 = vadd.f32 %v2153_v25, %v1985_v27 }
 0x134   : > { %v2322_v40 = vpop.f32.mrf.mxu2  ;;  %v1987_v45 = vpop.f32.mrf.mxu0 }
 0x135   : > { %v2491_v41 = vpop.f32.mrf.mxu3  ;;  %v2323_v44 = vadd.f32 %v2322_v40, %v2154_v29  ;;  %v2156_v46 = vpop.f32.mrf.mxu1  ;;  %v1988_v49 = vadd.f32 %v6840_v9, %v1987_v45 }
 0x137   : > { %v6891_v50 = vadd.f32 %v2491_v41, %v2323_v44  ;;  %v2157_v51 = vadd.f32 %v2156_v46, %v1988_v49  ;;  %2026 = vmatmul.bf16.gmra.mxu0 %v4759_v42  ;;  %v4807_v41 = vor.u32 %v5731_v31, %v4806_v30  ;;  %v4811_v42 = vor.u32 %v5728_v32, %v4808_v34  ;;  %v5877_v30 = vld [vmem:[#allocation7 + $0x118] sm:$0xff] }
 0x138   : > { %2195 = vmatmul.bf16.gmra.mxu1 %v4763_v43  ;;  %v4815_v46 = vor.u32 %v5732_v36, %v4814_v35  ;;  %2643 = vmatpush.bf16.msrb.mxu0 %v5877_v30  ;;  %v4854_v35 = vld [vmem:[%s6748_s3 + $0x2d0] sm:$0xf]  ;;  %v5743_v36 = vld [vmem:[%s6748_s3 + $0x2e4] sm:$0xf0] }
 0x139   : > { %2364 = vmatmul.bf16.gmra.mxu2 %v4767_v47  ;;  %v4819_v47 = vor.u32 %v5729_v37, %v4816_v38  ;;  %v5885_v37 = vld [vmem:[#allocation7 + $0x158] sm:$0xff]  ;;  %v5740_v38 = vld [vmem:[%s6748_s3 + $0x2d4] sm:$0xf] }
 0x13a   : > { %2533 = vmatmul.bf16.gmra.mxu3 %v4771_v48  ;;  %2812 = vmatpush.bf16.msrb.mxu1 %v5885_v37 }
 0x13c   : > { %v2325_v52 = vpop.f32.mrf.mxu2  ;;  %v1989_v56 = vpop.f32.mrf.mxu0 }
 0x13d   : > { %v2494_v54 = vpop.f32.mrf.mxu3  ;;  %v2326_v55 = vadd.f32 %v2325_v52, %v2157_v51  ;;  %v2158_v57 = vpop.f32.mrf.mxu1  ;;  %v1990_v58 = vadd.f32 %v6840_v9, %v1989_v56 }
 0x13f   : > { %v6894_v59 = vadd.f32 %v2494_v54, %v2326_v55  ;;  %v2159_v60 = vadd.f32 %v2158_v57, %v1990_v58 }
 0x144   : > { %v2327_v7 = vpop.f32.mrf.mxu2  ;;  %v1992_v13 = vpop.f32.mrf.mxu0 }
 0x145   : > { %v2496_v8 = vpop.f32.mrf.mxu3  ;;  %v2328_v12 = vadd.f32 %v2327_v7, %v2159_v60  ;;  %v2161_v14 = vpop.f32.mrf.mxu1  ;;  %v1993_v17 = vadd.f32 %v6840_v9, %v1992_v13 }
 0x147   : > { %v6905_v19 = vadd.f32 %v2496_v8, %v2328_v12  ;;  %v2162_v20 = vadd.f32 %v2161_v14, %v1993_v17  ;;  %2031 = vmatmul.bf16.gmra.mxu0 %v4783_v10  ;;  %v4831_v10 = vor.u32 %v5737_v0, %v4830_v63 }
 0x148   : > { %2200 = vmatmul.bf16.gmra.mxu1 %v4787_v11  ;;  %v4835_v11 = vor.u32 %v5734_v1, %v4832_v2 }
 0x149   : > { %2369 = vmatmul.bf16.gmra.mxu2 %v4791_v15  ;;  %v4839_v15 = vor.u32 %v5738_v4, %v4838_v3 }
 0x14a   : > { %2538 = vmatmul.bf16.gmra.mxu3 %v4795_v16  ;;  %v4843_v16 = vor.u32 %v5735_v5, %v4840_v6  ;;  %v4878_v6 = vld [vmem:[%s6748_s3 + $0x300] sm:$0xf] }
 0x14c   : > { %v2330_v21 = vpop.f32.mrf.mxu2  ;;  %v1994_v24 = vpop.f32.mrf.mxu0 }
 0x14d   : > { %v2499_v22 = vpop.f32.mrf.mxu3  ;;  %v2331_v23 = vadd.f32 %v2330_v21, %v2162_v20  ;;  %v2163_v25 = vpop.f32.mrf.mxu1  ;;  %v1995_v26 = vadd.f32 %v6840_v9, %v1994_v24 }
 0x14f   : > { %v6908_v27 = vadd.f32 %v2499_v22, %v2331_v23  ;;  %v2164_v29 = vadd.f32 %v2163_v25, %v1995_v26  ;;  %v5925_v22 = vld [vmem:[#allocation10 + $0x18] sm:$0xff] }
 0x150   : > { %3497 = vmatpush.bf16.msrb.mxu2 %v5925_v22 }
 0x154   : > { %v2332_v39 = vpop.f32.mrf.mxu2  ;;  %v1997_v44 = vpop.f32.mrf.mxu0 }
 0x155   : > { %v2501_v40 = vpop.f32.mrf.mxu3  ;;  %v2333_v43 = vadd.f32 %v2332_v39, %v2164_v29  ;;  %v2166_v45 = vpop.f32.mrf.mxu1  ;;  %v1998_v48 = vadd.f32 %v6840_v9, %v1997_v44  ;;  %v4856_v39 = vld [vmem:[%s6748_s3 + $0x2e8] sm:$0xf0] }
 0x157   : > { %v6919_v49 = vadd.f32 %v2501_v40, %v2333_v43  ;;  %v2167_v51 = vadd.f32 %v2166_v45, %v1998_v48  ;;  %2036 = vmatmul.bf16.gmra.mxu0 %v4807_v41  ;;  %v4862_v40 = vld [vmem:[%s6748_s3 + $0x2d8] sm:$0xf]  ;;  %v5744_v41 = vld [vmem:[%s6748_s3 + $0x2ec] sm:$0xf0]  ;;  %v4864_v43 = vld [vmem:[%s6748_s3 + $0x2f0] sm:$0xf0] }
 0x158   : > { %2205 = vmatmul.bf16.gmra.mxu1 %v4811_v42  ;;  %v5741_v42 = vld [vmem:[%s6748_s3 + $0x2dc] sm:$0xf] }
 0x159   : > { %2374 = vmatmul.bf16.gmra.mxu2 %v4815_v46  ;;  %v4855_v46 = vor.u32 %v5743_v36, %v4854_v35 }
 0x15a   : > { %2543 = vmatmul.bf16.gmra.mxu3 %v4819_v47  ;;  %v4859_v47 = vor.u32 %v5740_v38, %v4856_v39 }
 0x15c   : > { %v2335_v52 = vpop.f32.mrf.mxu2  ;;  %v1999_v56 = vpop.f32.mrf.mxu0 }
 0x15d   : > { %v2504_v54 = vpop.f32.mrf.mxu3  ;;  %v2336_v55 = vadd.f32 %v2335_v52, %v2167_v51  ;;  %v2168_v57 = vpop.f32.mrf.mxu1  ;;  %v2000_v58 = vadd.f32 %v6840_v9, %v1999_v56 }
 0x15f   : > { %v6922_v60 = vadd.f32 %v2504_v54, %v2336_v55  ;;  %v2169_v62 = vadd.f32 %v2168_v57, %v2000_v58  ;;  %v4863_v54 = vor.u32 %v5744_v41, %v4862_v40  ;;  %v4867_v55 = vor.u32 %v5741_v42, %v4864_v43  ;;  %v4902_v43 = vld [vmem:[%s6748_s3 + $0x330] sm:$0xf] }
 0x164   : > { %v2337_v7 = vpop.f32.mrf.mxu2  ;;  %v2002_v13 = vpop.f32.mrf.mxu0 }
 0x165   : > { %v2506_v8 = vpop.f32.mrf.mxu3  ;;  %v2338_v12 = vadd.f32 %v2337_v7, %v2169_v62  ;;  %v2171_v14 = vpop.f32.mrf.mxu1  ;;  %v2003_v17 = vadd.f32 %v6840_v9, %v2002_v13  ;;  %v5749_v7 = vld [vmem:[%s6748_s3 + $0x314] sm:$0xf0]  ;;  %v5750_v13 = vld [vmem:[%s6748_s3 + $0x31c] sm:$0xf0] }
 0x167   : > { %v6933_v20 = vadd.f32 %v2506_v8, %v2338_v12  ;;  %v2172_v21 = vadd.f32 %v2171_v14, %v2003_v17  ;;  %2041 = vmatmul.bf16.gmra.mxu0 %v4831_v10  ;;  %v5935_v8 = vld [vmem:[#allocation13 + $0x28] sm:$0xff]  ;;  %v5746_v10 = vld [vmem:[%s6748_s3 + $0x304] sm:$0xf]  ;;  %v4886_v12 = vld [vmem:[%s6748_s3 + $0x308] sm:$0xf] }
 0x168   : > { %2210 = vmatmul.bf16.gmra.mxu1 %v4835_v11  ;;  %v4880_v11 = vld [vmem:[%s6748_s3 + $0x318] sm:$0xf0]  ;;  %v5747_v14 = vld [vmem:[%s6748_s3 + $0x30c] sm:$0xf]  ;;  %4016 = vmatpush.bf16.msrb.mxu3 %v5935_v8 }
 0x169   : > { %2379 = vmatmul.bf16.gmra.mxu2 %v4839_v15  ;;  %v4888_v15 = vld [vmem:[%s6748_s3 + $0x320] sm:$0xf0]  ;;  %v4883_v22 = vor.u32 %v5746_v10, %v4880_v11 }
 0x16a   : > { %2548 = vmatmul.bf16.gmra.mxu3 %v4843_v16 }
 0x16c   : > { %v2340_v23 = vpop.f32.mrf.mxu2  ;;  %v2004_v26 = vpop.f32.mrf.mxu0 }
 0x16d   : > { %v2509_v24 = vpop.f32.mrf.mxu3  ;;  %v2341_v25 = vadd.f32 %v2340_v23, %v2172_v21  ;;  %v2173_v29 = vpop.f32.mrf.mxu1  ;;  %v2005_v31 = vadd.f32 %v6840_v9, %v2004_v26  ;;  %v4879_v21 = vor.u32 %v5749_v7, %v4878_v6  ;;  %v4887_v26 = vor.u32 %v5750_v13, %v4886_v12 }
 0x16f   : > { %v6936_v32 = vadd.f32 %v2509_v24, %v2341_v25  ;;  %v2174_v34 = vadd.f32 %v2173_v29, %v2005_v31  ;;  %v4891_v29 = vor.u32 %v5747_v14, %v4888_v15 }
 0x174   : > { %v2342_v44 = vpop.f32.mrf.mxu2  ;;  %v2007_v51 = vpop.f32.mrf.mxu0 }
 0x175   : > { %v2511_v45 = vpop.f32.mrf.mxu3  ;;  %v2343_v48 = vadd.f32 %v2342_v44, %v2174_v34  ;;  %v2176_v52 = vpop.f32.mrf.mxu1  ;;  %v2008_v56 = vadd.f32 %v6840_v9, %v2007_v51  ;;  %v5755_v44 = vld [vmem:[%s6748_s3 + $0x344] sm:$0xf0]  ;;  %v5753_v51 = vld [vmem:[%s6748_s3 + $0x33c] sm:$0xf] }
 0x177   : > { %v6947_v57 = vadd.f32 %v2511_v45, %v2343_v48  ;;  %v2177_v58 = vadd.f32 %v2176_v52, %v2008_v56  ;;  %2046 = vmatmul.bf16.gmra.mxu0 %v4855_v46  ;;  %v5752_v45 = vld [vmem:[%s6748_s3 + $0x334] sm:$0xf]  ;;  %v4904_v46 = vld [vmem:[%s6748_s3 + $0x348] sm:$0xf0]  ;;  %v5756_v48 = vld [vmem:[%s6748_s3 + $0x34c] sm:$0xf0]  ;;  %v4903_v56 = vor.u32 %v5755_v44, %v4902_v43 }
 0x178   : > { %2215 = vmatmul.bf16.gmra.mxu1 %v4859_v47  ;;  %v4910_v47 = vld [vmem:[%s6748_s3 + $0x338] sm:$0xf]  ;;  %v4912_v52 = vld [vmem:[%s6748_s3 + $0x350] sm:$0xf0] }
 0x179   : > { %2384 = vmatmul.bf16.gmra.mxu2 %v4863_v54 }
 0x17a   : > { %2553 = vmatmul.bf16.gmra.mxu3 %v4867_v55 }
 0x17c   : > { %v2345_v62 = vpop.f32.mrf.mxu2  ;;  %v2009_v1 = vpop.f32.mrf.mxu0 }
 0x17d   : > { %v2514_v63 = vpop.f32.mrf.mxu3  ;;  %v2346_v0 = vadd.f32 %v2345_v62, %v2177_v58  ;;  %v2178_v2 = vpop.f32.mrf.mxu1  ;;  %v2010_v3 = vadd.f32 %v6840_v9, %v2009_v1  ;;  %v4907_v58 = vor.u32 %v5752_v45, %v4904_v46  ;;  %v4911_v1 = vor.u32 %v5756_v48, %v4910_v47  ;;  %v5924_v45 = vld [vmem:[#allocation10 + $0x10] sm:$0xff] }
 0x17e   : > { %3498 = vmatpush.bf16.msrb.mxu2 %v5924_v45  ;;  %v4976_v45 = vld [vmem:[%s6748_s3 + $0x3d8] sm:$0xf0] }
 0x17f   : > { %v6950_v4 = vadd.f32 %v2514_v63, %v2346_v0  ;;  %v2179_v5 = vadd.f32 %v2178_v2, %v2010_v3  ;;  %v4915_v2 = vor.u32 %v5753_v51, %v4912_v52 }
 0x184   : > { %v2347_v16 = vpop.f32.mrf.mxu2  ;;  %v2012_v24 = vpop.f32.mrf.mxu0 }
 0x185   : > { %v2516_v17 = vpop.f32.mrf.mxu3  ;;  %v2348_v23 = vadd.f32 %v2347_v16, %v2179_v5  ;;  %v2181_v25 = vpop.f32.mrf.mxu1  ;;  %v2013_v30 = vadd.f32 %v6840_v9, %v2012_v24  ;;  %v4926_v16 = vld [vmem:[%s6748_s3 + $0x360] sm:$0xf] }
 0x186   : > { %v5762_v24 = vld [vmem:[%s6748_s3 + $0x37c] sm:$0xf0] }
 0x187   : > { %v6961_v31 = vadd.f32 %v2516_v17, %v2348_v23  ;;  %v2182_v34 = vadd.f32 %v2181_v25, %v2013_v30  ;;  %2051 = vmatmul.bf16.gmra.mxu0 %v4879_v21  ;;  %v5761_v17 = vld [vmem:[%s6748_s3 + $0x374] sm:$0xf0]  ;;  %v5758_v21 = vld [vmem:[%s6748_s3 + $0x364] sm:$0xf]  ;;  %v4934_v23 = vld [vmem:[%s6748_s3 + $0x368] sm:$0xf] }
 0x188   : > { %2220 = vmatmul.bf16.gmra.mxu1 %v4883_v22  ;;  %v4928_v22 = vld [vmem:[%s6748_s3 + $0x378] sm:$0xf0]  ;;  %v5759_v25 = vld [vmem:[%s6748_s3 + $0x36c] sm:$0xf] }
 0x189   : > { %2389 = vmatmul.bf16.gmra.mxu2 %v4887_v26  ;;  %v4936_v26 = vld [vmem:[%s6748_s3 + $0x380] sm:$0xf0] }
 0x18a   : > { %2558 = vmatmul.bf16.gmra.mxu3 %v4891_v29 }
 0x18c   : > { %v2350_v35 = vpop.f32.mrf.mxu2  ;;  %v2014_v38 = vpop.f32.mrf.mxu0 }
 0x18d   : > { %v2519_v36 = vpop.f32.mrf.mxu3  ;;  %v2351_v37 = vadd.f32 %v2350_v35, %v2182_v34  ;;  %v2183_v39 = vpop.f32.mrf.mxu1  ;;  %v2015_v40 = vadd.f32 %v6840_v9, %v2014_v38  ;;  %v4927_v34 = vor.u32 %v5761_v17, %v4926_v16  ;;  %v4931_v35 = vor.u32 %v5758_v21, %v4928_v22 }
 0x18f   : > { %v6964_v41 = vadd.f32 %v2519_v36, %v2351_v37  ;;  %v2184_v42 = vadd.f32 %v2183_v39, %v2015_v40  ;;  %v4935_v39 = vor.u32 %v5762_v24, %v4934_v23  ;;  %v4939_v40 = vor.u32 %v5759_v25, %v4936_v26 }
 0x194   : > { %v2352_v54 = vpop.f32.mrf.mxu2  ;;  %v2017_v63 = vpop.f32.mrf.mxu0 }
 0x195   : > { %v2521_v55 = vpop.f32.mrf.mxu3  ;;  %v2353_v62 = vadd.f32 %v2352_v54, %v2184_v42  ;;  %v2186_v0 = vpop.f32.mrf.mxu1  ;;  %v2018_v3 = vadd.f32 %v6840_v9, %v2017_v63  ;;  %v5876_v54 = vld [vmem:[#allocation7 + $0x110] sm:$0xff]  ;;  %v5767_v63 = vld [vmem:[%s6748_s3 + $0x3a4] sm:$0xf0] }
 0x196   : > { %2644 = vmatpush.bf16.msrb.mxu0 %v5876_v54 }
 0x197   : > { %v6975_v5 = vadd.f32 %v2521_v55, %v2353_v62  ;;  %v2187_v6 = vadd.f32 %v2186_v0, %v2018_v3  ;;  %2056 = vmatmul.bf16.gmra.mxu0 %v4903_v56  ;;  %v4950_v62 = vld [vmem:[%s6748_s3 + $0x390] sm:$0xf]  ;;  %v4958_v3 = vld [vmem:[%s6748_s3 + $0x398] sm:$0xf] }
 0x198   : > { %2225 = vmatmul.bf16.gmra.mxu1 %v4907_v58  ;;  %v5884_v0 = vld [vmem:[#allocation7 + $0x150] sm:$0xff] }
 0x199   : > { %2394 = vmatmul.bf16.gmra.mxu2 %v4911_v1  ;;  %v5764_v1 = vld [vmem:[%s6748_s3 + $0x394] sm:$0xf]  ;;  %2813 = vmatpush.bf16.msrb.mxu1 %v5884_v0 }
 0x19a   : > { %2563 = vmatmul.bf16.gmra.mxu3 %v4915_v2  ;;  %v4952_v2 = vld [vmem:[%s6748_s3 + $0x3a8] sm:$0xf0] }
 0x19c   : > { %v2355_v7 = vpop.f32.mrf.mxu2  ;;  %v2019_v11 = vpop.f32.mrf.mxu0 }
 0x19d   : > { %v2524_v8 = vpop.f32.mrf.mxu3  ;;  %v2356_v10 = vadd.f32 %v2355_v7, %v2187_v6  ;;  %v2188_v12 = vpop.f32.mrf.mxu1  ;;  %v2020_v13 = vadd.f32 %v6840_v9, %v2019_v11  ;;  %v5768_v6 = vld [vmem:[%s6748_s3 + $0x3ac] sm:$0xf0]  ;;  %v5765_v7 = vld [vmem:[%s6748_s3 + $0x39c] sm:$0xf] }
 0x19e   : > { %v4959_v21 = vor.u32 %v5768_v6, %v4958_v3 }
 0x19f   : > { %v6978_v14 = vadd.f32 %v2524_v8, %v2356_v10  ;;  %v2189_v15 = vadd.f32 %v2188_v12, %v2020_v13  ;;  %v4960_v8 = vld [vmem:[%s6748_s3 + $0x3b0] sm:$0xf0]  ;;  %v4951_v12 = vor.u32 %v5767_v63, %v4950_v62  ;;  %v4955_v13 = vor.u32 %v5764_v1, %v4952_v2 }
 0x1a0   : > { %v4963_v22 = vor.u32 %v5765_v7, %v4960_v8 }
 0x1a4   : > { %v2357_v29 = vpop.f32.mrf.mxu2  ;;  %v2022_v37 = vpop.f32.mrf.mxu0 }
 0x1a5   : > { %v2526_v30 = vpop.f32.mrf.mxu3  ;;  %v2358_v36 = vadd.f32 %v2357_v29, %v2189_v15  ;;  %v2191_v38 = vpop.f32.mrf.mxu1  ;;  %v2023_v42 = vadd.f32 %v6840_v9, %v2022_v37 }
 0x1a7   : > { %v6989_v43 = vadd.f32 %v2526_v30, %v2358_v36  ;;  %v2192_v44 = vadd.f32 %v2191_v38, %v2023_v42  ;;  %2061 = vmatmul.bf16.gmra.mxu0 %v4927_v34  ;;  %v5934_v42 = vld [vmem:[#allocation13 + $0x20] sm:$0xff] }
 0x1a8   : > { %2230 = vmatmul.bf16.gmra.mxu1 %v4931_v35  ;;  %4017 = vmatpush.bf16.msrb.mxu3 %v5934_v42 }
 0x1a9   : > { %2399 = vmatmul.bf16.gmra.mxu2 %v4935_v39  ;;  %v4974_v39 = vld [vmem:[%s6748_s3 + $0x3c0] sm:$0xf] }
 0x1aa   : > { %2568 = vmatmul.bf16.gmra.mxu3 %v4939_v40  ;;  %v5773_v40 = vld [vmem:[%s6748_s3 + $0x3d4] sm:$0xf0] }
 0x1ac   : > { %v2360_v46 = vpop.f32.mrf.mxu2  ;;  %v2024_v51 = vpop.f32.mrf.mxu0 }
 0x1ad   : > { %v2529_v47 = vpop.f32.mrf.mxu3  ;;  %v2361_v48 = vadd.f32 %v2360_v46, %v2192_v44  ;;  %v2193_v52 = vpop.f32.mrf.mxu1  ;;  %v2025_v55 = vadd.f32 %v6840_v9, %v2024_v51  ;;  %v5770_v44 = vld [vmem:[%s6748_s3 + $0x3c4] sm:$0xf]  ;;  %v4982_v46 = vld [vmem:[%s6748_s3 + $0x3c8] sm:$0xf] }
 0x1ae   : > { %v4984_v51 = vld [vmem:[%s6748_s3 + $0x3e0] sm:$0xf0] }
 0x1af   : > { %v6992_v56 = vadd.f32 %v2529_v47, %v2361_v48  ;;  %v2194_v58 = vadd.f32 %v2193_v52, %v2025_v55  ;;  %v5774_v47 = vld [vmem:[%s6748_s3 + $0x3dc] sm:$0xf0]  ;;  %v5771_v48 = vld [vmem:[%s6748_s3 + $0x3cc] sm:$0xf]  ;;  %v4975_v55 = vor.u32 %v5773_v40, %v4974_v39 }
 0x1b0   : > { %v4983_v1 = vor.u32 %v5774_v47, %v4982_v46  ;;  %v4987_v2 = vor.u32 %v5771_v48, %v4984_v51 }
 0x1b4   : > { %v2362_v10 = vpop.f32.mrf.mxu2  ;;  %v2027_v16 = vpop.f32.mrf.mxu0 }
 0x1b5   : > { %v2531_v11 = vpop.f32.mrf.mxu3  ;;  %v2363_v15 = vadd.f32 %v2362_v10, %v2194_v58  ;;  %v2196_v17 = vpop.f32.mrf.mxu1  ;;  %v2028_v23 = vadd.f32 %v6840_v9, %v2027_v16  ;;  %v4979_v58 = vor.u32 %v5770_v44, %v4976_v45 }
 0x1b7   : > { %v7003_v24 = vadd.f32 %v2531_v11, %v2363_v15  ;;  %v2197_v25 = vadd.f32 %v2196_v17, %v2028_v23  ;;  %2066 = vmatmul.bf16.gmra.mxu0 %v4951_v12  ;;  %v5776_v23 = vld [vmem:[%s6748_s3 + $0x3f4] sm:$0xf] }
 0x1b8   : > { %2235 = vmatmul.bf16.gmra.mxu1 %v4955_v13 }
 0x1b9   : > { %2404 = vmatmul.bf16.gmra.mxu2 %v4959_v21  ;;  %v4998_v21 = vld [vmem:[%s6748_s3 + $0x3f0] sm:$0xf] }
 0x1ba   : > { %2573 = vmatmul.bf16.gmra.mxu3 %v4963_v22  ;;  %v5779_v22 = vld [vmem:[%s6748_s3 + $0x404] sm:$0xf0] }
 0x1bc   : > { %v2365_v26 = vpop.f32.mrf.mxu2  ;;  %v2029_v34 = vpop.f32.mrf.mxu0 }
 0x1bd   : > { %v2534_v29 = vpop.f32.mrf.mxu3  ;;  %v2366_v30 = vadd.f32 %v2365_v26, %v2197_v25  ;;  %v2198_v35 = vpop.f32.mrf.mxu1  ;;  %v2030_v36 = vadd.f32 %v6840_v9, %v2029_v34  ;;  %v5000_v25 = vld [vmem:[%s6748_s3 + $0x408] sm:$0xf0]  ;;  %v5006_v26 = vld [vmem:[%s6748_s3 + $0x3f8] sm:$0xf]  ;;  %v5008_v34 = vld [vmem:[%s6748_s3 + $0x410] sm:$0xf0] }
 0x1be   : > { %v5003_v39 = vor.u32 %v5776_v23, %v5000_v25 }
 0x1bf   : > { %v7006_v37 = vadd.f32 %v2534_v29, %v2366_v30  ;;  %v2199_v38 = vadd.f32 %v2198_v35, %v2030_v36  ;;  %v5780_v29 = vld [vmem:[%s6748_s3 + $0x40c] sm:$0xf0]  ;;  %v5777_v30 = vld [vmem:[%s6748_s3 + $0x3fc] sm:$0xf] }
 0x1c0   : > { %v5007_v45 = vor.u32 %v5780_v29, %v5006_v26  ;;  %v5011_v46 = vor.u32 %v5777_v30, %v5008_v34 }
 0x1c4   : > { %v2367_v52 = vpop.f32.mrf.mxu2  ;;  %v2032_v63 = vpop.f32.mrf.mxu0 }
 0x1c5   : > { %v2536_v54 = vpop.f32.mrf.mxu3  ;;  %v2368_v62 = vadd.f32 %v2367_v52, %v2199_v38  ;;  %v2201_v0 = vpop.f32.mrf.mxu1  ;;  %v2033_v3 = vadd.f32 %v6840_v9, %v2032_v63  ;;  %v4999_v38 = vor.u32 %v5779_v22, %v4998_v21 }
 0x1c7   : > { %v7017_v6 = vadd.f32 %v2536_v54, %v2368_v62  ;;  %v2202_v7 = vadd.f32 %v2201_v0, %v2033_v3  ;;  %2071 = vmatmul.bf16.gmra.mxu0 %v4975_v55  ;;  %v5785_v3 = vld [vmem:[%s6748_s3 + $0x434] sm:$0xf0] }
 0x1c8   : > { %2240 = vmatmul.bf16.gmra.mxu1 %v4979_v58 }
 0x1c9   : > { %2409 = vmatmul.bf16.gmra.mxu2 %v4983_v1 }
 0x1ca   : > { %2578 = vmatmul.bf16.gmra.mxu3 %v4987_v2  ;;  %v5022_v2 = vld [vmem:[%s6748_s3 + $0x420] sm:$0xf] }
 0x1cb   : > { %v5023_v21 = vor.u32 %v5785_v3, %v5022_v2  ;;  %v5792_v2 = vld [vmem:[%s6748_s3 + $0x46c] sm:$0xf0]  ;;  %v5789_v3 = vld [vmem:[%s6748_s3 + $0x45c] sm:$0xf] }
 0x1cc   : > { %v2370_v8 = vpop.f32.mrf.mxu2  ;;  %v2034_v12 = vpop.f32.mrf.mxu0 }
 0x1cd   : > { %v2539_v10 = vpop.f32.mrf.mxu3  ;;  %v2371_v11 = vadd.f32 %v2370_v8, %v2202_v7  ;;  %v2203_v13 = vpop.f32.mrf.mxu1  ;;  %v2035_v15 = vadd.f32 %v6840_v9, %v2034_v12  ;;  %v5782_v7 = vld [vmem:[%s6748_s3 + $0x424] sm:$0xf]  ;;  %v5024_v8 = vld [vmem:[%s6748_s3 + $0x438] sm:$0xf0]  ;;  %v5783_v12 = vld [vmem:[%s6748_s3 + $0x42c] sm:$0xf] }
 0x1ce   : > { %v5027_v22 = vor.u32 %v5782_v7, %v5024_v8  ;;  %v5056_v7 = vld [vmem:[%s6748_s3 + $0x470] sm:$0xf0] }
 0x1cf   : > { %v7020_v16 = vadd.f32 %v2539_v10, %v2371_v11  ;;  %v2204_v17 = vadd.f32 %v2203_v13, %v2035_v15  ;;  %v5030_v10 = vld [vmem:[%s6748_s3 + $0x428] sm:$0xf]  ;;  %v5786_v11 = vld [vmem:[%s6748_s3 + $0x43c] sm:$0xf0]  ;;  %v5032_v13 = vld [vmem:[%s6748_s3 + $0x440] sm:$0xf0] }
 0x1d0   : > { %v5031_v29 = vor.u32 %v5786_v11, %v5030_v10  ;;  %v5035_v30 = vor.u32 %v5783_v12, %v5032_v13 }
 0x1d4   : > { %v2372_v35 = vpop.f32.mrf.mxu2  ;;  %v2037_v42 = vpop.f32.mrf.mxu0 }
 0x1d5   : > { %v2541_v36 = vpop.f32.mrf.mxu3  ;;  %v2373_v40 = vadd.f32 %v2372_v35, %v2204_v17  ;;  %v2206_v44 = vpop.f32.mrf.mxu1  ;;  %v2038_v47 = vadd.f32 %v6840_v9, %v2037_v42 }
 0x1d7   : > { %v7031_v48 = vadd.f32 %v2541_v36, %v2373_v40  ;;  %v2207_v51 = vadd.f32 %v2206_v44, %v2038_v47  ;;  %2076 = vmatmul.bf16.gmra.mxu0 %v4999_v38  ;;  %v5923_v38 = vld [vmem:[#allocation10 + $0x8] sm:$0xff] }
 0x1d8   : > { %2245 = vmatmul.bf16.gmra.mxu1 %v5003_v39  ;;  %3499 = vmatpush.bf16.msrb.mxu2 %v5923_v38 }
 0x1d9   : > { %2414 = vmatmul.bf16.gmra.mxu2 %v5007_v45 }
 0x1da   : > { %2583 = vmatmul.bf16.gmra.mxu3 %v5011_v46  ;;  %v5875_v46 = vld [vmem:[#allocation7 + $0x108] sm:$0xff] }
 0x1db   : > { %2645 = vmatpush.bf16.msrb.mxu0 %v5875_v46  ;;  %v5933_v46 = vld [vmem:[#allocation13 + $0x18] sm:$0xff] }
 0x1dc   : > { %v2375_v52 = vpop.f32.mrf.mxu2  ;;  %v2039_v58 = vpop.f32.mrf.mxu0  ;;  %4018 = vmatpush.bf16.msrb.mxu3 %v5933_v46  ;;  %v5804_v46 = vld [vmem:[%s6748_s3 + $0x4cc] sm:$0xf0] }
 0x1dd   : > { %v2544_v54 = vpop.f32.mrf.mxu3  ;;  %v2376_v55 = vadd.f32 %v2375_v52, %v2207_v51  ;;  %v2208_v62 = vpop.f32.mrf.mxu1  ;;  %v2040_v63 = vadd.f32 %v6840_v9, %v2039_v58  ;;  %v5883_v58 = vld [vmem:[#allocation7 + $0x148] sm:$0xff] }
 0x1de   : > { %2814 = vmatpush.bf16.msrb.mxu1 %v5883_v58  ;;  %v5795_v58 = vld [vmem:[%s6748_s3 + $0x48c] sm:$0xf] }
 0x1df   : > { %v7034_v0 = vadd.f32 %v2544_v54, %v2376_v55  ;;  %v2209_v1 = vadd.f32 %v2208_v62, %v2040_v63  ;;  %v5046_v54 = vld [vmem:[%s6748_s3 + $0x450] sm:$0xf]  ;;  %v5791_v55 = vld [vmem:[%s6748_s3 + $0x464] sm:$0xf0]  ;;  %v5788_v62 = vld [vmem:[%s6748_s3 + $0x454] sm:$0xf] }
 0x1e0   : > { %v5048_v63 = vld [vmem:[%s6748_s3 + $0x468] sm:$0xf0]  ;;  %v5047_v11 = vor.u32 %v5791_v55, %v5046_v54  ;;  %v5078_v54 = vld [vmem:[%s6748_s3 + $0x488] sm:$0xf]  ;;  %v5798_v55 = vld [vmem:[%s6748_s3 + $0x49c] sm:$0xf0] }
 0x1e1   : > { %v5051_v12 = vor.u32 %v5788_v62, %v5048_v63  ;;  %v5080_v62 = vld [vmem:[%s6748_s3 + $0x4a0] sm:$0xf0] }
 0x1e4   : > { %v2377_v15 = vpop.f32.mrf.mxu2  ;;  %v2042_v25 = vpop.f32.mrf.mxu0 }
 0x1e5   : > { %v2546_v17 = vpop.f32.mrf.mxu3  ;;  %v2378_v23 = vadd.f32 %v2377_v15, %v2209_v1  ;;  %v2211_v26 = vpop.f32.mrf.mxu1  ;;  %v2043_v34 = vadd.f32 %v6840_v9, %v2042_v25  ;;  %v5054_v1 = vld [vmem:[%s6748_s3 + $0x458] sm:$0xf] }
 0x1e7   : > { %v7045_v35 = vadd.f32 %v2546_v17, %v2378_v23  ;;  %v2212_v36 = vadd.f32 %v2211_v26, %v2043_v34  ;;  %2081 = vmatmul.bf16.gmra.mxu0 %v5023_v21  ;;  %v5055_v17 = vor.u32 %v5792_v2, %v5054_v1  ;;  %v5059_v21 = vor.u32 %v5789_v3, %v5056_v7 }
 0x1e8   : > { %2250 = vmatmul.bf16.gmra.mxu1 %v5027_v22  ;;  %v7058_v22 = vld [vmem:[#allocation8] ss:$0 sm:$0xff] }
 0x1e9   : > { %2419 = vmatmul.bf16.gmra.mxu2 %v5031_v29 }
 0x1ea   : > { %2588 = vmatmul.bf16.gmra.mxu3 %v5035_v30 }
 0x1ec   : > { %v2380_v39 = vpop.f32.mrf.mxu2  ;;  %v2044_v44 = vpop.f32.mrf.mxu0 }
 0x1ed   : > { %v2549_v40 = vpop.f32.mrf.mxu3  ;;  %v2381_v42 = vadd.f32 %v2380_v39, %v2212_v36  ;;  %v2213_v45 = vpop.f32.mrf.mxu1  ;;  %v2045_v47 = vadd.f32 %v6840_v9, %v2044_v44  ;;  %v5070_v44 = vld [vmem:[%s6748_s3 + $0x480] sm:$0xf] }
 0x1ef   : > { %v7048_v51 = vadd.f32 %v2549_v40, %v2381_v42  ;;  %v2214_v52 = vadd.f32 %v2213_v45, %v2045_v47  ;;  %v5797_v45 = vld [vmem:[%s6748_s3 + $0x494] sm:$0xf0]  ;;  %v5794_v47 = vld [vmem:[%s6748_s3 + $0x484] sm:$0xf] }
 0x1f0   : > { %v5071_v2 = vor.u32 %v5797_v45, %v5070_v44  ;;  %v5096_v44 = vld [vmem:[%s6748_s3 + $0x4c8] sm:$0xf0]  ;;  %v5102_v45 = vld [vmem:[%s6748_s3 + $0x4b8] sm:$0xf] }
 0x1f4   : > { %v2382_v8 = vpop.f32.mrf.mxu2  ;;  %v2047_v9 = vpop.f32.mrf.mxu0 }
 0x1f5   : > { %v2551_v10 = vpop.f32.mrf.mxu3  ;;  %v2383_v13 = vadd.f32 %v2382_v8, %v2214_v52  ;;  %v2216_v15 = vpop.f32.mrf.mxu1  ;;  %v2048_v23 = vadd.f32 %v7058_v22, %v2047_v9  ;;  %v5072_v52 = vld [vmem:[%s6748_s3 + $0x498] sm:$0xf0] }
 0x1f6   : > { %v5075_v3 = vor.u32 %v5794_v47, %v5072_v52  ;;  %v5801_v47 = vld [vmem:[%s6748_s3 + $0x4bc] sm:$0xf]  ;;  %v5104_v52 = vld [vmem:[%s6748_s3 + $0x4d0] sm:$0xf0] }
 0x1f7   : > { %v7061_v25 = vadd.f32 %v2551_v10, %v2383_v13  ;;  %v2217_v26 = vadd.f32 %v2216_v15, %v2048_v23  ;;  %2086 = vmatmul.bf16.gmra.mxu0 %v5047_v11  ;;  %v5079_v11 = vor.u32 %v5798_v55, %v5078_v54 }
 0x1f8   : > { %2255 = vmatmul.bf16.gmra.mxu1 %v5051_v12  ;;  %v5083_v12 = vor.u32 %v5795_v58, %v5080_v62 }
 0x1f9   : > { %2424 = vmatmul.bf16.gmra.mxu2 %v5055_v17 }
 0x1fa   : > { %2593 = vmatmul.bf16.gmra.mxu3 %v5059_v21 }
 0x1fc   : > { %v2385_v29 = vpop.f32.mrf.mxu2  ;;  %v2049_v36 = vpop.f32.mrf.mxu0 }
 0x1fd   : > { %v2554_v30 = vpop.f32.mrf.mxu3  ;;  %v2386_v34 = vadd.f32 %v2385_v29, %v2217_v26  ;;  %v2218_v38 = vpop.f32.mrf.mxu1  ;;  %v2050_v39 = vadd.f32 %v7058_v22, %v2049_v36 }
 0x1ff   : > { %v7064_v40 = vadd.f32 %v2554_v30, %v2386_v34  ;;  %v2219_v42 = vadd.f32 %v2218_v38, %v2050_v39  ;;  %v5094_v38 = vld [vmem:[%s6748_s3 + $0x4b0] sm:$0xf]  ;;  %v5803_v39 = vld [vmem:[%s6748_s3 + $0x4c4] sm:$0xf0] }
 0x200   : > { %v5095_v58 = vor.u32 %v5803_v39, %v5094_v38  ;;  %v5806_v38 = vld [vmem:[%s6748_s3 + $0x4e4] sm:$0xf]  ;;  %v5120_v39 = vld [vmem:[%s6748_s3 + $0x4f8] sm:$0xf0] }
 0x204   : > { %v2387_v63 = vpop.f32.mrf.mxu2  ;;  %v2052_v8 = vpop.f32.mrf.mxu0 }
 0x205   : > { %v2556_v1 = vpop.f32.mrf.mxu3  ;;  %v2388_v7 = vadd.f32 %v2387_v63, %v2219_v42  ;;  %v2221_v10 = vpop.f32.mrf.mxu1  ;;  %v2053_v13 = vadd.f32 %v7058_v22, %v2052_v8  ;;  %v5800_v42 = vld [vmem:[%s6748_s3 + $0x4b4] sm:$0xf] }
 0x206   : > { %v5099_v62 = vor.u32 %v5800_v42, %v5096_v44  ;;  %v5126_v42 = vld [vmem:[%s6748_s3 + $0x4e8] sm:$0xf]  ;;  %v5810_v44 = vld [vmem:[%s6748_s3 + $0x4fc] sm:$0xf0] }
 0x207   : > { %v7075_v9 = vadd.f32 %v2556_v1, %v2388_v7  ;;  %v2222_v15 = vadd.f32 %v2221_v10, %v2053_v13  ;;  %2091 = vmatmul.bf16.gmra.mxu0 %v5071_v2  ;;  %v5107_v7 = vor.u32 %v5801_v47, %v5104_v52 }
 0x208   : > { %2260 = vmatmul.bf16.gmra.mxu1 %v5075_v3  ;;  %v5103_v3 = vor.u32 %v5804_v46, %v5102_v45  ;;  %v5807_v45 = vld [vmem:[%s6748_s3 + $0x4ec] sm:$0xf]  ;;  %v5128_v46 = vld [vmem:[%s6748_s3 + $0x500] sm:$0xf0] }
 0x209   : > { %2429 = vmatmul.bf16.gmra.mxu2 %v5079_v11 }
 0x20a   : > { %2598 = vmatmul.bf16.gmra.mxu3 %v5083_v12 }
 0x20c   : > { %v2390_v17 = vpop.f32.mrf.mxu2  ;;  %v2054_v26 = vpop.f32.mrf.mxu0 }
 0x20d   : > { %v2559_v21 = vpop.f32.mrf.mxu3  ;;  %v2391_v23 = vadd.f32 %v2390_v17, %v2222_v15  ;;  %v2223_v29 = vpop.f32.mrf.mxu1  ;;  %v2055_v30 = vadd.f32 %v7058_v22, %v2054_v26 }
 0x20f   : > { %v7078_v34 = vadd.f32 %v2559_v21, %v2391_v23  ;;  %v2224_v36 = vadd.f32 %v2223_v29, %v2055_v30  ;;  %v5118_v30 = vld [vmem:[%s6748_s3 + $0x4e0] sm:$0xf] }
 0x214   : > { %v2392_v54 = vpop.f32.mrf.mxu2  ;;  %v2057_v1 = vpop.f32.mrf.mxu0 }
 0x215   : > { %v2561_v55 = vpop.f32.mrf.mxu3  ;;  %v2393_v63 = vadd.f32 %v2392_v54, %v2224_v36  ;;  %v2226_v2 = vpop.f32.mrf.mxu1  ;;  %v2058_v8 = vadd.f32 %v7058_v22, %v2057_v1  ;;  %v5809_v36 = vld [vmem:[%s6748_s3 + $0x4f4] sm:$0xf0]  ;;  %v5127_v1 = vor.u32 %v5810_v44, %v5126_v42  ;;  %v5882_v42 = vld [vmem:[#allocation7 + $0x140] sm:$0xff]  ;;  %v5812_v44 = vld [vmem:[%s6748_s3 + $0x514] sm:$0xf] }
 0x216   : > { %v5119_v54 = vor.u32 %v5809_v36, %v5118_v30  ;;  %2815 = vmatpush.bf16.msrb.mxu1 %v5882_v42 }
 0x217   : > { %v7089_v10 = vadd.f32 %v2561_v55, %v2393_v63  ;;  %v2227_v11 = vadd.f32 %v2226_v2, %v2058_v8  ;;  %2096 = vmatmul.bf16.gmra.mxu0 %v5095_v58  ;;  %v5123_v55 = vor.u32 %v5806_v38, %v5120_v39  ;;  %v5131_v2 = vor.u32 %v5807_v45, %v5128_v46  ;;  %v5142_v38 = vld [vmem:[%s6748_s3 + $0x510] sm:$0xf]  ;;  %v5815_v39 = vld [vmem:[%s6748_s3 + $0x524] sm:$0xf0]  ;;  %v5144_v45 = vld [vmem:[%s6748_s3 + $0x528] sm:$0xf0] }
 0x218   : > { %2265 = vmatmul.bf16.gmra.mxu1 %v5099_v62  ;;  %v5150_v46 = vld [vmem:[%s6748_s3 + $0x518] sm:$0xf] }
 0x219   : > { %2434 = vmatmul.bf16.gmra.mxu2 %v5103_v3 }
 0x21a   : > { %2603 = vmatmul.bf16.gmra.mxu3 %v5107_v7 }
 0x21c   : > { %v2395_v12 = vpop.f32.mrf.mxu2  ;;  %v2059_v17 = vpop.f32.mrf.mxu0 }
 0x21d   : > { %v2564_v13 = vpop.f32.mrf.mxu3  ;;  %v2396_v15 = vadd.f32 %v2395_v12, %v2227_v11  ;;  %v2228_v21 = vpop.f32.mrf.mxu1  ;;  %v2060_v23 = vadd.f32 %v7058_v22, %v2059_v17  ;;  %v5922_v11 = vld [vmem:[#allocation10] sm:$0xff] }
 0x21e   : > { %3500 = vmatpush.bf16.msrb.mxu2 %v5922_v11 }
 0x21f   : > { %v7092_v26 = vadd.f32 %v2564_v13, %v2396_v15  ;;  %v2229_v29 = vadd.f32 %v2228_v21, %v2060_v23  ;;  %v5874_v23 = vld [vmem:[#allocation7 + $0x100] sm:$0xff] }
 0x220   : > { %2646 = vmatpush.bf16.msrb.mxu0 %v5874_v23 }
 0x224   : > { %v2397_v47 = vpop.f32.mrf.mxu2  ;;  %v2062_v62 = vpop.f32.mrf.mxu0 }
 0x225   : > { %v2566_v52 = vpop.f32.mrf.mxu3  ;;  %v2398_v58 = vadd.f32 %v2397_v47, %v2229_v29  ;;  %v2231_v63 = vpop.f32.mrf.mxu1  ;;  %v2063_v3 = vadd.f32 %v7058_v22, %v2062_v62  ;;  %v5816_v47 = vld [vmem:[%s6748_s3 + $0x52c] sm:$0xf0]  ;;  %v5143_v62 = vor.u32 %v5815_v39, %v5142_v38 }
 0x227   : > { %v7103_v7 = vadd.f32 %v2566_v52, %v2398_v58  ;;  %v2232_v8 = vadd.f32 %v2231_v63, %v2063_v3  ;;  %2101 = vmatmul.bf16.gmra.mxu0 %v5119_v54  ;;  %v5813_v52 = vld [vmem:[%s6748_s3 + $0x51c] sm:$0xf]  ;;  %v5152_v54 = vld [vmem:[%s6748_s3 + $0x530] sm:$0xf0]  ;;  %v5147_v63 = vor.u32 %v5812_v44, %v5144_v45  ;;  %v5166_v44 = vld [vmem:[%s6748_s3 + $0x540] sm:$0xf] }
 0x228   : > { %2270 = vmatmul.bf16.gmra.mxu1 %v5123_v55  ;;  %v5155_v11 = vor.u32 %v5813_v52, %v5152_v54  ;;  %v5821_v45 = vld [vmem:[%s6748_s3 + $0x554] sm:$0xf0]  ;;  %v5168_v52 = vld [vmem:[%s6748_s3 + $0x558] sm:$0xf0]  ;;  %v5174_v54 = vld [vmem:[%s6748_s3 + $0x548] sm:$0xf] }
 0x229   : > { %2439 = vmatmul.bf16.gmra.mxu2 %v5127_v1 }
 0x22a   : > { %2608 = vmatmul.bf16.gmra.mxu3 %v5131_v2 }
 0x22c   : > { %v2400_v12 = vpop.f32.mrf.mxu2  ;;  %v2064_v17 = vpop.f32.mrf.mxu0 }
 0x22d   : > { %v2569_v13 = vpop.f32.mrf.mxu3  ;;  %v2401_v15 = vadd.f32 %v2400_v12, %v2232_v8  ;;  %v2233_v21 = vpop.f32.mrf.mxu1  ;;  %v2065_v29 = vadd.f32 %v7058_v22, %v2064_v17  ;;  %v5151_v8 = vor.u32 %v5816_v47, %v5150_v46  ;;  %v5932_v46 = vld [vmem:[#allocation13 + $0x10] sm:$0xff]  ;;  %v5818_v47 = vld [vmem:[%s6748_s3 + $0x544] sm:$0xf] }
 0x22e   : > { %4019 = vmatpush.bf16.msrb.mxu3 %v5932_v46 }
 0x22f   : > { %v7106_v30 = vadd.f32 %v2569_v13, %v2401_v15  ;;  %v2234_v36 = vadd.f32 %v2233_v21, %v2065_v29 }
 0x234   : > { %v2402_v55 = vpop.f32.mrf.mxu2  ;;  %v2067_v2 = vpop.f32.mrf.mxu0 }
 0x235   : > { %v2571_v58 = vpop.f32.mrf.mxu3  ;;  %v2403_v1 = vadd.f32 %v2402_v55, %v2234_v36  ;;  %v2236_v3 = vpop.f32.mrf.mxu1  ;;  %v2068_v12 = vadd.f32 %v7058_v22, %v2067_v2  ;;  %v5822_v55 = vld [vmem:[%s6748_s3 + $0x55c] sm:$0xf0]  ;;  %v5167_v2 = vor.u32 %v5821_v45, %v5166_v44 }
 0x237   : > { %v7117_v13 = vadd.f32 %v2571_v58, %v2403_v1  ;;  %v2237_v15 = vadd.f32 %v2236_v3, %v2068_v12  ;;  %2106 = vmatmul.bf16.gmra.mxu0 %v5143_v62  ;;  %v5819_v58 = vld [vmem:[%s6748_s3 + $0x54c] sm:$0xf]  ;;  %v5176_v62 = vld [vmem:[%s6748_s3 + $0x560] sm:$0xf0]  ;;  %v5171_v3 = vor.u32 %v5818_v47, %v5168_v52 }
 0x238   : > { %2275 = vmatmul.bf16.gmra.mxu1 %v5147_v63 }
 0x239   : > { %2444 = vmatmul.bf16.gmra.mxu2 %v5151_v8 }
 0x23a   : > { %2613 = vmatmul.bf16.gmra.mxu3 %v5155_v11 }
 0x23c   : > { %v2405_v17 = vpop.f32.mrf.mxu2  ;;  %v2069_v29 = vpop.f32.mrf.mxu0 }
 0x23d   : > { %v2574_v21 = vpop.f32.mrf.mxu3  ;;  %v2406_v23 = vadd.f32 %v2405_v17, %v2237_v15  ;;  %v2238_v36 = vpop.f32.mrf.mxu1  ;;  %v2070_v38 = vadd.f32 %v7058_v22, %v2069_v29  ;;  %v5175_v15 = vor.u32 %v5822_v55, %v5174_v54  ;;  %v5179_v17 = vor.u32 %v5819_v58, %v5176_v62  ;;  %v5190_v54 = vld [vmem:[%s6748_s3 + $0x570] sm:$0xf]  ;;  %v5827_v55 = vld [vmem:[%s6748_s3 + $0x584] sm:$0xf0]  ;;  %v5824_v58 = vld [vmem:[%s6748_s3 + $0x574] sm:$0xf] }
 0x23e   : > { %v5192_v62 = vld [vmem:[%s6748_s3 + $0x588] sm:$0xf0] }
 0x23f   : > { %v7120_v39 = vadd.f32 %v2574_v21, %v2406_v23  ;;  %v2239_v42 = vadd.f32 %v2238_v36, %v2070_v38 }
 0x244   : > { %v2407_v63 = vpop.f32.mrf.mxu2  ;;  %v2072_v11 = vpop.f32.mrf.mxu0 }
 0x245   : > { %v2576_v1 = vpop.f32.mrf.mxu3  ;;  %v2408_v8 = vadd.f32 %v2407_v63, %v2239_v42  ;;  %v2241_v12 = vpop.f32.mrf.mxu1  ;;  %v2073_v21 = vadd.f32 %v7058_v22, %v2072_v11  ;;  %v5198_v63 = vld [vmem:[%s6748_s3 + $0x578] sm:$0xf] }
 0x247   : > { %v7131_v23 = vadd.f32 %v2576_v1, %v2408_v8  ;;  %v2242_v29 = vadd.f32 %v2241_v12, %v2073_v21  ;;  %2111 = vmatmul.bf16.gmra.mxu0 %v5167_v2  ;;  %v5828_v1 = vld [vmem:[%s6748_s3 + $0x58c] sm:$0xf0]  ;;  %v5825_v2 = vld [vmem:[%s6748_s3 + $0x57c] sm:$0xf]  ;;  %v5191_v12 = vor.u32 %v5827_v55, %v5190_v54 }
 0x248   : > { %2280 = vmatmul.bf16.gmra.mxu1 %v5171_v3  ;;  %v5200_v3 = vld [vmem:[%s6748_s3 + $0x590] sm:$0xf0] }
 0x249   : > { %2449 = vmatmul.bf16.gmra.mxu2 %v5175_v15  ;;  %v5195_v15 = vor.u32 %v5824_v58, %v5192_v62 }
 0x24a   : > { %2618 = vmatmul.bf16.gmra.mxu3 %v5179_v17 }
 0x24c   : > { %v2410_v36 = vpop.f32.mrf.mxu2  ;;  %v2074_v44 = vpop.f32.mrf.mxu0 }
 0x24d   : > { %v2579_v38 = vpop.f32.mrf.mxu3  ;;  %v2411_v42 = vadd.f32 %v2410_v36, %v2242_v29  ;;  %v2243_v45 = vpop.f32.mrf.mxu1  ;;  %v2075_v46 = vadd.f32 %v7058_v22, %v2074_v44  ;;  %v5199_v36 = vor.u32 %v5828_v1, %v5198_v63  ;;  %v5214_v1 = vld [vmem:[%s6748_s3 + $0x5a0] sm:$0xf] }
 0x24f   : > { %v7134_v47 = vadd.f32 %v2579_v38, %v2411_v42  ;;  %v2244_v52 = vadd.f32 %v2243_v45, %v2075_v46  ;;  %v5203_v38 = vor.u32 %v5825_v2, %v5200_v3  ;;  %v5833_v2 = vld [vmem:[%s6748_s3 + $0x5b4] sm:$0xf0]  ;;  %v5830_v3 = vld [vmem:[%s6748_s3 + $0x5a4] sm:$0xf] }
 0x251   : > { %7659 = vst [vmem:[#allocation22_spill] sm:$0xff] %v7134_v47 }
 0x254   : > { %v2412_v8 = vpop.f32.mrf.mxu2  ;;  %v2077_v21 = vpop.f32.mrf.mxu0 }
 0x255   : > { %v7144_v11 = vpop.f32.mrf.mxu3  ;;  %v7146_v17 = vadd.f32 %v2412_v8, %v2244_v52  ;;  %v2246_v29 = vpop.f32.mrf.mxu1  ;;  %v2078_v42 = vadd.f32 %v7058_v22, %v2077_v21  ;;  %v5216_v8 = vld [vmem:[%s6748_s3 + $0x5b8] sm:$0xf0]  ;;  %v5831_v21 = vld [vmem:[%s6748_s3 + $0x5ac] sm:$0xf] }
 0x257   : > { %v2247_v44 = vadd.f32 %v2246_v29, %v2078_v42  ;;  %2116 = vmatmul.bf16.gmra.mxu0 %v5191_v12  ;;  %v5222_v12 = vld [vmem:[%s6748_s3 + $0x5a8] sm:$0xf]  ;;  %v5224_v29 = vld [vmem:[%s6748_s3 + $0x5c0] sm:$0xf0]  ;;  %v5215_v42 = vor.u32 %v5833_v2, %v5214_v1 }
 0x258   : > { %2285 = vmatmul.bf16.gmra.mxu1 %v5195_v15  ;;  %v5834_v15 = vld [vmem:[%s6748_s3 + $0x5bc] sm:$0xf0] }
 0x259   : > { %2454 = vmatmul.bf16.gmra.mxu2 %v5199_v36 }
 0x25a   : > { %2623 = vmatmul.bf16.gmra.mxu3 %v5203_v38 }
 0x25c   : > { %v2415_v45 = vpop.f32.mrf.mxu2  ;;  %v2079_v54 = vpop.f32.mrf.mxu0 }
 0x25d   : > { %v2584_v46 = vpop.f32.mrf.mxu3  ;;  %v2416_v52 = vadd.f32 %v2415_v45, %v2247_v44  ;;  %v2248_v55 = vpop.f32.mrf.mxu1  ;;  %v2080_v58 = vadd.f32 %v7058_v22, %v2079_v54  ;;  %v5219_v44 = vor.u32 %v5830_v3, %v5216_v8 }
 0x25f   : > { %v7150_v62 = vadd.f32 %v2584_v46, %v2416_v52  ;;  %v2249_v63 = vadd.f32 %v2248_v55, %v2080_v58  ;;  %v5223_v46 = vor.u32 %v5834_v15, %v5222_v12  ;;  %v5227_v52 = vor.u32 %v5831_v21, %v5224_v29  ;;  %v5238_v21 = vld [vmem:[%s6748_s3 + $0x5d0] sm:$0xf]  ;;  %v5839_v29 = vld [vmem:[%s6748_s3 + $0x5e4] sm:$0xf0] }
 0x261   : > { %7660 = vst [vmem:[#allocation23_spill] sm:$0xff] %v7150_v62 }
 0x264   : > { %v2417_v36 = vpop.f32.mrf.mxu2  ;;  %v2082_v47 = vpop.f32.mrf.mxu0 }
 0x265   : > { %v7160_v38 = vpop.f32.mrf.mxu3  ;;  %v7162_v45 = vadd.f32 %v2417_v36, %v2249_v63  ;;  %v2251_v54 = vpop.f32.mrf.mxu1  ;;  %v2083_v55 = vadd.f32 %v7058_v22, %v2082_v47  ;;  %v5836_v36 = vld [vmem:[%s6748_s3 + $0x5d4] sm:$0xf] }
 0x266   : > { %7661 = vst [vmem:[#allocation24_spill] sm:$0xff] %v7160_v38  ;;  %v5239_v38 = vor.u32 %v5839_v29, %v5238_v21 }
 0x267   : > { %7662 = vst [vmem:[#allocation25_spill] sm:$0xff] %v7162_v45  ;;  %v2252_v58 = vadd.f32 %v2251_v54, %v2083_v55  ;;  %2121 = vmatmul.bf16.gmra.mxu0 %v5215_v42  ;;  %v5240_v42 = vld [vmem:[%s6748_s3 + $0x5e8] sm:$0xf0]  ;;  %v5840_v54 = vld [vmem:[%s6748_s3 + $0x5ec] sm:$0xf0] }
 0x268   : > { %2290 = vmatmul.bf16.gmra.mxu1 %v5219_v44  ;;  %v5246_v44 = vld [vmem:[%s6748_s3 + $0x5d8] sm:$0xf]  ;;  %v5248_v55 = vld [vmem:[%s6748_s3 + $0x5f0] sm:$0xf0] }
 0x269   : > { %2459 = vmatmul.bf16.gmra.mxu2 %v5223_v46  ;;  %v5837_v46 = vld [vmem:[%s6748_s3 + $0x5dc] sm:$0xf] }
 0x26a   : > { %2628 = vmatmul.bf16.gmra.mxu3 %v5227_v52 }
 0x26c   : > { %v2420_v63 = vpop.f32.mrf.mxu2  ;;  %v2084_v3 = vpop.f32.mrf.mxu0 }
 0x26d   : > { %v2589_v1 = vpop.f32.mrf.mxu3  ;;  %v2421_v2 = vadd.f32 %v2420_v63, %v2252_v58  ;;  %v2253_v8 = vpop.f32.mrf.mxu1  ;;  %v2085_v12 = vadd.f32 %v7058_v22, %v2084_v3  ;;  %v5243_v58 = vor.u32 %v5836_v36, %v5240_v42 }
 0x26f   : > { %v7166_v15 = vadd.f32 %v2589_v1, %v2421_v2  ;;  %v2254_v47 = vadd.f32 %v2253_v8, %v2085_v12  ;;  %v5247_v1 = vor.u32 %v5840_v54, %v5246_v44  ;;  %v5251_v2 = vor.u32 %v5837_v46, %v5248_v55  ;;  %v5931_v46 = vld [vmem:[#allocation13 + $0x8] sm:$0xff]  ;;  %v5655_v55 = vld [vmem:[%s6748_s3 + $0x24] sm:$0xf0] }
 0x270   : > { %4020 = vmatpush.bf16.msrb.mxu3 %v5931_v46 }
 0x271   : > { %7663 = vst [vmem:[#allocation26_spill] sm:$0xff] %v7166_v15 }
 0x274   : > { %v2422_v52 = vpop.f32.mrf.mxu2  ;;  %v2087_v45 = vpop.f32.mrf.mxu0 }
 0x275   : > { %v7176_v62 = vpop.f32.mrf.mxu3  ;;  %v7178_v63 = vadd.f32 %v2422_v52, %v2254_v47  ;;  %v2256_v3 = vpop.f32.mrf.mxu1  ;;  %v2088_v8 = vadd.f32 %v7058_v22, %v2087_v45  ;;  %v4510_v45 = vld [vmem:[%s6748_s3 + $0x10] sm:$0xf]  ;;  %v5652_v52 = vld [vmem:[%s6748_s3 + $0x14] sm:$0xf] }
 0x276   : > { %7664 = vst [vmem:[#allocation27_spill] sm:$0xff] %v7176_v62 }
 0x277   : > { %7665 = vst [vmem:[#allocation28_spill] sm:$0xff] %v7178_v63  ;;  %v2257_v12 = vadd.f32 %v2256_v3, %v2088_v8  ;;  %2126 = vmatmul.bf16.gmra.mxu0 %v5239_v38  ;;  %v4512_v38 = vld [vmem:[%s6748_s3 + $0x28] sm:$0xf0] }
 0x278   : > { %2295 = vmatmul.bf16.gmra.mxu1 %v5243_v58 }
 0x279   : > { %2464 = vmatmul.bf16.gmra.mxu2 %v5247_v1  ;;  %v4511_v1 = vor.u32 %v5655_v55, %v4510_v45 }
 0x27a   : > { %2633 = vmatmul.bf16.gmra.mxu3 %v5251_v2  ;;  %v4515_v2 = vor.u32 %v5652_v52, %v4512_v38 }
 0x27c   : > { %v2425_v15 = vpop.f32.mrf.mxu2  ;;  %v2089_v47 = vpop.f32.mrf.mxu0 }
 0x27d   : > { %v2594_v21 = vpop.f32.mrf.mxu3  ;;  %v2426_v29 = vadd.f32 %v2425_v15, %v2257_v12  ;;  %v2258_v36 = vpop.f32.mrf.mxu1  ;;  %v2090_v42 = vadd.f32 %v7058_v22, %v2089_v47 }
 0x27f   : > { %v7182_v44 = vadd.f32 %v2594_v21, %v2426_v29  ;;  %v2259_v54 = vadd.f32 %v2258_v36, %v2090_v42  ;;  %v5890_v21 = vld [vmem:[%s6758_s4] sm:$0xff] }
 0x281   : > { %7666 = vst [vmem:[#allocation29_spill] sm:$0xff] %v7182_v44  ;;  %v5661_v44 = vld [vmem:[%s6748_s3 + $0x54] sm:$0xf0] }
 0x284   : > { %v2427_v58 = vpop.f32.mrf.mxu2  ;;  %v2092_v8 = vpop.f32.mrf.mxu0 }
 0x285   : > { %v7188_v3 = vpop.f32.mrf.mxu3  ;;  %v7190_v15 = vadd.f32 %v2427_v58, %v2259_v54  ;;  %v2261_v12 = vpop.f32.mrf.mxu1  ;;  %v2093_v29 = vadd.f32 %v7058_v22, %v2092_v8  ;;  %v4534_v58 = vld [vmem:[%s6748_s3 + $0x40] sm:$0xf]  ;;  %v4536_v8 = vld [vmem:[%s6748_s3 + $0x58] sm:$0xf0] }
 0x286   : > { %7667 = vst [vmem:[#allocation30_spill] sm:$0xff] %v7188_v3  ;;  %v5658_v3 = vld [vmem:[%s6748_s3 + $0x44] sm:$0xf] }
 0x287   : > { %7668 = vst [vmem:[#allocation31_spill] sm:$0xff] %v7190_v15  ;;  %v2262_v47 = vadd.f32 %v2261_v12, %v2093_v29  ;;  %2647 = vmatmul.bf16.vlgmr.msrb.gmra.mxu0 %v4511_v1  ;;  %v4535_v1 = vor.u32 %v5661_v44, %v4534_v58 }
 0x288   : > { %2816 = vmatmul.bf16.vlgmr.msrb.gmra.mxu1 %v4515_v2  ;;  %v4539_v2 = vor.u32 %v5658_v3, %v4536_v8  ;;  %v4558_v8 = vld [vmem:[%s6748_s3 + $0x70] sm:$0xf] }
 0x289   : > { %3501 = vmatmul.bf16.vlgmr.msrb.gmra.mxu2 %v5890_v21 }
 0x28c   : > { %v2430_v36 = vpop.f32.mrf.mxu2  ;;  %v2094_v45 = vpop.f32.mrf.mxu0 }
 0x28d   : > { %v2599_v42 = vpop.f32.mrf.mxu3  ;;  %v2431_v46 = vadd.f32 %v2430_v36, %v2262_v47  ;;  %v2263_v54 = vpop.f32.mrf.mxu1  ;;  %v2095_v55 = vadd.f32 %v7058_v22, %v2094_v45  ;;  %v5891_v36 = vld [vmem:[%s6758_s4 + $0x8] sm:$0xff] }
 0x28f   : > { %v7195_v52 = vadd.f32 %v2599_v42, %v2431_v46  ;;  %v2264_v38 = vadd.f32 %v2263_v54, %v2095_v55 }
 0x291   : > { %7669 = vst [vmem:[#allocation32_spill] sm:$0xff] %v7195_v52  ;;  %v5667_v52 = vld [vmem:[%s6748_s3 + $0x84] sm:$0xf0] }
 0x294   : > { %v2432_v15 = vpop.f32.mrf.mxu2  ;;  %v2097_v29 = vpop.f32.mrf.mxu0 }
 0x295   : > { %v7201_v12 = vpop.f32.mrf.mxu3  ;;  %v7203_v21 = vadd.f32 %v2432_v15, %v2264_v38  ;;  %v2266_v47 = vpop.f32.mrf.mxu1  ;;  %v2098_v42 = vadd.f32 %v7058_v22, %v2097_v29  ;;  %v4560_v29 = vld [vmem:[%s6748_s3 + $0x88] sm:$0xf0] }
 0x296   : > { %7670 = vst [vmem:[#allocation33_spill] sm:$0xff] %v7201_v12  ;;  %v5664_v12 = vld [vmem:[%s6748_s3 + $0x74] sm:$0xf] }
 0x297   : > { %7671 = vst [vmem:[#allocation34_spill] sm:$0xff] %v7203_v21  ;;  %v2267_v46 = vadd.f32 %v2266_v47, %v2098_v42  ;;  %2652 = vmatmul.bf16.gmra.mxu0 %v4535_v1  ;;  %v4559_v1 = vor.u32 %v5667_v52, %v4558_v8 }
 0x298   : > { %2821 = vmatmul.bf16.gmra.mxu1 %v4539_v2  ;;  %v4563_v2 = vor.u32 %v5664_v12, %v4560_v29  ;;  %v4582_v29 = vld [vmem:[%s6748_s3 + $0xa0] sm:$0xf] }
 0x299   : > { %3506 = vmatmul.bf16.gmra.mxu2 %v5891_v36 }
 0x29c   : > { %v2435_v45 = vpop.f32.mrf.mxu2  ;;  %v2099_v44 = vpop.f32.mrf.mxu0 }
 0x29d   : > { %v2604_v54 = vpop.f32.mrf.mxu3  ;;  %v2436_v55 = vadd.f32 %v2435_v45, %v2267_v46  ;;  %v2268_v3 = vpop.f32.mrf.mxu1  ;;  %v2100_v15 = vadd.f32 %v7058_v22, %v2099_v44  ;;  %v5892_v45 = vld [vmem:[%s6758_s4 + $0x10] sm:$0xff] }
 0x29f   : > { %v7208_v38 = vadd.f32 %v2604_v54, %v2436_v55  ;;  %v2269_v58 = vadd.f32 %v2268_v3, %v2100_v15 }
 0x2a1   : > { %7672 = vst [vmem:[#allocation35_spill] sm:$0xff] %v7208_v38  ;;  %v5673_v38 = vld [vmem:[%s6748_s3 + $0xb4] sm:$0xf0] }
 0x2a4   : > { %v2437_v21 = vpop.f32.mrf.mxu2  ;;  %v2102_v42 = vpop.f32.mrf.mxu0 }
 0x2a5   : > { %v7214_v47 = vpop.f32.mrf.mxu3  ;;  %v7216_v36 = vadd.f32 %v2437_v21, %v2269_v58  ;;  %v2271_v46 = vpop.f32.mrf.mxu1  ;;  %v2103_v54 = vadd.f32 %v7058_v22, %v2102_v42  ;;  %v4584_v42 = vld [vmem:[%s6748_s3 + $0xb8] sm:$0xf0] }
 0x2a6   : > { %7673 = vst [vmem:[#allocation36_spill] sm:$0xff] %v7214_v47  ;;  %v5670_v47 = vld [vmem:[%s6748_s3 + $0xa4] sm:$0xf] }
 0x2a7   : > { %7674 = vst [vmem:[#allocation37_spill] sm:$0xff] %v7216_v36  ;;  %v2272_v55 = vadd.f32 %v2271_v46, %v2103_v54  ;;  %2657 = vmatmul.bf16.gmra.mxu0 %v4559_v1  ;;  %v4583_v1 = vor.u32 %v5673_v38, %v4582_v29 }
 0x2a8   : > { %2826 = vmatmul.bf16.gmra.mxu1 %v4563_v2  ;;  %v4587_v2 = vor.u32 %v5670_v47, %v4584_v42  ;;  %v4606_v42 = vld [vmem:[%s6748_s3 + $0xd0] sm:$0xf] }
 0x2a9   : > { %3511 = vmatmul.bf16.gmra.mxu2 %v5892_v45 }
 0x2ac   : > { %v2440_v44 = vpop.f32.mrf.mxu2  ;;  %v2104_v52 = vpop.f32.mrf.mxu0 }
 0x2ad   : > { %v2609_v3 = vpop.f32.mrf.mxu3  ;;  %v2441_v15 = vadd.f32 %v2440_v44, %v2272_v55  ;;  %v2273_v12 = vpop.f32.mrf.mxu1  ;;  %v2105_v21 = vadd.f32 %v7058_v22, %v2104_v52  ;;  %v5893_v44 = vld [vmem:[%s6758_s4 + $0x18] sm:$0xff] }
 0x2af   : > { %v7221_v58 = vadd.f32 %v2609_v3, %v2441_v15  ;;  %v2274_v8 = vadd.f32 %v2273_v12, %v2105_v21 }
 0x2b1   : > { %7675 = vst [vmem:[#allocation38_spill] sm:$0xff] %v7221_v58  ;;  %v5930_v58 = vld [vmem:[#allocation13] sm:$0xff] }
 0x2b2   : > { %4021 = vmatpush.bf16.msrb.mxu3 %v5930_v58 }
 0x2b4   : > { %v2442_v36 = vpop.f32.mrf.mxu2  ;;  %v2107_v54 = vpop.f32.mrf.mxu0 }
 0x2b5   : > { %v7227_v46 = vpop.f32.mrf.mxu3  ;;  %v7229_v45 = vadd.f32 %v2442_v36, %v2274_v8  ;;  %v2276_v55 = vpop.f32.mrf.mxu1  ;;  %v2108_v3 = vadd.f32 %v7058_v22, %v2107_v54  ;;  %v5679_v54 = vld [vmem:[%s6748_s3 + $0xe4] sm:$0xf0] }
 0x2b6   : > { %7676 = vst [vmem:[#allocation39_spill] sm:$0xff] %v7227_v46  ;;  %v5676_v46 = vld [vmem:[%s6748_s3 + $0xd4] sm:$0xf] }
 0x2b7   : > { %7677 = vst [vmem:[#allocation40_spill] sm:$0xff] %v7229_v45  ;;  %v2277_v15 = vadd.f32 %v2276_v55, %v2108_v3  ;;  %2662 = vmatmul.bf16.gmra.mxu0 %v4583_v1  ;;  %v4608_v55 = vld [vmem:[%s6748_s3 + $0xe8] sm:$0xf0] }
 0x2b8   : > { %2831 = vmatmul.bf16.gmra.mxu1 %v4587_v2  ;;  %v4611_v3 = vor.u32 %v5676_v46, %v4608_v55 }
 0x2b9   : > { %3516 = vmatmul.bf16.gmra.mxu2 %v5893_v44  ;;  %v4607_v44 = vor.u32 %v5679_v54, %v4606_v42 }
 0x2bc   : > { %v2445_v52 = vpop.f32.mrf.mxu2  ;;  %v2109_v38 = vpop.f32.mrf.mxu0 }
 0x2bd   : > { %v2614_v12 = vpop.f32.mrf.mxu3  ;;  %v2446_v21 = vadd.f32 %v2445_v52, %v2277_v15  ;;  %v2278_v47 = vpop.f32.mrf.mxu1  ;;  %v2110_v36 = vadd.f32 %v7058_v22, %v2109_v38 }
 0x2bf   : > { %v7234_v8 = vadd.f32 %v2614_v12, %v2446_v21  ;;  %v2279_v29 = vadd.f32 %v2278_v47, %v2110_v36  ;;  %v5894_v12 = vld [vmem:[%s6758_s4 + $0x20] sm:$0xff] }
 0x2c1   : > { %7678 = vst [vmem:[#allocation41_spill] sm:$0xff] %v7234_v8 }
 0x2c4   : > { %v2447_v1 = vpop.f32.mrf.mxu2  ;;  %v2112_v52 = vpop.f32.mrf.mxu0 }
 0x2c5   : > { %v7240_v2 = vpop.f32.mrf.mxu3  ;;  %v7242_v15 = vadd.f32 %v2447_v1, %v2279_v29  ;;  %v2281_v38 = vpop.f32.mrf.mxu1  ;;  %v2113_v21 = vadd.f32 %v7058_v22, %v2112_v52  ;;  %v4630_v1 = vld [vmem:[%s6748_s3 + $0x100] sm:$0xf]  ;;  %v4632_v52 = vld [vmem:[%s6748_s3 + $0x118] sm:$0xf0] }
 0x2c6   : > { %7679 = vst [vmem:[#allocation42_spill] sm:$0xff] %v7240_v2  ;;  %v5685_v2 = vld [vmem:[%s6748_s3 + $0x114] sm:$0xf0] }
 0x2c7   : > { %7680 = vst [vmem:[#allocation43_spill] sm:$0xff] %v7242_v15  ;;  %v2282_v47 = vadd.f32 %v2281_v38, %v2113_v21  ;;  %2667 = vmatmul.bf16.gmra.mxu0 %v4607_v44  ;;  %v5682_v15 = vld [vmem:[%s6748_s3 + $0x104] sm:$0xf]  ;;  %v4631_v44 = vor.u32 %v5685_v2, %v4630_v1 }
 0x2c8   : > { %2836 = vmatmul.bf16.gmra.mxu1 %v4611_v3  ;;  %v4635_v3 = vor.u32 %v5682_v15, %v4632_v52  ;;  %v4654_v52 = vld [vmem:[%s6748_s3 + $0x130] sm:$0xf] }
 0x2c9   : > { %3521 = vmatmul.bf16.gmra.mxu2 %v5894_v12 }
 0x2cc   : > { %v2450_v58 = vpop.f32.mrf.mxu2  ;;  %v2114_v42 = vpop.f32.mrf.mxu0 }
 0x2cd   : > { %v2619_v36 = vpop.f32.mrf.mxu3  ;;  %v2451_v8 = vadd.f32 %v2450_v58, %v2282_v47  ;;  %v2283_v46 = vpop.f32.mrf.mxu1  ;;  %v2115_v29 = vadd.f32 %v7058_v22, %v2114_v42  ;;  %v5895_v58 = vld [vmem:[%s6758_s4 + $0x28] sm:$0xff] }
 0x2cf   : > { %v7247_v54 = vadd.f32 %v2619_v36, %v2451_v8  ;;  %v2284_v55 = vadd.f32 %v2283_v46, %v2115_v29 }
 0x2d1   : > { %7681 = vst [vmem:[#allocation44_spill] sm:$0xff] %v7247_v54  ;;  %v5691_v54 = vld [vmem:[%s6748_s3 + $0x144] sm:$0xf0] }
 0x2d4   : > { %v2452_v45 = vpop.f32.mrf.mxu2  ;;  %v2117_v21 = vpop.f32.mrf.mxu0 }
 0x2d5   : > { %v7253_v38 = vpop.f32.mrf.mxu3  ;;  %v7255_v12 = vadd.f32 %v2452_v45, %v2284_v55  ;;  %v2286_v47 = vpop.f32.mrf.mxu1  ;;  %v2118_v8 = vadd.f32 %v7058_v22, %v2117_v21  ;;  %v4656_v21 = vld [vmem:[%s6748_s3 + $0x148] sm:$0xf0] }
 0x2d6   : > { %7682 = vst [vmem:[#allocation45_spill] sm:$0xff] %v7253_v38  ;;  %v5688_v38 = vld [vmem:[%s6748_s3 + $0x134] sm:$0xf] }
 0x2d7   : > { %7683 = vst [vmem:[#allocation46_spill] sm:$0xff] %v7255_v12  ;;  %v2287_v36 = vadd.f32 %v2286_v47, %v2118_v8  ;;  %2672 = vmatmul.bf16.gmra.mxu0 %v4631_v44  ;;  %v4655_v44 = vor.u32 %v5691_v54, %v4654_v52 }
 0x2d8   : > { %2841 = vmatmul.bf16.gmra.mxu1 %v4635_v3  ;;  %v4659_v3 = vor.u32 %v5688_v38, %v4656_v21  ;;  %v4678_v21 = vld [vmem:[%s6748_s3 + $0x160] sm:$0xf] }
 0x2d9   : > { %3526 = vmatmul.bf16.gmra.mxu2 %v5895_v58 }
 0x2dc   : > { %v2455_v42 = vpop.f32.mrf.mxu2  ;;  %v2119_v2 = vpop.f32.mrf.mxu0 }
 0x2dd   : > { %v2624_v46 = vpop.f32.mrf.mxu3  ;;  %v2456_v29 = vadd.f32 %v2455_v42, %v2287_v36  ;;  %v2288_v45 = vpop.f32.mrf.mxu1  ;;  %v2120_v15 = vadd.f32 %v7058_v22, %v2119_v2  ;;  %v5896_v42 = vld [vmem:[%s6758_s4 + $0x30] sm:$0xff] }
 0x2df   : > { %v7260_v55 = vadd.f32 %v2624_v46, %v2456_v29  ;;  %v2289_v1 = vadd.f32 %v2288_v45, %v2120_v15 }
 0x2e1   : > { %7684 = vst [vmem:[#allocation47_spill] sm:$0xff] %v7260_v55  ;;  %v5697_v55 = vld [vmem:[%s6748_s3 + $0x174] sm:$0xf0] }
 0x2e4   : > { %v2457_v12 = vpop.f32.mrf.mxu2  ;;  %v2122_v8 = vpop.f32.mrf.mxu0 }
 0x2e5   : > { %v7266_v47 = vpop.f32.mrf.mxu3  ;;  %v7268_v58 = vadd.f32 %v2457_v12, %v2289_v1  ;;  %v2291_v36 = vpop.f32.mrf.mxu1  ;;  %v2123_v46 = vadd.f32 %v7058_v22, %v2122_v8  ;;  %v4680_v8 = vld [vmem:[%s6748_s3 + $0x178] sm:$0xf0] }
 0x2e6   : > { %7685 = vst [vmem:[#allocation48_spill] sm:$0xff] %v7266_v47  ;;  %v5694_v47 = vld [vmem:[%s6748_s3 + $0x164] sm:$0xf] }
 0x2e7   : > { %7686 = vst [vmem:[#allocation49_spill] sm:$0xff] %v7268_v58  ;;  %v2292_v29 = vadd.f32 %v2291_v36, %v2123_v46  ;;  %2677 = vmatmul.bf16.gmra.mxu0 %v4655_v44  ;;  %v4679_v44 = vor.u32 %v5697_v55, %v4678_v21 }
 0x2e8   : > { %2846 = vmatmul.bf16.gmra.mxu1 %v4659_v3  ;;  %v4683_v3 = vor.u32 %v5694_v47, %v4680_v8  ;;  %v4702_v8 = vld [vmem:[%s6748_s3 + $0x190] sm:$0xf] }
 0x2e9   : > { %3531 = vmatmul.bf16.gmra.mxu2 %v5896_v42 }
 0x2ec   : > { %v2460_v2 = vpop.f32.mrf.mxu2  ;;  %v2124_v54 = vpop.f32.mrf.mxu0 }
 0x2ed   : > { %v2629_v45 = vpop.f32.mrf.mxu3  ;;  %v2461_v15 = vadd.f32 %v2460_v2, %v2292_v29  ;;  %v2293_v38 = vpop.f32.mrf.mxu1  ;;  %v2125_v12 = vadd.f32 %v7058_v22, %v2124_v54  ;;  %v5897_v2 = vld [vmem:[%s6758_s4 + $0x38] sm:$0xff] }
 0x2ef   : > { %v7273_v1 = vadd.f32 %v2629_v45, %v2461_v15  ;;  %v2294_v52 = vadd.f32 %v2293_v38, %v2125_v12 }
 0x2f1   : > { %7687 = vst [vmem:[#allocation50_spill] sm:$0xff] %v7273_v1  ;;  %v5703_v1 = vld [vmem:[%s6748_s3 + $0x1a4] sm:$0xf0] }
 0x2f4   : > { %v2462_v58 = vpop.f32.mrf.mxu2  ;;  %v2127_v46 = vpop.f32.mrf.mxu0 }
 0x2f5   : > { %v7279_v36 = vpop.f32.mrf.mxu3  ;;  %v7281_v42 = vadd.f32 %v2462_v58, %v2294_v52  ;;  %v2296_v29 = vpop.f32.mrf.mxu1  ;;  %v2128_v45 = vadd.f32 %v7058_v22, %v2127_v46  ;;  %v4704_v46 = vld [vmem:[%s6748_s3 + $0x1a8] sm:$0xf0] }
 0x2f6   : > { %7688 = vst [vmem:[#allocation51_spill] sm:$0xff] %v7279_v36  ;;  %v5700_v36 = vld [vmem:[%s6748_s3 + $0x194] sm:$0xf] }
 0x2f7   : > { %7689 = vst [vmem:[#allocation52_spill] sm:$0xff] %v7281_v42  ;;  %v2297_v15 = vadd.f32 %v2296_v29, %v2128_v45  ;;  %2682 = vmatmul.bf16.gmra.mxu0 %v4679_v44  ;;  %v4703_v29 = vor.u32 %v5703_v1, %v4702_v8  ;;  %v4707_v44 = vor.u32 %v5700_v36, %v4704_v46  ;;  %v5706_v8 = vld [vmem:[%s6748_s3 + $0x1c4] sm:$0xf]  ;;  %v4728_v46 = vld [vmem:[%s6748_s3 + $0x1d8] sm:$0xf0] }
 0x2f8   : > { %2851 = vmatmul.bf16.gmra.mxu1 %v4683_v3 }
 0x2f9   : > { %3536 = vmatmul.bf16.gmra.mxu2 %v5897_v2 }
 0x2fc   : > { %v2465_v54 = vpop.f32.mrf.mxu2  ;;  %v2129_v55 = vpop.f32.mrf.mxu0 }
 0x2fd   : > { %v2634_v38 = vpop.f32.mrf.mxu3  ;;  %v2466_v12 = vadd.f32 %v2465_v54, %v2297_v15  ;;  %v2298_v47 = vpop.f32.mrf.mxu1  ;;  %v2130_v58 = vadd.f32 %v7058_v22, %v2129_v55  ;;  %v5898_v15 = vld [vmem:[%s6758_s4 + $0x40] sm:$0xff] }
 0x2fe   : > { %v7295_v22 = vld [vmem:[#allocation11] ss:$0 sm:$0xff] }
 0x2ff   : > { %v7286_v52 = vadd.f32 %v2634_v38, %v2466_v12  ;;  %v2299_v21 = vadd.f32 %v2298_v47, %v2130_v58  ;;  %v4726_v55 = vld [vmem:[%s6748_s3 + $0x1c0] sm:$0xf] }
 0x301   : > { %7690 = vst [vmem:[#allocation53_spill] sm:$0xff] %v7286_v52  ;;  %v4731_v52 = vor.u32 %v5706_v8, %v4728_v46 }
 0x304   : > { %v2467_v42 = vpop.f32.mrf.mxu2  ;;  %v2648_v2 = vpop.f32.mrf.mxu0 }
 0x305   : > { %v7292_v3 = vadd.f32 %v2467_v42, %v2299_v21  ;;  %v2817_v45 = vpop.f32.mrf.mxu1  ;;  %v2649_v38 = vadd.f32 %v2648_v2, %v6852_v33  ;;  %v5709_v21 = vld [vmem:[%s6748_s3 + $0x1d4] sm:$0xf0] }
 0x307   : > { %7691 = vst [vmem:[#allocation54_spill] sm:$0xff] %v7292_v3  ;;  %2687 = vmatmul.bf16.gmra.mxu0 %v4703_v29  ;;  %v2818_v47 = vadd.f32 %v2817_v45, %v2649_v38 }
 0x308   : > { %2856 = vmatmul.bf16.gmra.mxu1 %v4707_v44 }
 0x309   : > { %3541 = vmatmul.bf16.gmra.mxu2 %v5898_v15  ;;  %v4727_v15 = vor.u32 %v5709_v21, %v4726_v55  ;;  %v3041_v3 = vmul.f32 0.01, %v2818_v47  ;;  %vm2977_vm1 = vcmp.gt.f32.partialorder %v2818_v47, 0.0 }
 0x30b   : > { %v3105_v38 = vsel %vm2977_vm1, %v2818_v47, %v3041_v3  ;;  %v4750_v3 = vld [vmem:[%s6748_s3 + $0x1f0] sm:$0xf] }
 0x30c   : > { %v3502_v54 = vpop.f32.mrf.mxu2  ;;  %v2650_v12 = vpop.f32.mrf.mxu0 }
 0x30d   : > { %v2819_v1 = vpop.f32.mrf.mxu1  ;;  %v2651_v36 = vadd.f32 %v2650_v12, %v6863_v53  ;;  %v3503_v42 = vadd.f32 %v7295_v22, %v3502_v54  ;;  %v5899_v12 = vld [vmem:[%s6758_s4 + $0x48] sm:$0xff] }
 0x30f   : > { %v2820_v58 = vadd.f32 %v2819_v1, %v2651_v36  ;;  %v3726_v29 = vmul.f32 0.01, %v3503_v42  ;;  %vm3662_vm0 = vcmp.gt.f32.partialorder %v3503_v42, 0.0 }
 0x311   : > { %v3042_v33 = vmul.f32 0.01, %v2820_v58  ;;  %vm2978_vm2 = vcmp.gt.f32.partialorder %v2820_v58, 0.0  ;;  %v3790_v54 = vsel %vm3662_vm0, %v3503_v42, %v3726_v29 }
 0x312   : > { %v3854_v55 = vadd.f32 %v3790_v54, %v3105_v38 }
 0x313   : > { %v3106_v1 = vsel %vm2978_vm2, %v2820_v58, %v3042_v33  ;;  %v5712_v33 = vld [vmem:[%s6748_s3 + $0x1f4] sm:$0xf] }
 0x314   : > { %v3504_v44 = vpop.f32.mrf.mxu2  ;;  %v2653_v62 = vpop.f32.mrf.mxu0 }
 0x315   : > { %v3505_v2 = vadd.f32 %v7295_v22, %v3504_v44  ;;  %v2822_v53 = vpop.f32.mrf.mxu1  ;;  %v2654_v44 = vadd.f32 %v2653_v62, %v6866_v61 }
 0x317   : > { %vm3663_vm3 = vcmp.gt.f32.partialorder %v3505_v2, 0.0  ;;  %v3727_v45 = vmul.f32 0.01, %v3505_v2  ;;  %2692 = vmatmul.bf16.gmra.mxu0 %v4727_v15  ;;  %v2823_v47 = vadd.f32 %v2822_v53, %v2654_v44  ;;  %v5715_v15 = vld [vmem:[%s6748_s3 + $0x204] sm:$0xf0] }
 0x318   : > { %2861 = vmatmul.bf16.gmra.mxu1 %v4731_v52 }
 0x319   : > { %v3791_v36 = vsel %vm3663_vm3, %v3505_v2, %v3727_v45  ;;  %3546 = vmatmul.bf16.gmra.mxu2 %v5899_v12  ;;  %v4752_v2 = vld [vmem:[%s6748_s3 + $0x208] sm:$0xf0]  ;;  %v4751_v45 = vor.u32 %v5715_v15, %v4750_v3  ;;  %v3043_v61 = vmul.f32 0.01, %v2823_v47  ;;  %vm2979_vm5 = vcmp.gt.f32.partialorder %v2823_v47, 0.0 }
 0x31a   : > { %v3855_v21 = vadd.f32 %v3791_v36, %v3106_v1  ;;  %v4755_v38 = vor.u32 %v5712_v33, %v4752_v2  ;;  %v5900_v36 = vld [vmem:[%s6758_s4 + $0x50] sm:$0xff] }
 0x31c   : > { %v3507_v8 = vpop.f32.mrf.mxu2  ;;  %v3918_v46 = vpack.c.bf16 %v3855_v21, %v3854_v55  ;;  %v2655_v63 = vpop.f32.mrf.mxu0  ;;  %v3107_v21 = vsel %vm2979_vm5, %v2823_v47, %v3043_v61  ;;  %v4774_v47 = vld [vmem:[%s6748_s3 + $0x220] sm:$0xf]  ;;  %v4776_v61 = vld [vmem:[%s6748_s3 + $0x238] sm:$0xf0] }
 0x31d   : > { %v2824_v42 = vpop.f32.mrf.mxu1  ;;  %v2656_v29 = vadd.f32 %v2655_v63, %v6877_v18  ;;  %v3508_v52 = vadd.f32 %v7295_v22, %v3507_v8 }
 0x31e   : > { %4022 = vmatmul.bf16.vlgmr.msrb.gmra.mxu3 %v3918_v46 }
 0x31f   : > { %v2825_v58 = vadd.f32 %v2824_v42, %v2656_v29  ;;  %v3728_v12 = vmul.f32 0.01, %v3508_v52  ;;  %vm3664_vm4 = vcmp.gt.f32.partialorder %v3508_v52, 0.0 }
 0x321   : > { %v3044_v62 = vmul.f32 0.01, %v2825_v58  ;;  %vm2980_vm6 = vcmp.gt.f32.partialorder %v2825_v58, 0.0  ;;  %v3792_v55 = vsel %vm3664_vm4, %v3508_v52, %v3728_v12 }
 0x322   : > { %v3856_v44 = vadd.f32 %v3792_v55, %v3107_v21 }
 0x323   : > { %v3108_v8 = vsel %vm2980_vm6, %v2825_v58, %v3044_v62 }
 0x324   : > { %v3509_v54 = vpop.f32.mrf.mxu2  ;;  %v2658_v18 = vpop.f32.mrf.mxu0 }
 0x325   : > { %v3510_v1 = vadd.f32 %v7295_v22, %v3509_v54  ;;  %v2827_v63 = vpop.f32.mrf.mxu1  ;;  %v2659_v15 = vadd.f32 %v2658_v18, %v6880_v28 }
 0x327   : > { %vm3665_vm7 = vcmp.gt.f32.partialorder %v3510_v1, 0.0  ;;  %v3729_v53 = vmul.f32 0.01, %v3510_v1  ;;  %2697 = vmatmul.bf16.gmra.mxu0 %v4751_v45  ;;  %v2828_v58 = vadd.f32 %v2827_v63, %v2659_v15  ;;  %v5721_v45 = vld [vmem:[%s6748_s3 + $0x234] sm:$0xf0] }
 0x328   : > { %2866 = vmatmul.bf16.gmra.mxu1 %v4755_v38  ;;  %v5718_v38 = vld [vmem:[%s6748_s3 + $0x224] sm:$0xf] }
 0x329   : > { %v3793_v46 = vsel %vm3665_vm7, %v3510_v1, %v3729_v53  ;;  %3551 = vmatmul.bf16.gmra.mxu2 %v5900_v36  ;;  %v4775_v36 = vor.u32 %v5721_v45, %v4774_v47  ;;  %v4779_v55 = vor.u32 %v5718_v38, %v4776_v61  ;;  %v3045_v28 = vmul.f32 0.01, %v2828_v58 }
 0x32a   : > { %v3857_v42 = vadd.f32 %v3793_v46, %v3108_v8  ;;  %v5901_v8 = vld [vmem:[%s6758_s4 + $0x58] sm:$0xff]  ;;  %vm2981_vm9 = vcmp.gt.f32.partialorder %v2828_v58, 0.0 }
 0x32c   : > { %v3512_v29 = vpop.f32.mrf.mxu2  ;;  %v3919_v3 = vpack.c.bf16 %v3857_v42, %v3856_v44  ;;  %v2660_v33 = vpop.f32.mrf.mxu0  ;;  %v3109_v44 = vsel %vm2981_vm9, %v2828_v58, %v3045_v28  ;;  %v4798_v58 = vld [vmem:[%s6748_s3 + $0x250] sm:$0xf] }
 0x32d   : > { %v2829_v52 = vpop.f32.mrf.mxu1  ;;  %v2661_v2 = vadd.f32 %v2660_v33, %v6891_v50  ;;  %v3513_v12 = vadd.f32 %v7295_v22, %v3512_v29 }
 0x32e   : > { %4027 = vmatmul.bf16.gmra.mxu3 %v3919_v3 }
 0x32f   : > { %v2830_v54 = vadd.f32 %v2829_v52, %v2661_v2  ;;  %v3730_v62 = vmul.f32 0.01, %v3513_v12  ;;  %vm3666_vm8 = vcmp.gt.f32.partialorder %v3513_v12, 0.0 }
 0x331   : > { %v3046_v18 = vmul.f32 0.01, %v2830_v54  ;;  %vm2982_vm10 = vcmp.gt.f32.partialorder %v2830_v54, 0.0  ;;  %v3794_v46 = vsel %vm3666_vm8, %v3513_v12, %v3730_v62  ;;  %v5727_v62 = vld [vmem:[%s6748_s3 + $0x264] sm:$0xf0] }
 0x332   : > { %v3858_v3 = vadd.f32 %v3794_v46, %v3109_v44 }
 0x333   : > { %v3110_v42 = vsel %vm2982_vm10, %v2830_v54, %v3046_v18  ;;  %v4799_v18 = vor.u32 %v5727_v62, %v4798_v58 }
 0x334   : > { %v3514_v1 = vpop.f32.mrf.mxu2  ;;  %v2663_v50 = vpop.f32.mrf.mxu0 }
 0x335   : > { %v3515_v53 = vadd.f32 %v7295_v22, %v3514_v1  ;;  %v2832_v21 = vpop.f32.mrf.mxu1  ;;  %v2664_v2 = vadd.f32 %v2663_v50, %v6894_v59  ;;  %v5724_v1 = vld [vmem:[%s6748_s3 + $0x254] sm:$0xf] }
 0x337   : > { %vm3667_vm11 = vcmp.gt.f32.partialorder %v3515_v53, 0.0  ;;  %v3731_v63 = vmul.f32 0.01, %v3515_v53  ;;  %2702 = vmatmul.bf16.gmra.mxu0 %v4775_v36  ;;  %v2833_v54 = vadd.f32 %v2832_v21, %v2664_v2  ;;  %v4800_v36 = vld [vmem:[%s6748_s3 + $0x268] sm:$0xf0] }
 0x338   : > { %2871 = vmatmul.bf16.gmra.mxu1 %v4779_v55 }
 0x339   : > { %v3795_v29 = vsel %vm3667_vm11, %v3515_v53, %v3731_v63  ;;  %3556 = vmatmul.bf16.gmra.mxu2 %v5901_v8  ;;  %v4803_v53 = vor.u32 %v5724_v1, %v4800_v36  ;;  %v3047_v59 = vmul.f32 0.01, %v2833_v54  ;;  %v5902_v63 = vld [vmem:[%s6758_s4 + $0x60] sm:$0xff]  ;;  %vm2983_vm13 = vcmp.gt.f32.partialorder %v2833_v54, 0.0  ;;  %v5733_v1 = vld [vmem:[%s6748_s3 + $0x294] sm:$0xf0] }
 0x33a   : > { %v3859_v15 = vadd.f32 %v3795_v29, %v3110_v42  ;;  %v5730_v36 = vld [vmem:[%s6748_s3 + $0x284] sm:$0xf] }
 0x33b   : > { %v3111_v42 = vsel %vm2983_vm13, %v2833_v54, %v3047_v59  ;;  %v4822_v54 = vld [vmem:[%s6748_s3 + $0x280] sm:$0xf] }
 0x33c   : > { %v3517_v33 = vpop.f32.mrf.mxu2  ;;  %v3920_v52 = vpack.c.bf16 %v3859_v15, %v3858_v3  ;;  %v2665_v47 = vpop.f32.mrf.mxu0 }
 0x33d   : > { %v2834_v12 = vpop.f32.mrf.mxu1  ;;  %v2666_v45 = vadd.f32 %v2665_v47, %v6905_v19  ;;  %v3518_v38 = vadd.f32 %v7295_v22, %v3517_v33 }
 0x33e   : > { %4032 = vmatmul.bf16.gmra.mxu3 %v3920_v52 }
 0x33f   : > { %v2835_v61 = vadd.f32 %v2834_v12, %v2666_v45  ;;  %v3732_v55 = vmul.f32 0.01, %v3518_v38  ;;  %vm3668_vm12 = vcmp.gt.f32.partialorder %v3518_v38, 0.0 }
 0x341   : > { %v3048_v50 = vmul.f32 0.01, %v2835_v61  ;;  %vm2984_vm14 = vcmp.gt.f32.partialorder %v2835_v61, 0.0  ;;  %v3796_v44 = vsel %vm3668_vm12, %v3518_v38, %v3732_v55  ;;  %v4824_v55 = vld [vmem:[%s6748_s3 + $0x298] sm:$0xf0] }
 0x342   : > { %v3860_v15 = vadd.f32 %v3796_v44, %v3111_v42  ;;  %v4827_v59 = vor.u32 %v5730_v36, %v4824_v55  ;;  %v4848_v36 = vld [vmem:[%s6748_s3 + $0x2c8] sm:$0xf0] }
 0x343   : > { %v3112_v29 = vsel %vm2984_vm14, %v2835_v61, %v3048_v50 }
 0x344   : > { %v3519_v28 = vpop.f32.mrf.mxu2  ;;  %v2668_v19 = vpop.f32.mrf.mxu0 }
 0x345   : > { %v3520_v8 = vadd.f32 %v7295_v22, %v3519_v28  ;;  %v2837_v46 = vpop.f32.mrf.mxu1  ;;  %v2669_v47 = vadd.f32 %v2668_v19, %v6908_v27 }
 0x347   : > { %vm3669_vm15 = vcmp.gt.f32.partialorder %v3520_v8, 0.0  ;;  %v3733_v21 = vmul.f32 0.01, %v3520_v8  ;;  %2707 = vmatmul.bf16.gmra.mxu0 %v4799_v18  ;;  %v2838_v61 = vadd.f32 %v2837_v46, %v2669_v47 }
 0x348   : > { %2876 = vmatmul.bf16.gmra.mxu1 %v4803_v53  ;;  %v4823_v53 = vor.u32 %v5733_v1, %v4822_v54  ;;  %v5736_v1 = vld [vmem:[%s6748_s3 + $0x2b4] sm:$0xf] }
 0x349   : > { %v3797_v3 = vsel %vm3669_vm15, %v3520_v8, %v3733_v21  ;;  %3561 = vmatmul.bf16.gmra.mxu2 %v5902_v63  ;;  %v3049_v27 = vmul.f32 0.01, %v2838_v61  ;;  %v5903_v63 = vld [vmem:[%s6758_s4 + $0x68] sm:$0xff]  ;;  %vm2985_vm1 = vcmp.gt.f32.partialorder %v2838_v61, 0.0 }
 0x34a   : > { %v3861_v33 = vadd.f32 %v3797_v3, %v3112_v29 }
 0x34b   : > { %v3113_v21 = vsel %vm2985_vm1, %v2838_v61, %v3049_v27 }
 0x34c   : > { %v3522_v52 = vpop.f32.mrf.mxu2  ;;  %v3921_v2 = vpack.c.bf16 %v3861_v33, %v3860_v15  ;;  %v2670_v12 = vpop.f32.mrf.mxu0 }
 0x34d   : > { %v2839_v45 = vpop.f32.mrf.mxu1  ;;  %v2671_v38 = vadd.f32 %v2670_v12, %v6919_v49  ;;  %v3523_v58 = vadd.f32 %v7295_v22, %v3522_v52 }
 0x34e   : > { %4037 = vmatmul.bf16.gmra.mxu3 %v3921_v2 }
 0x34f   : > { %v2840_v62 = vadd.f32 %v2839_v45, %v2671_v38  ;;  %v3734_v28 = vmul.f32 0.01, %v3523_v58  ;;  %vm3670_vm0 = vcmp.gt.f32.partialorder %v3523_v58, 0.0 }
 0x351   : > { %v3050_v50 = vmul.f32 0.01, %v2840_v62  ;;  %vm2986_vm2 = vcmp.gt.f32.partialorder %v2840_v62, 0.0  ;;  %v3798_v44 = vsel %vm3670_vm0, %v3523_v58, %v3734_v28  ;;  %v4846_v58 = vld [vmem:[%s6748_s3 + $0x2b0] sm:$0xf] }
 0x352   : > { %v3862_v3 = vadd.f32 %v3798_v44, %v3113_v21 }
 0x353   : > { %v3114_v42 = vsel %vm2986_vm2, %v2840_v62, %v3050_v50  ;;  %v5739_v62 = vld [vmem:[%s6748_s3 + $0x2c4] sm:$0xf0] }
 0x354   : > { %v3524_v18 = vpop.f32.mrf.mxu2  ;;  %v2673_v49 = vpop.f32.mrf.mxu0 }
 0x355   : > { %v3525_v8 = vadd.f32 %v7295_v22, %v3524_v18  ;;  %v2842_v19 = vpop.f32.mrf.mxu1  ;;  %v2674_v2 = vadd.f32 %v2673_v49, %v6922_v60  ;;  %v4847_v18 = vor.u32 %v5739_v62, %v4846_v58  ;;  %v5745_v58 = vld [vmem:[%s6748_s3 + $0x2f4] sm:$0xf0] }
 0x357   : > { %vm3671_vm3 = vcmp.gt.f32.partialorder %v3525_v8, 0.0  ;;  %v3735_v46 = vmul.f32 0.01, %v3525_v8  ;;  %2712 = vmatmul.bf16.gmra.mxu0 %v4823_v53  ;;  %v2843_v54 = vadd.f32 %v2842_v19, %v2674_v2  ;;  %v4851_v53 = vor.u32 %v5736_v1, %v4848_v36 }
 0x358   : > { %2881 = vmatmul.bf16.gmra.mxu1 %v4827_v59 }
 0x359   : > { %v3799_v29 = vsel %vm3671_vm3, %v3525_v8, %v3735_v46  ;;  %3566 = vmatmul.bf16.gmra.mxu2 %v5903_v63  ;;  %v3051_v60 = vmul.f32 0.01, %v2843_v54  ;;  %v5904_v8 = vld [vmem:[%s6758_s4 + $0x70] sm:$0xff]  ;;  %vm2987_vm5 = vcmp.gt.f32.partialorder %v2843_v54, 0.0 }
 0x35a   : > { %v3863_v15 = vadd.f32 %v3799_v29, %v3114_v42 }
 0x35b   : > { %v3115_v63 = vsel %vm2987_vm5, %v2843_v54, %v3051_v60  ;;  %v5742_v54 = vld [vmem:[%s6748_s3 + $0x2e4] sm:$0xf]  ;;  %v5905_v60 = vld [vmem:[%s6758_s4 + $0x78] sm:$0xff] }
 0x35c   : > { %v3527_v33 = vpop.f32.mrf.mxu2  ;;  %v3922_v52 = vpack.c.bf16 %v3863_v15, %v3862_v3  ;;  %v2675_v47 = vpop.f32.mrf.mxu0 }
 0x35d   : > { %v2844_v12 = vpop.f32.mrf.mxu1  ;;  %v2676_v45 = vadd.f32 %v2675_v47, %v6933_v20  ;;  %v3528_v38 = vadd.f32 %v7295_v22, %v3527_v33 }
 0x35e   : > { %4042 = vmatmul.bf16.gmra.mxu3 %v3922_v52 }
 0x35f   : > { %v2845_v61 = vadd.f32 %v2844_v12, %v2676_v45  ;;  %v3736_v55 = vmul.f32 0.01, %v3528_v38  ;;  %vm3672_vm4 = vcmp.gt.f32.partialorder %v3528_v38, 0.0  ;;  %v4870_v12 = vld [vmem:[%s6748_s3 + $0x2e0] sm:$0xf] }
 0x360   : > { %v4871_v36 = vor.u32 %v5745_v58, %v4870_v12  ;;  %v4896_v12 = vld [vmem:[%s6748_s3 + $0x328] sm:$0xf0] }
 0x361   : > { %v3052_v59 = vmul.f32 0.01, %v2845_v61  ;;  %vm2988_vm6 = vcmp.gt.f32.partialorder %v2845_v61, 0.0  ;;  %v3800_v49 = vsel %vm3672_vm4, %v3528_v38, %v3736_v55 }
 0x362   : > { %v3864_v21 = vadd.f32 %v3800_v49, %v3115_v63 }
 0x363   : > { %v3116_v44 = vsel %vm2988_vm6, %v2845_v61, %v3052_v59  ;;  %v4872_v61 = vld [vmem:[%s6748_s3 + $0x2f8] sm:$0xf0] }
 0x364   : > { %v3529_v28 = vpop.f32.mrf.mxu2  ;;  %v2678_v20 = vpop.f32.mrf.mxu0  ;;  %v4875_v55 = vor.u32 %v5742_v54, %v4872_v61 }
 0x365   : > { %v3530_v27 = vadd.f32 %v7295_v22, %v3529_v28  ;;  %v2847_v50 = vpop.f32.mrf.mxu1  ;;  %v2679_v15 = vadd.f32 %v2678_v20, %v6936_v32 }
 0x367   : > { %vm3673_vm7 = vcmp.gt.f32.partialorder %v3530_v27, 0.0  ;;  %v3737_v19 = vmul.f32 0.01, %v3530_v27  ;;  %2717 = vmatmul.bf16.gmra.mxu0 %v4847_v18  ;;  %v2848_v45 = vadd.f32 %v2847_v50, %v2679_v15  ;;  %v4894_v15 = vld [vmem:[%s6748_s3 + $0x310] sm:$0xf] }
 0x368   : > { %2886 = vmatmul.bf16.gmra.mxu1 %v4851_v53 }
 0x369   : > { %v3801_v46 = vsel %vm3673_vm7, %v3530_v27, %v3737_v19  ;;  %3571 = vmatmul.bf16.gmra.mxu2 %v5904_v8  ;;  %v3053_v32 = vmul.f32 0.01, %v2848_v45  ;;  %vm2989_vm9 = vcmp.gt.f32.partialorder %v2848_v45, 0.0 }
 0x36a   : > { %v3865_v42 = vadd.f32 %v3801_v46, %v3116_v44 }
 0x36b   : > { %v3117_v20 = vsel %vm2989_vm9, %v2848_v45, %v3053_v32 }
 0x36c   : > { %v3532_v29 = vpop.f32.mrf.mxu2  ;;  %v3923_v3 = vpack.c.bf16 %v3865_v42, %v3864_v21  ;;  %v2680_v33 = vpop.f32.mrf.mxu0 }
 0x36d   : > { %v2849_v52 = vpop.f32.mrf.mxu1  ;;  %v2681_v2 = vadd.f32 %v2680_v33, %v6947_v57  ;;  %v3533_v47 = vadd.f32 %v7295_v22, %v3532_v29 }
 0x36e   : > { %4047 = vmatmul.bf16.gmra.mxu3 %v3923_v3 }
 0x36f   : > { %v2850_v38 = vadd.f32 %v2849_v52, %v2681_v2  ;;  %v3738_v62 = vmul.f32 0.01, %v3533_v47  ;;  %vm3674_vm8 = vcmp.gt.f32.partialorder %v3533_v47, 0.0  ;;  %v5751_v2 = vld [vmem:[%s6748_s3 + $0x324] sm:$0xf0] }
 0x370   : > { %v4895_v58 = vor.u32 %v5751_v2, %v4894_v15 }
 0x371   : > { %v3054_v28 = vmul.f32 0.01, %v2850_v38  ;;  %vm2990_vm10 = vcmp.gt.f32.partialorder %v2850_v38, 0.0  ;;  %v3802_v59 = vsel %vm3674_vm8, %v3533_v47, %v3738_v62  ;;  %v5748_v47 = vld [vmem:[%s6748_s3 + $0x314] sm:$0xf] }
 0x372   : > { %v3866_v49 = vadd.f32 %v3802_v59, %v3117_v20  ;;  %v4899_v54 = vor.u32 %v5748_v47, %v4896_v12 }
 0x373   : > { %v3118_v50 = vsel %vm2990_vm10, %v2850_v38, %v3054_v28 }
 0x374   : > { %v3534_v1 = vpop.f32.mrf.mxu2  ;;  %v2683_v57 = vpop.f32.mrf.mxu0 }
 0x375   : > { %v3535_v18 = vadd.f32 %v7295_v22, %v3534_v1  ;;  %v2852_v53 = vpop.f32.mrf.mxu1  ;;  %v2684_v46 = vadd.f32 %v2683_v57, %v6950_v4 }
 0x377   : > { %vm3675_vm11 = vcmp.gt.f32.partialorder %v3535_v18, 0.0  ;;  %v3739_v27 = vmul.f32 0.01, %v3535_v18  ;;  %2722 = vmatmul.bf16.gmra.mxu0 %v4871_v36  ;;  %v2853_v33 = vadd.f32 %v2852_v53, %v2684_v46  ;;  %v5906_v36 = vld [vmem:[%s6758_s4 + $0x80] sm:$0xff] }
 0x378   : > { %2891 = vmatmul.bf16.gmra.mxu1 %v4875_v55 }
 0x379   : > { %v3803_v8 = vsel %vm3675_vm11, %v3535_v18, %v3739_v27  ;;  %3576 = vmatmul.bf16.gmra.mxu2 %v5905_v60  ;;  %v3055_v4 = vmul.f32 0.01, %v2853_v33  ;;  %vm2991_vm13 = vcmp.gt.f32.partialorder %v2853_v33, 0.0 }
 0x37a   : > { %v3867_v19 = vadd.f32 %v3803_v8, %v3118_v50 }
 0x37b   : > { %v3119_v28 = vsel %vm2991_vm13, %v2853_v33, %v3055_v4 }
 0x37c   : > { %v3537_v63 = vpop.f32.mrf.mxu2  ;;  %v3924_v44 = vpack.c.bf16 %v3867_v19, %v3866_v49  ;;  %v2685_v21 = vpop.f32.mrf.mxu0 }
 0x37d   : > { %v2854_v42 = vpop.f32.mrf.mxu1  ;;  %v2686_v29 = vadd.f32 %v2685_v21, %v6961_v31  ;;  %v3538_v3 = vadd.f32 %v7295_v22, %v3537_v63  ;;  %v4918_v63 = vld [vmem:[%s6748_s3 + $0x340] sm:$0xf]  ;;  %v5757_v21 = vld [vmem:[%s6748_s3 + $0x354] sm:$0xf0] }
 0x37e   : > { %4052 = vmatmul.bf16.gmra.mxu3 %v3924_v44  ;;  %v4919_v33 = vor.u32 %v5757_v21, %v4918_v63 }
 0x37f   : > { %v2855_v52 = vadd.f32 %v2854_v42, %v2686_v29  ;;  %v3740_v45 = vmul.f32 0.01, %v3538_v3  ;;  %vm3676_vm12 = vcmp.gt.f32.partialorder %v3538_v3, 0.0  ;;  %v5754_v42 = vld [vmem:[%s6748_s3 + $0x344] sm:$0xf] }
 0x380   : > { %v4920_v29 = vld [vmem:[%s6748_s3 + $0x358] sm:$0xf0] }
 0x381   : > { %v3056_v61 = vmul.f32 0.01, %v2855_v52  ;;  %vm2992_vm14 = vcmp.gt.f32.partialorder %v2855_v52, 0.0  ;;  %v3804_v55 = vsel %vm3676_vm12, %v3538_v3, %v3740_v45  ;;  %v5907_v45 = vld [vmem:[%s6758_s4 + $0x88] sm:$0xff] }
 0x382   : > { %v3868_v53 = vadd.f32 %v3804_v55, %v3119_v28 }
 0x383   : > { %v3120_v18 = vsel %vm2992_vm14, %v2855_v52, %v3056_v61  ;;  %v4923_v52 = vor.u32 %v5754_v42, %v4920_v29 }
 0x384   : > { %v3539_v38 = vpop.f32.mrf.mxu2  ;;  %v2688_v31 = vpop.f32.mrf.mxu0 }
 0x385   : > { %v3540_v62 = vadd.f32 %v7295_v22, %v3539_v38  ;;  %v2857_v1 = vpop.f32.mrf.mxu1  ;;  %v2689_v20 = vadd.f32 %v2688_v31, %v6964_v41 }
 0x387   : > { %vm3677_vm15 = vcmp.gt.f32.partialorder %v3540_v62, 0.0  ;;  %v3741_v32 = vmul.f32 0.01, %v3540_v62  ;;  %2727 = vmatmul.bf16.gmra.mxu0 %v4895_v58  ;;  %v2858_v44 = vadd.f32 %v2857_v1, %v2689_v20 }
 0x388   : > { %2896 = vmatmul.bf16.gmra.mxu1 %v4899_v54  ;;  %v7378_v54 = vpop.f32.mrf.mxu3 }
 0x389   : > { %v3805_v57 = vsel %vm3677_vm15, %v3540_v62, %v3741_v32  ;;  %3581 = vmatmul.bf16.gmra.mxu2 %v5906_v36  ;;  %v3057_v41 = vmul.f32 0.01, %v2858_v44  ;;  %vm2993_vm1 = vcmp.gt.f32.partialorder %v2858_v44, 0.0 }
 0x38a   : > { %v3869_v60 = vadd.f32 %v3805_v57, %v3120_v18 }
 0x38b   : > { %v3121_v4 = vsel %vm2993_vm1, %v2858_v44, %v3057_v41 }
 0x38c   : > { %v3542_v59 = vpop.f32.mrf.mxu2  ;;  %v3925_v27 = vpack.c.bf16 %v3869_v60, %v3868_v53  ;;  %v2690_v50 = vpop.f32.mrf.mxu0  ;;  %v4942_v60 = vld [vmem:[%s6748_s3 + $0x370] sm:$0xf] }
 0x38d   : > { %v2859_v8 = vpop.f32.mrf.mxu1  ;;  %v2691_v49 = vadd.f32 %v2690_v50, %v6975_v5  ;;  %v3543_v19 = vadd.f32 %v7295_v22, %v3542_v59  ;;  %v5763_v50 = vld [vmem:[%s6748_s3 + $0x384] sm:$0xf0] }
 0x38e   : > { %4057 = vmatmul.bf16.gmra.mxu3 %v3925_v27  ;;  %v4943_v44 = vor.u32 %v5763_v50, %v4942_v60 }
 0x38f   : > { %v2860_v46 = vadd.f32 %v2859_v8, %v2691_v49  ;;  %v3742_v3 = vmul.f32 0.01, %v3543_v19  ;;  %vm3678_vm0 = vcmp.gt.f32.partialorder %v3543_v19, 0.0  ;;  %v5760_v8 = vld [vmem:[%s6748_s3 + $0x374] sm:$0xf] }
 0x390   : > { %v4944_v49 = vld [vmem:[%s6748_s3 + $0x388] sm:$0xf0] }
 0x391   : > { %v3058_v2 = vmul.f32 0.01, %v2860_v46  ;;  %vm2994_vm2 = vcmp.gt.f32.partialorder %v2860_v46, 0.0  ;;  %v3806_v38 = vsel %vm3678_vm0, %v3543_v19, %v3742_v3  ;;  %v5908_v3 = vld [vmem:[%s6758_s4 + $0x90] sm:$0xff] }
 0x392   : > { %v3870_v31 = vadd.f32 %v3806_v38, %v3121_v4 }
 0x393   : > { %v3122_v61 = vsel %vm2994_vm2, %v2860_v46, %v3058_v2 }
 0x394   : > { %v3544_v15 = vpop.f32.mrf.mxu2  ;;  %v2693_v5 = vpop.f32.mrf.mxu0 }
 0x395   : > { %v3545_v47 = vadd.f32 %v7295_v22, %v3544_v15  ;;  %v2862_v12 = vpop.f32.mrf.mxu1  ;;  %v2694_v32 = vadd.f32 %v2693_v5, %v6978_v14  ;;  %v4947_v14 = vor.u32 %v5760_v8, %v4944_v49 }
 0x397   : > { %vm3679_vm3 = vcmp.gt.f32.partialorder %v3545_v47, 0.0  ;;  %v3743_v58 = vmul.f32 0.01, %v3545_v47  ;;  %2732 = vmatmul.bf16.gmra.mxu0 %v4919_v33  ;;  %v2863_v59 = vadd.f32 %v2862_v12, %v2694_v32 }
 0x398   : > { %2901 = vmatmul.bf16.gmra.mxu1 %v4923_v52 }
 0x399   : > { %v3807_v62 = vsel %vm3679_vm3, %v3545_v47, %v3743_v58  ;;  %3586 = vmatmul.bf16.gmra.mxu2 %v5907_v45  ;;  %v3059_v46 = vmul.f32 0.01, %v2863_v59  ;;  %vm2995_vm5 = vcmp.gt.f32.partialorder %v2863_v59, 0.0 }
 0x39a   : > { %v3871_v1 = vadd.f32 %v3807_v62, %v3122_v61 }
 0x39b   : > { %v3123_v52 = vsel %vm2995_vm5, %v2863_v59, %v3059_v46 }
 0x39c   : > { %v3547_v36 = vpop.f32.mrf.mxu2  ;;  %v3926_v55 = vpack.c.bf16 %v3871_v1, %v3870_v31  ;;  %v2695_v28 = vpop.f32.mrf.mxu0 }
 0x39d   : > { %v2864_v18 = vpop.f32.mrf.mxu1  ;;  %v2696_v57 = vadd.f32 %v2695_v28, %v6989_v43  ;;  %v3548_v53 = vadd.f32 %v7295_v22, %v3547_v36  ;;  %v4966_v36 = vld [vmem:[%s6748_s3 + $0x3a0] sm:$0xf] }
 0x39e   : > { %4062 = vmatmul.bf16.gmra.mxu3 %v3926_v55 }
 0x39f   : > { %v2865_v27 = vadd.f32 %v2864_v18, %v2696_v57  ;;  %v3744_v19 = vmul.f32 0.01, %v3548_v53  ;;  %vm3680_vm4 = vcmp.gt.f32.partialorder %v3548_v53, 0.0  ;;  %v5769_v18 = vld [vmem:[%s6748_s3 + $0x3b4] sm:$0xf0] }
 0x3a0   : > { %v5766_v57 = vld [vmem:[%s6748_s3 + $0x3a4] sm:$0xf] }
 0x3a1   : > { %v4023_v20 = vpop.f32.mrf.mxu3  ;;  %v3060_v21 = vmul.f32 0.01, %v2865_v27  ;;  %vm2996_vm6 = vcmp.gt.f32.partialorder %v2865_v27, 0.0  ;;  %v3808_v15 = vsel %vm3680_vm4, %v3548_v53, %v3744_v19  ;;  %v4968_v53 = vld [vmem:[%s6748_s3 + $0x3b8] sm:$0xf0] }
 0x3a2   : > { %v3872_v12 = vadd.f32 %v3808_v15, %v3123_v52  ;;  %v5909_v19 = vld [vmem:[%s6758_s4 + $0x98] sm:$0xff] }
 0x3a3   : > { %v3124_v41 = vsel %vm2996_vm6, %v2865_v27, %v3060_v21  ;;  %v4967_v27 = vor.u32 %v5769_v18, %v4966_v36 }
 0x3a4   : > { %v3549_v63 = vpop.f32.mrf.mxu2  ;;  %v2698_v42 = vpop.f32.mrf.mxu0 }
 0x3a5   : > { %v3550_v43 = vadd.f32 %v7295_v22, %v3549_v63  ;;  %v2867_v29 = vpop.f32.mrf.mxu1  ;;  %v2699_v4 = vadd.f32 %v2698_v42, %v6992_v56  ;;  %v4971_v56 = vor.u32 %v5766_v57, %v4968_v53  ;;  %v5910_v57 = vld [vmem:[%s6758_s4 + $0xa0] sm:$0xff] }
 0x3a7   : > { %vm3681_vm7 = vcmp.gt.f32.partialorder %v3550_v43, 0.0  ;;  %v3745_v33 = vmul.f32 0.01, %v3550_v43  ;;  %2737 = vmatmul.bf16.gmra.mxu0 %v4943_v44  ;;  %v2868_v55 = vadd.f32 %v2867_v29, %v2699_v4  ;;  %v5775_v4 = vld [vmem:[%s6748_s3 + $0x3e4] sm:$0xf0] }
 0x3a8   : > { %2906 = vmatmul.bf16.gmra.mxu1 %v4947_v14 }
 0x3a9   : > { %v3809_v2 = vsel %vm3681_vm7, %v3550_v43, %v3745_v33  ;;  %3591 = vmatmul.bf16.gmra.mxu2 %v5908_v3  ;;  %v4025_v47 = vpop.f32.mrf.mxu3  ;;  %vm2997_vm9 = vcmp.gt.f32.partialorder %v2868_v55, 0.0 }
 0x3aa   : > { %v5942_v5 = vpack.c.bf16 %v4025_v47, %v4023_v20  ;;  %v3873_v45 = vadd.f32 %v3809_v2, %v3124_v41  ;;  %v3061_v20 = vmul.f32 0.01, %v2868_v55 }
 0x3ac   : > { %5943 = vst [vmem:[%s7391_s15] sm:$0xff] %v5942_v5   ;;  %v3552_v38 = vpop.f32.mrf.mxu2  ;;  %v3927_v58 = vpack.c.bf16 %v3873_v45, %v3872_v12  ;;  %v2700_v61 = vpop.f32.mrf.mxu0  ;;  %v3125_v14 = vsel %vm2997_vm9, %v2868_v55, %v3061_v20  ;;  %v4990_v12 = vld [vmem:[%s6748_s3 + $0x3d0] sm:$0xf] }
 0x3ad   : > { %v2869_v62 = vpop.f32.mrf.mxu1  ;;  %v2701_v31 = vadd.f32 %v2700_v61, %v7003_v24  ;;  %v3553_v1 = vadd.f32 %v7295_v22, %v3552_v38  ;;  %v5772_v61 = vld [vmem:[%s6748_s3 + $0x3d4] sm:$0xf]  ;;  %v4991_v36 = vor.u32 %v5775_v4, %v4990_v12 }
 0x3ae   : > { %4067 = vmatmul.bf16.gmra.mxu3 %v3927_v58 }
 0x3af   : > { %v2870_v32 = vadd.f32 %v2869_v62, %v2701_v31  ;;  %v3746_v60 = vmul.f32 0.01, %v3553_v1  ;;  %vm3682_vm8 = vcmp.gt.f32.partialorder %v3553_v1, 0.0  ;;  %v4992_v62 = vld [vmem:[%s6748_s3 + $0x3e8] sm:$0xf0] }
 0x3b1   : > { %v4028_v28 = vpop.f32.mrf.mxu3  ;;  %v3062_v50 = vmul.f32 0.01, %v2870_v32  ;;  %vm2998_vm10 = vcmp.gt.f32.partialorder %v2870_v32, 0.0  ;;  %v3810_v63 = vsel %vm3682_vm8, %v3553_v1, %v3746_v60 }
 0x3b2   : > { %v3874_v29 = vadd.f32 %v3810_v63, %v3125_v14 }
 0x3b3   : > { %v3126_v46 = vsel %vm2998_vm10, %v2870_v32, %v3062_v50 }
 0x3b4   : > { %v3554_v59 = vpop.f32.mrf.mxu2  ;;  %v2703_v8 = vpop.f32.mrf.mxu0 }
 0x3b5   : > { %v3555_v24 = vadd.f32 %v7295_v22, %v3554_v59  ;;  %v2872_v49 = vpop.f32.mrf.mxu1  ;;  %v2704_v52 = vadd.f32 %v2703_v8, %v7006_v37  ;;  %v4995_v37 = vor.u32 %v5772_v61, %v4992_v62 }
 0x3b7   : > { %vm3683_vm11 = vcmp.gt.f32.partialorder %v3555_v24, 0.0  ;;  %v3747_v44 = vmul.f32 0.01, %v3555_v24  ;;  %2742 = vmatmul.bf16.gmra.mxu0 %v4967_v27  ;;  %v2873_v45 = vadd.f32 %v2872_v49, %v2704_v52  ;;  %v5016_v52 = vld [vmem:[%s6748_s3 + $0x418] sm:$0xf0] }
 0x3b8   : > { %2911 = vmatmul.bf16.gmra.mxu1 %v4971_v56 }
 0x3b9   : > { %v3811_v21 = vsel %vm3683_vm11, %v3555_v24, %v3747_v44  ;;  %3596 = vmatmul.bf16.gmra.mxu2 %v5909_v19  ;;  %v4030_v43 = vpop.f32.mrf.mxu3  ;;  %v3063_v55 = vmul.f32 0.01, %v2873_v45  ;;  %vm2999_vm13 = vcmp.gt.f32.partialorder %v2873_v45, 0.0 }
 0x3ba   : > { %v5947_v42 = vpack.c.bf16 %v4030_v43, %v4028_v28  ;;  %v3875_v3 = vadd.f32 %v3811_v21, %v3126_v46  ;;  %v5014_v43 = vld [vmem:[%s6748_s3 + $0x400] sm:$0xf] }
 0x3bb   : > { %v3127_v59 = vsel %vm2999_vm13, %v2873_v45, %v3063_v55 }
 0x3bc   : > { %6099 = vst [vmem:[%s7391_s15 + $0x8] sm:$0xff] %v5947_v42   ;;  %v3557_v15 = vpop.f32.mrf.mxu2  ;;  %v3928_v33 = vpack.c.bf16 %v3875_v3, %v3874_v29  ;;  %v2705_v41 = vpop.f32.mrf.mxu0 }
 0x3bd   : > { %v2874_v2 = vpop.f32.mrf.mxu1  ;;  %v2706_v47 = vadd.f32 %v2705_v41, %v7017_v6  ;;  %v3558_v5 = vadd.f32 %v7295_v22, %v3557_v15  ;;  %v5781_v15 = vld [vmem:[%s6748_s3 + $0x414] sm:$0xf0] }
 0x3be   : > { %4072 = vmatmul.bf16.gmra.mxu3 %v3928_v33  ;;  %v5778_v33 = vld [vmem:[%s6748_s3 + $0x404] sm:$0xf] }
 0x3bf   : > { %v2875_v38 = vadd.f32 %v2874_v2, %v2706_v47  ;;  %v3748_v31 = vmul.f32 0.01, %v3558_v5  ;;  %vm3684_vm12 = vcmp.gt.f32.partialorder %v3558_v5, 0.0  ;;  %v5015_v47 = vor.u32 %v5781_v15, %v5014_v43 }
 0x3c1   : > { %v4033_v58 = vpop.f32.mrf.mxu3  ;;  %v3064_v32 = vmul.f32 0.01, %v2875_v38  ;;  %vm3000_vm14 = vcmp.gt.f32.partialorder %v2875_v38, 0.0  ;;  %v3812_v53 = vsel %vm3684_vm12, %v3558_v5, %v3748_v31 }
 0x3c2   : > { %v3876_v24 = vadd.f32 %v3812_v53, %v3127_v59 }
 0x3c3   : > { %v3128_v27 = vsel %vm3000_vm14, %v2875_v38, %v3064_v32 }
 0x3c4   : > { %v3559_v1 = vpop.f32.mrf.mxu2  ;;  %v2708_v28 = vpop.f32.mrf.mxu0 }
 0x3c5   : > { %v3560_v6 = vadd.f32 %v7295_v22, %v3559_v1  ;;  %v2877_v18 = vpop.f32.mrf.mxu1  ;;  %v2709_v63 = vadd.f32 %v2708_v28, %v7020_v16  ;;  %v5019_v16 = vor.u32 %v5778_v33, %v5016_v52 }
 0x3c7   : > { %vm3685_vm15 = vcmp.gt.f32.partialorder %v3560_v6, 0.0  ;;  %v3749_v60 = vmul.f32 0.01, %v3560_v6  ;;  %2747 = vmatmul.bf16.gmra.mxu0 %v4991_v36  ;;  %v2878_v42 = vadd.f32 %v2877_v18, %v2709_v63 }
 0x3c8   : > { %2916 = vmatmul.bf16.gmra.mxu1 %v4995_v37 }
 0x3c9   : > { %v3813_v56 = vsel %vm3685_vm15, %v3560_v6, %v3749_v60  ;;  %3601 = vmatmul.bf16.gmra.mxu2 %v5910_v57  ;;  %v4035_v20 = vpop.f32.mrf.mxu3  ;;  %v3065_v5 = vmul.f32 0.01, %v2878_v42  ;;  %vm3001_vm1 = vcmp.gt.f32.partialorder %v2878_v42, 0.0  ;;  %v7426_v60 = vld [vmem:[#allocation11] ss:$0 sm:$0xff] }
 0x3ca   : > { %v5952_v50 = vpack.c.bf16 %v4035_v20, %v4033_v58  ;;  %v3877_v8 = vadd.f32 %v3813_v56, %v3128_v27  ;;  %v5911_v58 = vld [vmem:[%s6758_s4 + $0xa8] sm:$0xff]  ;;  %v5038_v27 = vld [vmem:[%s6748_s3 + $0x430] sm:$0xf] }
 0x3cb   : > { %v3129_v62 = vsel %vm3001_vm1, %v2878_v42, %v3065_v5  ;;  %v5912_v42 = vld [vmem:[%s6758_s4 + $0xb0] sm:$0xff] }
 0x3cc   : > { %6100 = vst [vmem:[%s7391_s15 + $0x10] sm:$0xff] %v5952_v50   ;;  %v3562_v49 = vpop.f32.mrf.mxu2  ;;  %v3929_v19 = vpack.c.bf16 %v3877_v8, %v3876_v24  ;;  %v2710_v44 = vpop.f32.mrf.mxu0  ;;  %v5787_v24 = vld [vmem:[%s6748_s3 + $0x444] sm:$0xf0]  ;;  %v5784_v8 = vld [vmem:[%s6748_s3 + $0x434] sm:$0xf] }
 0x3cd   : > { %v2879_v14 = vpop.f32.mrf.mxu1  ;;  %v2711_v46 = vadd.f32 %v2710_v44, %v7031_v48  ;;  %v3563_v21 = vadd.f32 %v7295_v22, %v3562_v49  ;;  %v5040_v49 = vld [vmem:[%s6748_s3 + $0x448] sm:$0xf0]  ;;  %v5039_v63 = vor.u32 %v5787_v24, %v5038_v27 }
 0x3ce   : > { %4077 = vmatmul.bf16.gmra.mxu3 %v3929_v19  ;;  %v5043_v44 = vor.u32 %v5784_v8, %v5040_v49 }
 0x3cf   : > { %v2880_v29 = vadd.f32 %v2879_v14, %v2711_v46  ;;  %v3750_v41 = vmul.f32 0.01, %v3563_v21  ;;  %vm3686_vm0 = vcmp.gt.f32.partialorder %v3563_v21, 0.0 }
 0x3d1   : > { %v4038_v3 = vpop.f32.mrf.mxu3  ;;  %v3066_v12 = vmul.f32 0.01, %v2880_v29  ;;  %vm3002_vm2 = vcmp.gt.f32.partialorder %v2880_v29, 0.0  ;;  %v3814_v4 = vsel %vm3686_vm0, %v3563_v21, %v3750_v41 }
 0x3d2   : > { %v3878_v55 = vadd.f32 %v3814_v4, %v3129_v62 }
 0x3d3   : > { %v3130_v31 = vsel %vm3002_vm2, %v2880_v29, %v3066_v12 }
 0x3d4   : > { %v3564_v2 = vpop.f32.mrf.mxu2  ;;  %v2713_v45 = vpop.f32.mrf.mxu0 }
 0x3d5   : > { %v3565_v48 = vadd.f32 %v7295_v22, %v3564_v2  ;;  %v2882_v38 = vpop.f32.mrf.mxu1  ;;  %v2714_v28 = vadd.f32 %v2713_v45, %v7034_v0 }
 0x3d7   : > { %vm3687_vm3 = vcmp.gt.f32.partialorder %v3565_v48, 0.0  ;;  %v3751_v61 = vmul.f32 0.01, %v3565_v48  ;;  %2752 = vmatmul.bf16.gmra.mxu0 %v5015_v47  ;;  %v2883_v56 = vadd.f32 %v2882_v38, %v2714_v28 }
 0x3d8   : > { %2921 = vmatmul.bf16.gmra.mxu1 %v5019_v16 }
 0x3d9   : > { %v3815_v1 = vsel %vm3687_vm3, %v3565_v48, %v3751_v61  ;;  %3606 = vmatmul.bf16.gmra.mxu2 %v5911_v58  ;;  %v4040_v36 = vpop.f32.mrf.mxu3  ;;  %v3067_v14 = vmul.f32 0.01, %v2883_v56  ;;  %vm3003_vm5 = vcmp.gt.f32.partialorder %v2883_v56, 0.0  ;;  %v5062_v61 = vld [vmem:[%s6748_s3 + $0x460] sm:$0xf] }
 0x3da   : > { %v5957_v37 = vpack.c.bf16 %v4040_v36, %v4038_v3  ;;  %v3879_v22 = vadd.f32 %v3815_v1, %v3130_v31  ;;  %v5793_v36 = vld [vmem:[%s6748_s3 + $0x474] sm:$0xf0] }
 0x3db   : > { %v3131_v15 = vsel %vm3003_vm5, %v2883_v56, %v3067_v14 }
 0x3dc   : > { %6101 = vst [vmem:[%s7391_s15 + $0x18] sm:$0xff] %v5957_v37   ;;  %v3567_v32 = vpop.f32.mrf.mxu2  ;;  %v3930_v6 = vpack.c.bf16 %v3879_v22, %v3878_v55  ;;  %v2715_v18 = vpop.f32.mrf.mxu0  ;;  %v5790_v37 = vld [vmem:[%s6748_s3 + $0x464] sm:$0xf]  ;;  %v5064_v55 = vld [vmem:[%s6748_s3 + $0x478] sm:$0xf0] }
 0x3dd   : > { %v2884_v57 = vpop.f32.mrf.mxu1  ;;  %v2716_v53 = vadd.f32 %v2715_v18, %v7045_v35  ;;  %v3568_v59 = vadd.f32 %v7426_v60, %v3567_v32 }
 0x3de   : > { %4082 = vmatmul.bf16.gmra.mxu3 %v3930_v6  ;;  %v5063_v6 = vor.u32 %v5793_v36, %v5062_v61 }
 0x3df   : > { %v2885_v20 = vadd.f32 %v2884_v57, %v2716_v53  ;;  %v3752_v19 = vmul.f32 0.01, %v3568_v59  ;;  %vm3688_vm4 = vcmp.gt.f32.partialorder %v3568_v59, 0.0 }
 0x3e1   : > { %v4043_v50 = vpop.f32.mrf.mxu3  ;;  %v3068_v35 = vmul.f32 0.01, %v2885_v20  ;;  %vm3004_vm6 = vcmp.gt.f32.partialorder %v2885_v20, 0.0  ;;  %v3816_v29 = vsel %vm3688_vm4, %v3568_v59, %v3752_v19  ;;  %v5913_v59 = vld [vmem:[%s6758_s4 + $0xb8] sm:$0xff] }
 0x3e2   : > { %v3880_v47 = vadd.f32 %v3816_v29, %v3131_v15 }
 0x3e3   : > { %v3132_v33 = vsel %vm3004_vm6, %v2885_v20, %v3068_v35 }
 0x3e4   : > { %v3569_v0 = vpop.f32.mrf.mxu2  ;;  %v2718_v21 = vpop.f32.mrf.mxu0 }
 0x3e5   : > { %v3570_v46 = vadd.f32 %v7426_v60, %v3569_v0  ;;  %v2887_v43 = vpop.f32.mrf.mxu1  ;;  %v2719_v48 = vadd.f32 %v2718_v21, %v7048_v51  ;;  %v5067_v51 = vor.u32 %v5790_v37, %v5064_v55 }
 0x3e7   : > { %vm3689_vm7 = vcmp.gt.f32.partialorder %v3570_v46, 0.0  ;;  %v3753_v3 = vmul.f32 0.01, %v3570_v46  ;;  %2757 = vmatmul.bf16.gmra.mxu0 %v5039_v63  ;;  %v2888_v62 = vadd.f32 %v2887_v43, %v2719_v48 }
 0x3e8   : > { %2926 = vmatmul.bf16.gmra.mxu1 %v5043_v44 }
 0x3e9   : > { %v3817_v52 = vsel %vm3689_vm7, %v3570_v46, %v3753_v3  ;;  %3611 = vmatmul.bf16.gmra.mxu2 %v5912_v42  ;;  %v4045_v41 = vpop.f32.mrf.mxu3  ;;  %v3069_v28 = vmul.f32 0.01, %v2888_v62  ;;  %vm3005_vm9 = vcmp.gt.f32.partialorder %v2888_v62, 0.0  ;;  %v5086_v42 = vld [vmem:[%s6748_s3 + $0x490] sm:$0xf] }
 0x3ea   : > { %v5962_v2 = vpack.c.bf16 %v4045_v41, %v4043_v50  ;;  %v3881_v16 = vadd.f32 %v3817_v52, %v3132_v33  ;;  %v5799_v33 = vld [vmem:[%s6748_s3 + $0x4a4] sm:$0xf0]  ;;  %v5796_v52 = vld [vmem:[%s6748_s3 + $0x494] sm:$0xf]  ;;  %v5088_v41 = vld [vmem:[%s6748_s3 + $0x4a8] sm:$0xf0] }
 0x3eb   : > { %v3133_v20 = vsel %vm3005_vm9, %v2888_v62, %v3069_v28 }
 0x3ec   : > { %6102 = vst [vmem:[%s7391_s15 + $0x20] sm:$0xff] %v5962_v2   ;;  %v3572_v5 = vpop.f32.mrf.mxu2  ;;  %v3931_v12 = vpack.c.bf16 %v3881_v16, %v3880_v47  ;;  %v2720_v45 = vpop.f32.mrf.mxu0  ;;  %v5087_v16 = vor.u32 %v5799_v33, %v5086_v42 }
 0x3ed   : > { %v2889_v38 = vpop.f32.mrf.mxu1  ;;  %v2721_v58 = vadd.f32 %v2720_v45, %v7061_v25  ;;  %v3573_v4 = vadd.f32 %v7426_v60, %v3572_v5 }
 0x3ee   : > { %4087 = vmatmul.bf16.gmra.mxu3 %v3931_v12 }
 0x3ef   : > { %v2890_v31 = vadd.f32 %v2889_v38, %v2721_v58  ;;  %v3754_v22 = vmul.f32 0.01, %v3573_v4  ;;  %vm3690_vm8 = vcmp.gt.f32.partialorder %v3573_v4, 0.0  ;;  %v5914_v38 = vld [vmem:[%s6758_s4 + $0xc0] sm:$0xff] }
 0x3f1   : > { %v4048_v1 = vpop.f32.mrf.mxu3  ;;  %v3070_v18 = vmul.f32 0.01, %v2890_v31  ;;  %vm3006_vm10 = vcmp.gt.f32.partialorder %v2890_v31, 0.0  ;;  %v3818_v27 = vsel %vm3690_vm8, %v3573_v4, %v3754_v22 }
 0x3f2   : > { %v3882_v19 = vadd.f32 %v3818_v27, %v3133_v20  ;;  %v5802_v20 = vld [vmem:[%s6748_s3 + $0x4c4] sm:$0xf] }
 0x3f3   : > { %v3134_v50 = vsel %vm3006_vm10, %v2890_v31, %v3070_v18 }
 0x3f4   : > { %v3574_v32 = vpop.f32.mrf.mxu2  ;;  %v2723_v57 = vpop.f32.mrf.mxu0 }
 0x3f5   : > { %v3575_v25 = vadd.f32 %v7426_v60, %v3574_v32  ;;  %v2892_v53 = vpop.f32.mrf.mxu1  ;;  %v2724_v14 = vadd.f32 %v2723_v57, %v7064_v40  ;;  %v5091_v40 = vor.u32 %v5796_v52, %v5088_v41  ;;  %v5110_v57 = vld [vmem:[%s6748_s3 + $0x4c0] sm:$0xf] }
 0x3f7   : > { %vm3691_vm11 = vcmp.gt.f32.partialorder %v3575_v25, 0.0  ;;  %v3755_v56 = vmul.f32 0.01, %v3575_v25  ;;  %2762 = vmatmul.bf16.gmra.mxu0 %v5063_v6  ;;  %v2893_v29 = vadd.f32 %v2892_v53, %v2724_v14  ;;  %v5915_v14 = vld [vmem:[%s6758_s4 + $0xc8] sm:$0xff] }
 0x3f8   : > { %2931 = vmatmul.bf16.gmra.mxu1 %v5067_v51 }
 0x3f9   : > { %v3819_v24 = vsel %vm3691_vm11, %v3575_v25, %v3755_v56  ;;  %3616 = vmatmul.bf16.gmra.mxu2 %v5913_v59  ;;  %v4050_v8 = vpop.f32.mrf.mxu3  ;;  %v3071_v5 = vmul.f32 0.01, %v2893_v29  ;;  %vm3007_vm13 = vcmp.gt.f32.partialorder %v2893_v29, 0.0  ;;  %v5805_v56 = vld [vmem:[%s6748_s3 + $0x4d4] sm:$0xf0] }
 0x3fa   : > { %v5967_v49 = vpack.c.bf16 %v4050_v8, %v4048_v1  ;;  %v3883_v0 = vadd.f32 %v3819_v24, %v3134_v50  ;;  %v5112_v50 = vld [vmem:[%s6748_s3 + $0x4d8] sm:$0xf0] }
 0x3fb   : > { %v3135_v61 = vsel %vm3007_vm13, %v2893_v29, %v3071_v5 }
 0x3fc   : > { %6103 = vst [vmem:[%s7391_s15 + $0x28] sm:$0xff] %v5967_v49   ;;  %v3577_v63 = vpop.f32.mrf.mxu2  ;;  %v3932_v44 = vpack.c.bf16 %v3883_v0, %v3882_v19  ;;  %v2725_v35 = vpop.f32.mrf.mxu0  ;;  %v5111_v49 = vor.u32 %v5805_v56, %v5110_v57 }
 0x3fd   : > { %v2894_v46 = vpop.f32.mrf.mxu1  ;;  %v2726_v21 = vadd.f32 %v2725_v35, %v7075_v9  ;;  %v3578_v43 = vadd.f32 %v7426_v60, %v3577_v63 }
 0x3fe   : > { %4092 = vmatmul.bf16.gmra.mxu3 %v3932_v44 }
 0x3ff   : > { %v2895_v3 = vadd.f32 %v2894_v46, %v2726_v21  ;;  %v3756_v2 = vmul.f32 0.01, %v3578_v43  ;;  %vm3692_vm12 = vcmp.gt.f32.partialorder %v3578_v43, 0.0 }
 0x401   : > { %v4053_v15 = vpop.f32.mrf.mxu3  ;;  %v3072_v12 = vmul.f32 0.01, %v2895_v3  ;;  %vm3008_vm14 = vcmp.gt.f32.partialorder %v2895_v3, 0.0  ;;  %v3820_v58 = vsel %vm3692_vm12, %v3578_v43, %v3756_v2 }
 0x402   : > { %v3884_v37 = vadd.f32 %v3820_v58, %v3135_v61  ;;  %v5808_v58 = vld [vmem:[%s6748_s3 + $0x4f4] sm:$0xf] }
 0x403   : > { %v3136_v62 = vsel %vm3008_vm14, %v2895_v3, %v3072_v12  ;;  %v5134_v12 = vld [vmem:[%s6748_s3 + $0x4f0] sm:$0xf] }
 0x404   : > { %v3579_v47 = vpop.f32.mrf.mxu2  ;;  %v2728_v48 = vpop.f32.mrf.mxu0 }
 0x405   : > { %v3580_v9 = vadd.f32 %v7426_v60, %v3579_v47  ;;  %v2897_v45 = vpop.f32.mrf.mxu1  ;;  %v2729_v6 = vadd.f32 %v2728_v48, %v7078_v34  ;;  %v5115_v34 = vor.u32 %v5802_v20, %v5112_v50 }
 0x407   : > { %vm3693_vm15 = vcmp.gt.f32.partialorder %v3580_v9, 0.0  ;;  %v3757_v4 = vmul.f32 0.01, %v3580_v9  ;;  %2767 = vmatmul.bf16.gmra.mxu0 %v5087_v16  ;;  %v2898_v53 = vadd.f32 %v2897_v45, %v2729_v6 }
 0x408   : > { %2936 = vmatmul.bf16.gmra.mxu1 %v5091_v40 }
 0x409   : > { %v3821_v31 = vsel %vm3693_vm15, %v3580_v9, %v3757_v4  ;;  %3621 = vmatmul.bf16.gmra.mxu2 %v5914_v38  ;;  %v4055_v1 = vpop.f32.mrf.mxu3  ;;  %v3073_v19 = vmul.f32 0.01, %v2898_v53  ;;  %vm3009_vm1 = vcmp.gt.f32.partialorder %v2898_v53, 0.0  ;;  %v5811_v38 = vld [vmem:[%s6748_s3 + $0x504] sm:$0xf0] }
 0x40a   : > { %v5972_v36 = vpack.c.bf16 %v4055_v1, %v4053_v15  ;;  %v3885_v55 = vadd.f32 %v3821_v31, %v3136_v62  ;;  %v5136_v4 = vld [vmem:[%s6748_s3 + $0x508] sm:$0xf0]  ;;  %v5135_v31 = vor.u32 %v5811_v38, %v5134_v12 }
 0x40b   : > { %v3137_v21 = vsel %vm3009_vm1, %v2898_v53, %v3073_v19 }
 0x40c   : > { %6104 = vst [vmem:[%s7391_s15 + $0x30] sm:$0xff] %v5972_v36   ;;  %v3582_v22 = vpop.f32.mrf.mxu2  ;;  %v3933_v32 = vpack.c.bf16 %v3885_v55, %v3884_v37  ;;  %v2730_v51 = vpop.f32.mrf.mxu0 }
 0x40d   : > { %v2899_v28 = vpop.f32.mrf.mxu1  ;;  %v2731_v18 = vadd.f32 %v2730_v51, %v7089_v10  ;;  %v3583_v25 = vadd.f32 %v7426_v60, %v3582_v22  ;;  %v5916_v22 = vld [vmem:[%s6758_s4 + $0xd0] sm:$0xff] }
 0x40e   : > { %4097 = vmatmul.bf16.gmra.mxu3 %v3933_v32 }
 0x40f   : > { %v2900_v59 = vadd.f32 %v2899_v28, %v2731_v18  ;;  %v3758_v24 = vmul.f32 0.01, %v3583_v25  ;;  %vm3694_vm0 = vcmp.gt.f32.partialorder %v3583_v25, 0.0 }
 0x411   : > { %v4058_v27 = vpop.f32.mrf.mxu3  ;;  %v3074_v0 = vmul.f32 0.01, %v2900_v59  ;;  %vm3010_vm2 = vcmp.gt.f32.partialorder %v2900_v59, 0.0  ;;  %v3822_v35 = vsel %vm3694_vm0, %v3583_v25, %v3758_v24 }
 0x412   : > { %v3886_v15 = vadd.f32 %v3822_v35, %v3137_v21 }
 0x413   : > { %v3138_v43 = vsel %vm3010_vm2, %v2900_v59, %v3074_v0 }
 0x414   : > { %v3584_v8 = vpop.f32.mrf.mxu2  ;;  %v2733_v63 = vpop.f32.mrf.mxu0 }
 0x415   : > { %v3585_v10 = vadd.f32 %v7426_v60, %v3584_v8  ;;  %v2902_v44 = vpop.f32.mrf.mxu1  ;;  %v2734_v2 = vadd.f32 %v2733_v63, %v7092_v26  ;;  %v5139_v26 = vor.u32 %v5808_v58, %v5136_v4  ;;  %v5817_v63 = vld [vmem:[%s6748_s3 + $0x534] sm:$0xf0] }
 0x417   : > { %vm3695_vm3 = vcmp.gt.f32.partialorder %v3585_v10, 0.0  ;;  %v3759_v46 = vmul.f32 0.01, %v3585_v10  ;;  %2772 = vmatmul.bf16.gmra.mxu0 %v5111_v49  ;;  %v2903_v9 = vadd.f32 %v2902_v44, %v2734_v2  ;;  %v5814_v44 = vld [vmem:[%s6748_s3 + $0x524] sm:$0xf] }
 0x418   : > { %2941 = vmatmul.bf16.gmra.mxu1 %v5115_v34  ;;  %v5158_v34 = vld [vmem:[%s6748_s3 + $0x520] sm:$0xf] }
 0x419   : > { %v3823_v42 = vsel %vm3695_vm3, %v3585_v10, %v3759_v46  ;;  %3626 = vmatmul.bf16.gmra.mxu2 %v5915_v14  ;;  %v4060_v29 = vpop.f32.mrf.mxu3  ;;  %v3075_v1 = vmul.f32 0.01, %v2903_v9  ;;  %vm3011_vm5 = vcmp.gt.f32.partialorder %v2903_v9, 0.0  ;;  %v5160_v14 = vld [vmem:[%s6748_s3 + $0x538] sm:$0xf0]  ;;  %v5159_v21 = vor.u32 %v5817_v63, %v5158_v34 }
 0x41a   : > { %v5977_v3 = vpack.c.bf16 %v4060_v29, %v4058_v27  ;;  %v3887_v33 = vadd.f32 %v3823_v42, %v3138_v43 }
 0x41b   : > { %v3139_v51 = vsel %vm3011_vm5, %v2903_v9, %v3075_v1 }
 0x41c   : > { %6105 = vst [vmem:[%s7391_s15 + $0x38] sm:$0xff] %v5977_v3   ;;  %v3587_v52 = vpop.f32.mrf.mxu2  ;;  %v3934_v41 = vpack.c.bf16 %v3887_v33, %v3886_v15  ;;  %v2735_v47 = vpop.f32.mrf.mxu0  ;;  %v5917_v15 = vld [vmem:[%s6758_s4 + $0xd8] sm:$0xff] }
 0x41d   : > { %v2904_v16 = vpop.f32.mrf.mxu1  ;;  %v2736_v40 = vadd.f32 %v2735_v47, %v7103_v7  ;;  %v3588_v5 = vadd.f32 %v7426_v60, %v3587_v52 }
 0x41e   : > { %4102 = vmatmul.bf16.gmra.mxu3 %v3934_v41 }
 0x41f   : > { %v2905_v48 = vadd.f32 %v2904_v16, %v2736_v40  ;;  %v3760_v61 = vmul.f32 0.01, %v3588_v5  ;;  %vm3696_vm4 = vcmp.gt.f32.partialorder %v3588_v5, 0.0 }
 0x421   : > { %v4063_v45 = vpop.f32.mrf.mxu3  ;;  %v3076_v36 = vmul.f32 0.01, %v2905_v48  ;;  %vm3012_vm6 = vcmp.gt.f32.partialorder %v2905_v48, 0.0  ;;  %v3824_v32 = vsel %vm3696_vm4, %v3588_v5, %v3760_v61 }
 0x422   : > { %v3888_v53 = vadd.f32 %v3824_v32, %v3139_v51 }
 0x423   : > { %v3140_v28 = vsel %vm3012_vm6, %v2905_v48, %v3076_v36  ;;  %v5823_v36 = vld [vmem:[%s6748_s3 + $0x564] sm:$0xf0] }
 0x424   : > { %v3589_v62 = vpop.f32.mrf.mxu2  ;;  %v2738_v37 = vpop.f32.mrf.mxu0 }
 0x425   : > { %v3590_v7 = vadd.f32 %v7426_v60, %v3589_v62  ;;  %v2907_v55 = vpop.f32.mrf.mxu1  ;;  %v2739_v20 = vadd.f32 %v2738_v37, %v7106_v30  ;;  %v5163_v30 = vor.u32 %v5814_v44, %v5160_v14  ;;  %v5182_v62 = vld [vmem:[%s6748_s3 + $0x550] sm:$0xf]  ;;  %v5184_v37 = vld [vmem:[%s6748_s3 + $0x568] sm:$0xf0] }
 0x426   : > { %v5183_v32 = vor.u32 %v5823_v36, %v5182_v62  ;;  %v7694_v62 = vld [vmem:[#allocation24_spill] sm:$0xff]  ;;  %v7695_v36 = vld [vmem:[#allocation23_spill] sm:$0xff] }
 0x427   : > { %vm3697_vm7 = vcmp.gt.f32.partialorder %v3590_v7, 0.0  ;;  %v3761_v6 = vmul.f32 0.01, %v3590_v7  ;;  %2777 = vmatmul.bf16.gmra.mxu0 %v5135_v31  ;;  %v2908_v19 = vadd.f32 %v2907_v55, %v2739_v20 }
 0x428   : > { %2946 = vmatmul.bf16.gmra.mxu1 %v5139_v26 }
 0x429   : > { %v3825_v18 = vsel %vm3697_vm7, %v3590_v7, %v3761_v6  ;;  %3631 = vmatmul.bf16.gmra.mxu2 %v5916_v22  ;;  %v4065_v25 = vpop.f32.mrf.mxu3  ;;  %v3077_v43 = vmul.f32 0.01, %v2908_v19  ;;  %vm3013_vm9 = vcmp.gt.f32.partialorder %v2908_v19, 0.0  ;;  %v5820_v7 = vld [vmem:[%s6748_s3 + $0x554] sm:$0xf] }
 0x42a   : > { %v5982_v57 = vpack.c.bf16 %v4065_v25, %v4063_v45  ;;  %v3889_v59 = vadd.f32 %v3825_v18, %v3140_v28  ;;  %v5918_v25 = vld [vmem:[%s6758_s4 + $0xe0] sm:$0xff] }
 0x42b   : > { %v3141_v41 = vsel %vm3013_vm9, %v2908_v19, %v3077_v43 }
 0x42c   : > { %6106 = vst [vmem:[%s7391_s15 + $0x40] sm:$0xff] %v5982_v57   ;;  %v3592_v27 = vpop.f32.mrf.mxu2  ;;  %v3935_v56 = vpack.c.bf16 %v3889_v59, %v3888_v53  ;;  %v2740_v50 = vpop.f32.mrf.mxu0 }
 0x42d   : > { %v2909_v24 = vpop.f32.mrf.mxu1  ;;  %v2741_v8 = vadd.f32 %v2740_v50, %v7117_v13  ;;  %v3593_v49 = vadd.f32 %v7426_v60, %v3592_v27 }
 0x42e   : > { %4107 = vmatmul.bf16.gmra.mxu3 %v3935_v56 }
 0x42f   : > { %v2910_v0 = vadd.f32 %v2909_v24, %v2741_v8  ;;  %v3762_v35 = vmul.f32 0.01, %v3593_v49  ;;  %vm3698_vm8 = vcmp.gt.f32.partialorder %v3593_v49, 0.0 }
 0x431   : > { %v4068_v10 = vpop.f32.mrf.mxu3  ;;  %v3078_v42 = vmul.f32 0.01, %v2910_v0  ;;  %vm3014_vm10 = vcmp.gt.f32.partialorder %v2910_v0, 0.0  ;;  %v3826_v33 = vsel %vm3698_vm8, %v3593_v49, %v3762_v35  ;;  %v2582_v49 = vadd.f32 %v7144_v11, %v7146_v17  ;;  %v5208_v11 = vld [vmem:[%s6748_s3 + $0x598] sm:$0xf0] }
 0x432   : > { %v3890_v5 = vadd.f32 %v3826_v33, %v3141_v41 }
 0x433   : > { %v3142_v2 = vsel %vm3014_vm10, %v2910_v0, %v3078_v42  ;;  %v7692_v0 = vld [vmem:[#allocation22_spill] sm:$0xff]  ;;  %v5829_v42 = vld [vmem:[%s6748_s3 + $0x594] sm:$0xf0] }
 0x434   : > { %v3594_v46 = vpop.f32.mrf.mxu2  ;;  %v2743_v29 = vpop.f32.mrf.mxu0 }
 0x435   : > { %v3595_v13 = vadd.f32 %v7426_v60, %v3594_v46  ;;  %v2912_v3 = vpop.f32.mrf.mxu1  ;;  %v2744_v45 = vadd.f32 %v2743_v29, %v7120_v39  ;;  %v5187_v39 = vor.u32 %v5820_v7, %v5184_v37  ;;  %v5206_v46 = vld [vmem:[%s6748_s3 + $0x580] sm:$0xf] }
 0x437   : > { %vm3699_vm11 = vcmp.gt.f32.partialorder %v3595_v13, 0.0  ;;  %v3763_v52 = vmul.f32 0.01, %v3595_v13  ;;  %2782 = vmatmul.bf16.gmra.mxu0 %v5159_v21  ;;  %v2913_v31 = vadd.f32 %v2912_v3, %v2744_v45  ;;  %v5207_v3 = vor.u32 %v5829_v42, %v5206_v46 }
 0x438   : > { %2951 = vmatmul.bf16.gmra.mxu1 %v5163_v30 }
 0x439   : > { %v3827_v47 = vsel %vm3699_vm11, %v3595_v13, %v3763_v52  ;;  %3636 = vmatmul.bf16.gmra.mxu2 %v5917_v15  ;;  %v4070_v16 = vpop.f32.mrf.mxu3  ;;  %v3079_v6 = vmul.f32 0.01, %v2913_v31  ;;  %vm3015_vm13 = vcmp.gt.f32.partialorder %v2913_v31, 0.0  ;;  %v5826_v13 = vld [vmem:[%s6748_s3 + $0x584] sm:$0xf] }
 0x43a   : > { %v5987_v40 = vpack.c.bf16 %v4070_v16, %v4068_v10  ;;  %v3891_v12 = vadd.f32 %v3827_v47, %v3142_v2  ;;  %v5211_v15 = vor.u32 %v5826_v13, %v5208_v11  ;;  %v5919_v16 = vld [vmem:[%s6758_s4 + $0xe8] sm:$0xff] }
 0x43b   : > { %v3143_v59 = vsel %vm3015_vm13, %v2913_v31, %v3079_v6  ;;  %v7698_v11 = vld [vmem:[#allocation26_spill] sm:$0xff] }
 0x43c   : > { %6107 = vst [vmem:[%s7391_s15 + $0x48] sm:$0xff] %v5987_v40   ;;  %v3597_v9 = vpop.f32.mrf.mxu2  ;;  %v3936_v48 = vpack.c.bf16 %v3891_v12, %v3890_v5  ;;  %v2745_v38 = vpop.f32.mrf.mxu0 }
 0x43d   : > { %v2914_v58 = vpop.f32.mrf.mxu1  ;;  %v2746_v4 = vadd.f32 %v2745_v38, %v7131_v23  ;;  %v3598_v61 = vadd.f32 %v7426_v60, %v3597_v9 }
 0x43e   : > { %4112 = vmatmul.bf16.gmra.mxu3 %v3936_v48 }
 0x43f   : > { %v2915_v26 = vadd.f32 %v2914_v58, %v2746_v4  ;;  %v3764_v55 = vmul.f32 0.01, %v3598_v61  ;;  %vm3700_vm12 = vcmp.gt.f32.partialorder %v3598_v61, 0.0 }
 0x441   : > { %v4073_v1 = vpop.f32.mrf.mxu3  ;;  %v3080_v51 = vmul.f32 0.01, %v2915_v26  ;;  %vm3016_vm14 = vcmp.gt.f32.partialorder %v2915_v26, 0.0  ;;  %v3828_v57 = vsel %vm3700_vm12, %v3598_v61, %v3764_v55  ;;  %v7693_v61 = vld [vmem:[#allocation25_spill] sm:$0xff] }
 0x442   : > { %v3892_v24 = vadd.f32 %v3828_v57, %v3143_v59  ;;  %v2587_v31 = vadd.f32 %v7694_v62, %v7693_v61 }
 0x443   : > { %v3144_v27 = vsel %vm3016_vm14, %v2915_v26, %v3080_v51 }
 0x444   : > { %v3599_v22 = vpop.f32.mrf.mxu2  ;;  %v2748_v28 = vpop.f32.mrf.mxu0 }
 0x445   : > { %v3600_v23 = vadd.f32 %v7426_v60, %v3599_v22  ;;  %v2917_v18 = vpop.f32.mrf.mxu1  ;;  %v2749_v10 = vadd.f32 %v2748_v28, %v7692_v0  ;;  %v5835_v28 = vld [vmem:[%s6748_s3 + $0x5c4] sm:$0xf0] }
 0x447   : > { %vm3701_vm15 = vcmp.gt.f32.partialorder %v3600_v23, 0.0  ;;  %v3765_v53 = vmul.f32 0.01, %v3600_v23  ;;  %2787 = vmatmul.bf16.gmra.mxu0 %v5183_v32  ;;  %v2918_v21 = vadd.f32 %v2917_v18, %v2749_v10  ;;  %v5832_v18 = vld [vmem:[%s6748_s3 + $0x5b4] sm:$0xf] }
 0x448   : > { %2956 = vmatmul.bf16.gmra.mxu1 %v5187_v39  ;;  %v5230_v39 = vld [vmem:[%s6748_s3 + $0x5b0] sm:$0xf] }
 0x449   : > { %v3829_v56 = vsel %vm3701_vm15, %v3600_v23, %v3765_v53  ;;  %3641 = vmatmul.bf16.gmra.mxu2 %v5918_v25  ;;  %v4075_v20 = vpop.f32.mrf.mxu3  ;;  %v3081_v33 = vmul.f32 0.01, %v2918_v21  ;;  %vm3017_vm1 = vcmp.gt.f32.partialorder %v2918_v21, 0.0  ;;  %v5232_v25 = vld [vmem:[%s6748_s3 + $0x5c8] sm:$0xf0]  ;;  %v5231_v59 = vor.u32 %v5835_v28, %v5230_v39 }
 0x44a   : > { %v5992_v50 = vpack.c.bf16 %v4075_v20, %v4073_v1  ;;  %v3893_v8 = vadd.f32 %v3829_v56, %v3144_v27  ;;  %v5235_v27 = vor.u32 %v5832_v18, %v5232_v25  ;;  %v7701_v25 = vld [vmem:[#allocation29_spill] sm:$0xff] }
 0x44b   : > { %v3145_v12 = vsel %vm3017_vm1, %v2918_v21, %v3081_v33  ;;  %v7696_v21 = vld [vmem:[#allocation28_spill] sm:$0xff] }
 0x44c   : > { %6108 = vst [vmem:[%s7391_s15 + $0x50] sm:$0xff] %v5992_v50   ;;  %v3602_v34 = vpop.f32.mrf.mxu2  ;;  %v3937_v19 = vpack.c.bf16 %v3893_v8, %v3892_v24  ;;  %v2750_v63 = vpop.f32.mrf.mxu0 }
 0x44d   : > { %v2919_v44 = vpop.f32.mrf.mxu1  ;;  %v2751_v14 = vadd.f32 %v2750_v63, %v2582_v49  ;;  %v3603_v35 = vadd.f32 %v7426_v60, %v3602_v34  ;;  %v5920_v49 = vld [vmem:[%s6758_s4 + $0xf0] sm:$0xff] }
 0x44e   : > { %4117 = vmatmul.bf16.gmra.mxu3 %v3937_v19 }
 0x44f   : > { %v2920_v30 = vadd.f32 %v2919_v44, %v2751_v14  ;;  %v3766_v17 = vmul.f32 0.01, %v3603_v35  ;;  %vm3702_vm0 = vcmp.gt.f32.partialorder %v3603_v35, 0.0 }
 0x451   : > { %v4078_v43 = vpop.f32.mrf.mxu3  ;;  %v3082_v52 = vmul.f32 0.01, %v2920_v30  ;;  %vm3018_vm2 = vcmp.gt.f32.partialorder %v2920_v30, 0.0  ;;  %v3830_v40 = vsel %vm3702_vm0, %v3603_v35, %v3766_v17 }
 0x452   : > { %v3894_v58 = vadd.f32 %v3830_v40, %v3145_v12  ;;  %v5838_v40 = vld [vmem:[%s6748_s3 + $0x5e4] sm:$0xf] }
 0x453   : > { %v3146_v9 = vsel %vm3018_vm2, %v2920_v30, %v3082_v52  ;;  %v7697_v30 = vld [vmem:[#allocation27_spill] sm:$0xff]  ;;  %v5254_v52 = vld [vmem:[%s6748_s3 + $0x5e0] sm:$0xf] }
 0x454   : > { %v3604_v29 = vpop.f32.mrf.mxu2  ;;  %v2753_v2 = vpop.f32.mrf.mxu0 }
 0x455   : > { %v3605_v41 = vadd.f32 %v7426_v60, %v3604_v29  ;;  %v2922_v47 = vpop.f32.mrf.mxu1  ;;  %v2754_v7 = vadd.f32 %v2753_v2, %v7695_v36 }
 0x457   : > { %vm3703_vm3 = vcmp.gt.f32.partialorder %v3605_v41, 0.0  ;;  %v3767_v5 = vmul.f32 0.01, %v3605_v41  ;;  %2792 = vmatmul.bf16.gmra.mxu0 %v5207_v3  ;;  %v2923_v6 = vadd.f32 %v2922_v47, %v2754_v7 }
 0x458   : > { %2961 = vmatmul.bf16.gmra.mxu1 %v5211_v15 }
 0x459   : > { %v3831_v48 = vsel %vm3703_vm3, %v3605_v41, %v3767_v5  ;;  %3646 = vmatmul.bf16.gmra.mxu2 %v5919_v16  ;;  %v4080_v45 = vpop.f32.mrf.mxu3  ;;  %v3083_v56 = vmul.f32 0.01, %v2923_v6  ;;  %vm3019_vm5 = vcmp.gt.f32.partialorder %v2923_v6, 0.0  ;;  %v5841_v16 = vld [vmem:[%s6748_s3 + $0x5f4] sm:$0xf0] }
 0x45a   : > { %v5997_v38 = vpack.c.bf16 %v4080_v45, %v4078_v43  ;;  %v3895_v4 = vadd.f32 %v3831_v48, %v3146_v9  ;;  %v2592_v43 = vadd.f32 %v7697_v30, %v7696_v21  ;;  %v5256_v5 = vld [vmem:[%s6748_s3 + $0x5f8] sm:$0xf0]  ;;  %v5255_v48 = vor.u32 %v5841_v16, %v5254_v52 }
 0x45b   : > { %v3147_v0 = vsel %vm3019_vm5, %v2923_v6, %v3083_v56  ;;  %v5259_v45 = vor.u32 %v5838_v40, %v5256_v5  ;;  %v7699_v6 = vld [vmem:[#allocation31_spill] sm:$0xff] }
 0x45c   : > { %6109 = vst [vmem:[%s7391_s15 + $0x58] sm:$0xff] %v5997_v38   ;;  %v3607_v26 = vpop.f32.mrf.mxu2  ;;  %v3938_v1 = vpack.c.bf16 %v3895_v4, %v3894_v58  ;;  %v2755_v37 = vpop.f32.mrf.mxu0 }
 0x45d   : > { %v2924_v55 = vpop.f32.mrf.mxu1  ;;  %v2756_v22 = vadd.f32 %v2755_v37, %v2587_v31  ;;  %v3608_v32 = vadd.f32 %v7426_v60, %v3607_v26  ;;  %v5921_v31 = vld [vmem:[%s6758_s4 + $0xf8] sm:$0xff] }
 0x45e   : > { %4122 = vmatmul.bf16.gmra.mxu3 %v3938_v1 }
 0x45f   : > { %v2925_v51 = vadd.f32 %v2924_v55, %v2756_v22  ;;  %v3768_v57 = vmul.f32 0.01, %v3608_v32  ;;  %vm3704_vm4 = vcmp.gt.f32.partialorder %v3608_v32, 0.0 }
 0x461   : > { %v4083_v23 = vpop.f32.mrf.mxu3  ;;  %v3084_v20 = vmul.f32 0.01, %v2925_v51  ;;  %vm3020_vm6 = vcmp.gt.f32.partialorder %v2925_v51, 0.0  ;;  %v3832_v34 = vsel %vm3704_vm4, %v3608_v32, %v3768_v57 }
 0x462   : > { %v3896_v35 = vadd.f32 %v3832_v34, %v3147_v0 }
 0x463   : > { %v3148_v10 = vsel %vm3020_vm6, %v2925_v51, %v3084_v20  ;;  %v7700_v51 = vld [vmem:[#allocation30_spill] sm:$0xff] }
 0x464   : > { %v3609_v53 = vpop.f32.mrf.mxu2  ;;  %v2758_v24 = vpop.f32.mrf.mxu0 }
 0x465   : > { %v3610_v50 = vadd.f32 %v7426_v60, %v3609_v53  ;;  %v2927_v8 = vpop.f32.mrf.mxu1  ;;  %v2759_v17 = vadd.f32 %v2758_v24, %v7698_v11  ;;  %v7702_v11 = vld [vmem:[#allocation34_spill] sm:$0xff] }
 0x467   : > { %vm3705_vm7 = vcmp.gt.f32.partialorder %v3610_v50, 0.0  ;;  %v3769_v19 = vmul.f32 0.01, %v3610_v50  ;;  %2797 = vmatmul.bf16.gmra.mxu0 %v5231_v59  ;;  %v2928_v41 = vadd.f32 %v2927_v8, %v2759_v17  ;;  %v7703_v17 = vld [vmem:[#allocation33_spill] sm:$0xff] }
 0x468   : > { %2966 = vmatmul.bf16.gmra.mxu1 %v5235_v27 }
 0x469   : > { %v3833_v63 = vsel %vm3705_vm7, %v3610_v50, %v3769_v19  ;;  %3651 = vmatmul.bf16.gmra.mxu2 %v5920_v49  ;;  %v4085_v44 = vpop.f32.mrf.mxu3  ;;  %v3085_v38 = vmul.f32 0.01, %v2928_v41  ;;  %vm3021_vm9 = vcmp.gt.f32.partialorder %v2928_v41, 0.0 }
 0x46a   : > { %v6002_v14 = vpack.c.bf16 %v4085_v44, %v4083_v23  ;;  %v3897_v46 = vadd.f32 %v3833_v63, %v3148_v10  ;;  %v2597_v23 = vadd.f32 %v7700_v51, %v7699_v6 }
 0x46b   : > { %v3149_v36 = vsel %vm3021_vm9, %v2928_v41, %v3085_v38 }
 0x46c   : > { %6110 = vst [vmem:[%s7391_s15 + $0x60] sm:$0xff] %v6002_v14   ;;  %v3612_v42 = vpop.f32.mrf.mxu2  ;;  %v3939_v13 = vpack.c.bf16 %v3897_v46, %v3896_v35  ;;  %v2760_v29 = vpop.f32.mrf.mxu0 }
 0x46d   : > { %v2929_v3 = vpop.f32.mrf.mxu1  ;;  %v2761_v15 = vadd.f32 %v2760_v29, %v2592_v43  ;;  %v3613_v33 = vadd.f32 %v7426_v60, %v3612_v42  ;;  %v2602_v29 = vadd.f32 %v7703_v17, %v7702_v11 }
 0x46e   : > { %4127 = vmatmul.bf16.gmra.mxu3 %v3939_v13 }
 0x46f   : > { %v2930_v2 = vadd.f32 %v2929_v3, %v2761_v15  ;;  %v3770_v12 = vmul.f32 0.01, %v3613_v33  ;;  %vm3706_vm8 = vcmp.gt.f32.partialorder %v3613_v33, 0.0 }
 0x471   : > { %v4088_v47 = vpop.f32.mrf.mxu3  ;;  %v3086_v58 = vmul.f32 0.01, %v2930_v2  ;;  %vm3022_vm10 = vcmp.gt.f32.partialorder %v2930_v2, 0.0  ;;  %v3834_v26 = vsel %vm3706_vm8, %v3613_v33, %v3770_v12  ;;  %v7704_v33 = vld [vmem:[#allocation32_spill] sm:$0xff] }
 0x472   : > { %v3898_v32 = vadd.f32 %v3834_v26, %v3149_v36 }
 0x473   : > { %v3150_v7 = vsel %vm3022_vm10, %v2930_v2, %v3086_v58 }
 0x474   : > { %v3614_v9 = vpop.f32.mrf.mxu2  ;;  %v2763_v61 = vpop.f32.mrf.mxu0 }
 0x475   : > { %v3615_v4 = vadd.f32 %v7426_v60, %v3614_v9  ;;  %v2932_v62 = vpop.f32.mrf.mxu1  ;;  %v2764_v57 = vadd.f32 %v2763_v61, %v7701_v25 }
 0x477   : > { %vm3707_vm11 = vcmp.gt.f32.partialorder %v3615_v4, 0.0  ;;  %v3771_v1 = vmul.f32 0.01, %v3615_v4  ;;  %2802 = vmatmul.bf16.gmra.mxu0 %v5255_v48  ;;  %v2933_v20 = vadd.f32 %v2932_v62, %v2764_v57 }
 0x478   : > { %2971 = vmatmul.bf16.gmra.mxu1 %v5259_v45 }
 0x479   : > { %v3835_v37 = vsel %vm3707_vm11, %v3615_v4, %v3771_v1  ;;  %3656 = vmatmul.bf16.gmra.mxu2 %v5921_v31  ;;  %v4090_v55 = vpop.f32.mrf.mxu3  ;;  %v3087_v34 = vmul.f32 0.01, %v2933_v20  ;;  %vm3023_vm13 = vcmp.gt.f32.partialorder %v2933_v20, 0.0 }
 0x47a   : > { %v6007_v22 = vpack.c.bf16 %v4090_v55, %v4088_v47  ;;  %v3899_v39 = vadd.f32 %v3835_v37, %v3150_v7 }
 0x47b   : > { %v3151_v35 = vsel %vm3023_vm13, %v2933_v20, %v3087_v34 }
 0x47c   : > { %6111 = vst [vmem:[%s7391_s15 + $0x68] sm:$0xff] %v6007_v22   ;;  %v3617_v28 = vpop.f32.mrf.mxu2  ;;  %v3940_v18 = vpack.c.bf16 %v3899_v39, %v3898_v32  ;;  %v2765_v53 = vpop.f32.mrf.mxu0  ;;  %v7705_v32 = vld [vmem:[#allocation37_spill] sm:$0xff]  ;;  %v7706_v39 = vld [vmem:[#allocation36_spill] sm:$0xff] }
 0x47d   : > { %v2934_v59 = vpop.f32.mrf.mxu1  ;;  %v2766_v27 = vadd.f32 %v2765_v53, %v2597_v23  ;;  %v3618_v56 = vadd.f32 %v7426_v60, %v3617_v28  ;;  %v2607_v6 = vadd.f32 %v7706_v39, %v7705_v32  ;;  %v7707_v28 = vld [vmem:[#allocation35_spill] sm:$0xff] }
 0x47e   : > { %4132 = vmatmul.bf16.gmra.mxu3 %v3940_v18 }
 0x47f   : > { %v2935_v50 = vadd.f32 %v2934_v59, %v2766_v27  ;;  %v3772_v8 = vmul.f32 0.01, %v3618_v56  ;;  %vm3708_vm12 = vcmp.gt.f32.partialorder %v3618_v56, 0.0 }
 0x481   : > { %v4093_v24 = vpop.f32.mrf.mxu3  ;;  %v3088_v19 = vmul.f32 0.01, %v2935_v50  ;;  %vm3024_vm14 = vcmp.gt.f32.partialorder %v2935_v50, 0.0  ;;  %v3836_v44 = vsel %vm3708_vm12, %v3618_v56, %v3772_v8 }
 0x482   : > { %v3900_v42 = vadd.f32 %v3836_v44, %v3151_v35 }
 0x483   : > { %v3152_v46 = vsel %vm3024_vm14, %v2935_v50, %v3088_v19 }
 0x484   : > { %v3619_v49 = vpop.f32.mrf.mxu2  ;;  %v2768_v10 = vpop.f32.mrf.mxu0 }
 0x485   : > { %v3620_v0 = vadd.f32 %v7426_v60, %v3619_v49  ;;  %v2937_v63 = vpop.f32.mrf.mxu1  ;;  %v2769_v52 = vadd.f32 %v2768_v10, %v7704_v33 }
 0x487   : > { %vm3709_vm15 = vcmp.gt.f32.partialorder %v3620_v0, 0.0  ;;  %v3773_v14 = vmul.f32 0.01, %v3620_v0  ;;  %v2938_v40 = vadd.f32 %v2937_v63, %v2769_v52 }
 0x489   : > { %v3837_v21 = vsel %vm3709_vm15, %v3620_v0, %v3773_v14  ;;  %v4095_v30 = vpop.f32.mrf.mxu3  ;;  %v3089_v45 = vmul.f32 0.01, %v2938_v40  ;;  %vm3025_vm1 = vcmp.gt.f32.partialorder %v2938_v40, 0.0 }
 0x48a   : > { %v6012_v43 = vpack.c.bf16 %v4095_v30, %v4093_v24  ;;  %v3901_v13 = vadd.f32 %v3837_v21, %v3152_v46 }
 0x48b   : > { %v3153_v26 = vsel %vm3025_vm1, %v2938_v40, %v3089_v45 }
 0x48c   : > { %6112 = vst [vmem:[%s7391_s15 + $0x70] sm:$0xff] %v6012_v43   ;;  %v3622_v3 = vpop.f32.mrf.mxu2  ;;  %v3941_v15 = vpack.c.bf16 %v3901_v13, %v3900_v42  ;;  %v2770_v41 = vpop.f32.mrf.mxu0  ;;  %v7708_v42 = vld [vmem:[#allocation40_spill] sm:$0xff]  ;;  %v7709_v13 = vld [vmem:[#allocation39_spill] sm:$0xff] }
 0x48d   : > { %v2939_v2 = vpop.f32.mrf.mxu1  ;;  %v2771_v47 = vadd.f32 %v2770_v41, %v2602_v29  ;;  %v3623_v16 = vadd.f32 %v7426_v60, %v3622_v3  ;;  %v2612_v11 = vadd.f32 %v7709_v13, %v7708_v42  ;;  %v7710_v29 = vld [vmem:[#allocation38_spill] sm:$0xff]  ;;  %v7550_v41 = vld [vmem:[#allocation11] ss:$0 sm:$0xff] }
 0x48e   : > { %4137 = vmatmul.bf16.gmra.mxu3 %v3941_v15 }
 0x48f   : > { %v2940_v5 = vadd.f32 %v2939_v2, %v2771_v47  ;;  %v3774_v9 = vmul.f32 0.01, %v3623_v16  ;;  %vm3710_vm0 = vcmp.gt.f32.partialorder %v3623_v16, 0.0 }
 0x491   : > { %v4098_v12 = vpop.f32.mrf.mxu3  ;;  %v3090_v38 = vmul.f32 0.01, %v2940_v5  ;;  %vm3026_vm2 = vcmp.gt.f32.partialorder %v2940_v5, 0.0  ;;  %v3838_v62 = vsel %vm3710_vm0, %v3623_v16, %v3774_v9 }
 0x492   : > { %v3902_v55 = vadd.f32 %v3838_v62, %v3153_v26 }
 0x493   : > { %v3154_v1 = vsel %vm3026_vm2, %v2940_v5, %v3090_v38 }
 0x494   : > { %v3624_v48 = vpop.f32.mrf.mxu2  ;;  %v2773_v4 = vpop.f32.mrf.mxu0 }
 0x495   : > { %v3625_v58 = vadd.f32 %v7426_v60, %v3624_v48  ;;  %v2942_v61 = vpop.f32.mrf.mxu1  ;;  %v2774_v18 = vadd.f32 %v2773_v4, %v7707_v28 }
 0x497   : > { %vm3711_vm3 = vcmp.gt.f32.partialorder %v3625_v58, 0.0  ;;  %v3775_v31 = vmul.f32 0.01, %v3625_v58  ;;  %v2943_v27 = vadd.f32 %v2942_v61, %v2774_v18 }
 0x499   : > { %v3839_v36 = vsel %vm3711_vm3, %v3625_v58, %v3775_v31  ;;  %v4100_v7 = vpop.f32.mrf.mxu3  ;;  %v3091_v8 = vmul.f32 0.01, %v2943_v27  ;;  %vm3027_vm5 = vcmp.gt.f32.partialorder %v2943_v27, 0.0 }
 0x49a   : > { %v6017_v37 = vpack.c.bf16 %v4100_v7, %v4098_v12  ;;  %v3903_v22 = vadd.f32 %v3839_v36, %v3154_v1 }
 0x49b   : > { %v3155_v44 = vsel %vm3027_vm5, %v2943_v27, %v3091_v8 }
 0x49c   : > { %6113 = vst [vmem:[%s7391_s15 + $0x78] sm:$0xff] %v6017_v37   ;;  %v3627_v51 = vpop.f32.mrf.mxu2  ;;  %v3942_v23 = vpack.c.bf16 %v3903_v22, %v3902_v55  ;;  %v2775_v25 = vpop.f32.mrf.mxu0  ;;  %v7711_v55 = vld [vmem:[#allocation43_spill] sm:$0xff]  ;;  %v7712_v22 = vld [vmem:[#allocation42_spill] sm:$0xff] }
 0x49d   : > { %v2944_v57 = vpop.f32.mrf.mxu1  ;;  %v2776_v53 = vadd.f32 %v2775_v25, %v2607_v6  ;;  %v3628_v59 = vadd.f32 %v7426_v60, %v3627_v51  ;;  %v2617_v32 = vadd.f32 %v7712_v22, %v7711_v55  ;;  %v7713_v51 = vld [vmem:[#allocation41_spill] sm:$0xff] }
 0x49e   : > { %4142 = vmatmul.bf16.gmra.mxu3 %v3942_v23 }
 0x49f   : > { %v2945_v56 = vadd.f32 %v2944_v57, %v2776_v53  ;;  %v3776_v50 = vmul.f32 0.01, %v3628_v59  ;;  %vm3712_vm4 = vcmp.gt.f32.partialorder %v3628_v59, 0.0 }
 0x4a1   : > { %v4103_v20 = vpop.f32.mrf.mxu3  ;;  %v3092_v49 = vmul.f32 0.01, %v2945_v56  ;;  %vm3028_vm6 = vcmp.gt.f32.partialorder %v2945_v56, 0.0  ;;  %v3840_v10 = vsel %vm3712_vm4, %v3628_v59, %v3776_v50 }
 0x4a2   : > { %v3904_v30 = vadd.f32 %v3840_v10, %v3155_v44 }
 0x4a3   : > { %v3156_v14 = vsel %vm3028_vm6, %v2945_v56, %v3092_v49 }
 0x4a4   : > { %v3629_v24 = vpop.f32.mrf.mxu2  ;;  %v2778_v19 = vpop.f32.mrf.mxu0 }
 0x4a5   : > { %v3630_v34 = vadd.f32 %v7426_v60, %v3629_v24  ;;  %v2947_v0 = vpop.f32.mrf.mxu1  ;;  %v2779_v3 = vadd.f32 %v2778_v19, %v7710_v29 }
 0x4a7   : > { %vm3713_vm7 = vcmp.gt.f32.partialorder %v3630_v34, 0.0  ;;  %v3777_v63 = vmul.f32 0.01, %v3630_v34  ;;  %v2948_v47 = vadd.f32 %v2947_v0, %v2779_v3 }
 0x4a9   : > { %v3841_v35 = vsel %vm3713_vm7, %v3630_v34, %v3777_v63  ;;  %v4105_v46 = vpop.f32.mrf.mxu3  ;;  %v3093_v9 = vmul.f32 0.01, %v2948_v47  ;;  %vm3029_vm9 = vcmp.gt.f32.partialorder %v2948_v47, 0.0 }
 0x4aa   : > { %v6022_v21 = vpack.c.bf16 %v4105_v46, %v4103_v20  ;;  %v3905_v43 = vadd.f32 %v3841_v35, %v3156_v14 }
 0x4ab   : > { %v3157_v62 = vsel %vm3029_vm9, %v2948_v47, %v3093_v9 }
 0x4ac   : > { %6114 = vst [vmem:[%s7391_s15 + $0x80] sm:$0xff] %v6022_v21   ;;  %v3632_v60 = vpop.f32.mrf.mxu2  ;;  %v3943_v17 = vpack.c.bf16 %v3905_v43, %v3904_v30  ;;  %v2780_v15 = vpop.f32.mrf.mxu0  ;;  %v7714_v30 = vld [vmem:[#allocation46_spill] sm:$0xff]  ;;  %v7715_v43 = vld [vmem:[#allocation45_spill] sm:$0xff] }
 0x4ad   : > { %v2949_v33 = vpop.f32.mrf.mxu1  ;;  %v2781_v52 = vadd.f32 %v2780_v15, %v2612_v11  ;;  %v3633_v2 = vadd.f32 %v7550_v41, %v3632_v60  ;;  %v2622_v42 = vadd.f32 %v7715_v43, %v7714_v30  ;;  %v7716_v60 = vld [vmem:[#allocation44_spill] sm:$0xff] }
 0x4ae   : > { %4147 = vmatmul.bf16.gmra.mxu3 %v3943_v17 }
 0x4af   : > { %v2950_v16 = vadd.f32 %v2949_v33, %v2781_v52  ;;  %v3778_v5 = vmul.f32 0.01, %v3633_v2  ;;  %vm3714_vm8 = vcmp.gt.f32.partialorder %v3633_v2, 0.0 }
 0x4b1   : > { %v4108_v40 = vpop.f32.mrf.mxu3  ;;  %v3094_v48 = vmul.f32 0.01, %v2950_v16  ;;  %vm3030_vm10 = vcmp.gt.f32.partialorder %v2950_v16, 0.0  ;;  %v3842_v4 = vsel %vm3714_vm8, %v3633_v2, %v3778_v5 }
 0x4b2   : > { %v3906_v7 = vadd.f32 %v3842_v4, %v3157_v62 }
 0x4b3   : > { %v3158_v31 = vsel %vm3030_vm10, %v2950_v16, %v3094_v48 }
 0x4b4   : > { %v3634_v12 = vpop.f32.mrf.mxu2  ;;  %v2783_v38 = vpop.f32.mrf.mxu0 }
 0x4b5   : > { %v3635_v45 = vadd.f32 %v7550_v41, %v3634_v12  ;;  %v2952_v58 = vpop.f32.mrf.mxu1  ;;  %v2784_v23 = vadd.f32 %v2783_v38, %v7713_v51 }
 0x4b7   : > { %vm3715_vm11 = vcmp.gt.f32.partialorder %v3635_v45, 0.0  ;;  %v3779_v61 = vmul.f32 0.01, %v3635_v45  ;;  %v2953_v53 = vadd.f32 %v2952_v58, %v2784_v23 }
 0x4b9   : > { %v3843_v26 = vsel %vm3715_vm11, %v3635_v45, %v3779_v61  ;;  %v4110_v1 = vpop.f32.mrf.mxu3  ;;  %v3095_v50 = vmul.f32 0.01, %v2953_v53  ;;  %vm3031_vm13 = vcmp.gt.f32.partialorder %v2953_v53, 0.0 }
 0x4ba   : > { %v6027_v36 = vpack.c.bf16 %v4110_v1, %v4108_v40  ;;  %v3907_v37 = vadd.f32 %v3843_v26, %v3158_v31 }
 0x4bb   : > { %v3159_v10 = vsel %vm3031_vm13, %v2953_v53, %v3095_v50 }
 0x4bc   : > { %6115 = vst [vmem:[%s7391_s15 + $0x88] sm:$0xff] %v6027_v36   ;;  %v3637_v39 = vpop.f32.mrf.mxu2  ;;  %v3944_v6 = vpack.c.bf16 %v3907_v37, %v3906_v7  ;;  %v2785_v28 = vpop.f32.mrf.mxu0  ;;  %v7717_v7 = vld [vmem:[#allocation49_spill] sm:$0xff]  ;;  %v7718_v37 = vld [vmem:[#allocation48_spill] sm:$0xff] }
 0x4bd   : > { %v2954_v18 = vpop.f32.mrf.mxu1  ;;  %v2786_v25 = vadd.f32 %v2785_v28, %v2617_v32  ;;  %v3638_v57 = vadd.f32 %v7550_v41, %v3637_v39  ;;  %v2627_v55 = vadd.f32 %v7718_v37, %v7717_v7  ;;  %v7719_v39 = vld [vmem:[#allocation47_spill] sm:$0xff] }
 0x4be   : > { %4152 = vmatmul.bf16.gmra.mxu3 %v3944_v6 }
 0x4bf   : > { %v2955_v59 = vadd.f32 %v2954_v18, %v2786_v25  ;;  %v3780_v56 = vmul.f32 0.01, %v3638_v57  ;;  %vm3716_vm12 = vcmp.gt.f32.partialorder %v3638_v57, 0.0 }
 0x4c1   : > { %v4113_v27 = vpop.f32.mrf.mxu3  ;;  %v3096_v24 = vmul.f32 0.01, %v2955_v59  ;;  %vm3032_vm14 = vcmp.gt.f32.partialorder %v2955_v59, 0.0  ;;  %v3844_v19 = vsel %vm3716_vm12, %v3638_v57, %v3780_v56 }
 0x4c2   : > { %v3908_v46 = vadd.f32 %v3844_v19, %v3159_v10 }
 0x4c3   : > { %v3160_v63 = vsel %vm3032_vm14, %v2955_v59, %v3096_v24 }
 0x4c4   : > { %v3639_v20 = vpop.f32.mrf.mxu2  ;;  %v2788_v49 = vpop.f32.mrf.mxu0 }
 0x4c5   : > { %v3640_v8 = vadd.f32 %v7550_v41, %v3639_v20  ;;  %v2957_v34 = vpop.f32.mrf.mxu1  ;;  %v2789_v17 = vadd.f32 %v2788_v49, %v7716_v60 }
 0x4c7   : > { %vm3717_vm15 = vcmp.gt.f32.partialorder %v3640_v8, 0.0  ;;  %v3781_v0 = vmul.f32 0.01, %v3640_v8  ;;  %v2958_v52 = vadd.f32 %v2957_v34, %v2789_v17 }
 0x4c9   : > { %v3845_v44 = vsel %vm3717_vm15, %v3640_v8, %v3781_v0  ;;  %v4115_v14 = vpop.f32.mrf.mxu3  ;;  %v3097_v5 = vmul.f32 0.01, %v2958_v52  ;;  %vm3033_vm1 = vcmp.gt.f32.partialorder %v2958_v52, 0.0 }
 0x4ca   : > { %v6032_v35 = vpack.c.bf16 %v4115_v14, %v4113_v27  ;;  %v3909_v21 = vadd.f32 %v3845_v44, %v3160_v63 }
 0x4cb   : > { %v3161_v4 = vsel %vm3033_vm1, %v2958_v52, %v3097_v5 }
 0x4cc   : > { %6116 = vst [vmem:[%s7391_s15 + $0x90] sm:$0xff] %v6032_v35   ;;  %v3642_v13 = vpop.f32.mrf.mxu2  ;;  %v3945_v11 = vpack.c.bf16 %v3909_v21, %v3908_v46  ;;  %v2790_v29 = vpop.f32.mrf.mxu0  ;;  %v7720_v46 = vld [vmem:[#allocation52_spill] sm:$0xff]  ;;  %v7721_v21 = vld [vmem:[#allocation51_spill] sm:$0xff] }
 0x4cd   : > { %v2959_v3 = vpop.f32.mrf.mxu1  ;;  %v2791_v15 = vadd.f32 %v2790_v29, %v2622_v42  ;;  %v3643_v33 = vadd.f32 %v7550_v41, %v3642_v13  ;;  %v2632_v30 = vadd.f32 %v7721_v21, %v7720_v46  ;;  %v7722_v13 = vld [vmem:[#allocation50_spill] sm:$0xff] }
 0x4ce   : > { %4157 = vmatmul.bf16.gmra.mxu3 %v3945_v11 }
 0x4cf   : > { %v2960_v2 = vadd.f32 %v2959_v3, %v2791_v15  ;;  %v3782_v16 = vmul.f32 0.01, %v3643_v33  ;;  %vm3718_vm0 = vcmp.gt.f32.partialorder %v3643_v33, 0.0 }
 0x4d1   : > { %v4118_v47 = vpop.f32.mrf.mxu3  ;;  %v3098_v12 = vmul.f32 0.01, %v2960_v2  ;;  %vm3034_vm2 = vcmp.gt.f32.partialorder %v2960_v2, 0.0  ;;  %v3846_v38 = vsel %vm3718_vm0, %v3643_v33, %v3782_v16 }
 0x4d2   : > { %v3910_v1 = vadd.f32 %v3846_v38, %v3161_v4 }
 0x4d3   : > { %v3162_v61 = vsel %vm3034_vm2, %v2960_v2, %v3098_v12 }
 0x4d4   : > { %v3644_v40 = vpop.f32.mrf.mxu2  ;;  %v2793_v48 = vpop.f32.mrf.mxu0 }
 0x4d5   : > { %v3645_v9 = vadd.f32 %v7550_v41, %v3644_v40  ;;  %v2962_v45 = vpop.f32.mrf.mxu1  ;;  %v2794_v6 = vadd.f32 %v2793_v48, %v7719_v39 }
 0x4d7   : > { %vm3719_vm3 = vcmp.gt.f32.partialorder %v3645_v9, 0.0  ;;  %v3783_v58 = vmul.f32 0.01, %v3645_v9  ;;  %v2963_v25 = vadd.f32 %v2962_v45, %v2794_v6 }
 0x4d9   : > { %v3847_v62 = vsel %vm3719_vm3, %v3645_v9, %v3783_v58  ;;  %v4120_v31 = vpop.f32.mrf.mxu3  ;;  %v3099_v56 = vmul.f32 0.01, %v2963_v25  ;;  %vm3035_vm5 = vcmp.gt.f32.partialorder %v2963_v25, 0.0 }
 0x4da   : > { %v6037_v26 = vpack.c.bf16 %v4120_v31, %v4118_v47  ;;  %v3911_v36 = vadd.f32 %v3847_v62, %v3162_v61 }
 0x4db   : > { %v3163_v19 = vsel %vm3035_vm5, %v2963_v25, %v3099_v56 }
 0x4dc   : > { %6117 = vst [vmem:[%s7391_s15 + $0x98] sm:$0xff] %v6037_v26   ;;  %v3647_v22 = vpop.f32.mrf.mxu2  ;;  %v3946_v32 = vpack.c.bf16 %v3911_v36, %v3910_v1  ;;  %v2795_v51 = vpop.f32.mrf.mxu0  ;;  %v7723_v1 = vld [vmem:[#allocation54_spill] sm:$0xff] }
 0x4dd   : > { %v2964_v23 = vpop.f32.mrf.mxu1  ;;  %v2796_v28 = vadd.f32 %v2795_v51, %v2627_v55  ;;  %v3648_v18 = vadd.f32 %v7550_v41, %v3647_v22  ;;  %v2637_v36 = vadd.f32 %v7378_v54, %v7723_v1  ;;  %v7724_v55 = vld [vmem:[#allocation53_spill] sm:$0xff] }
 0x4de   : > { %4162 = vmatmul.bf16.gmra.mxu3 %v3946_v32 }
 0x4df   : > { %v2965_v57 = vadd.f32 %v2964_v23, %v2796_v28  ;;  %v3784_v59 = vmul.f32 0.01, %v3648_v18  ;;  %vm3720_vm4 = vcmp.gt.f32.partialorder %v3648_v18, 0.0 }
 0x4e1   : > { %v4123_v53 = vpop.f32.mrf.mxu3  ;;  %v3100_v20 = vmul.f32 0.01, %v2965_v57  ;;  %vm3036_vm6 = vcmp.gt.f32.partialorder %v2965_v57, 0.0  ;;  %v3848_v49 = vsel %vm3720_vm4, %v3648_v18, %v3784_v59 }
 0x4e2   : > { %v3912_v14 = vadd.f32 %v3848_v49, %v3163_v19 }
 0x4e3   : > { %v3164_v0 = vsel %vm3036_vm6, %v2965_v57, %v3100_v20 }
 0x4e4   : > { %v3649_v27 = vpop.f32.mrf.mxu2  ;;  %v2798_v24 = vpop.f32.mrf.mxu0 }
 0x4e5   : > { %v3650_v50 = vadd.f32 %v7550_v41, %v3649_v27  ;;  %v2967_v8 = vpop.f32.mrf.mxu1  ;;  %v2799_v11 = vadd.f32 %v2798_v24, %v7722_v13 }
 0x4e7   : > { %vm3721_vm7 = vcmp.gt.f32.partialorder %v3650_v50, 0.0  ;;  %v3785_v34 = vmul.f32 0.01, %v3650_v50  ;;  %v2968_v15 = vadd.f32 %v2967_v8, %v2799_v11 }
 0x4e9   : > { %v3849_v10 = vsel %vm3721_vm7, %v3650_v50, %v3785_v34  ;;  %v4125_v63 = vpop.f32.mrf.mxu3  ;;  %v3101_v16 = vmul.f32 0.01, %v2968_v15  ;;  %vm3037_vm9 = vcmp.gt.f32.partialorder %v2968_v15, 0.0 }
 0x4ea   : > { %v6042_v44 = vpack.c.bf16 %v4125_v63, %v4123_v53  ;;  %v3913_v35 = vadd.f32 %v3849_v10, %v3164_v0 }
 0x4eb   : > { %v3165_v38 = vsel %vm3037_vm9, %v2968_v15, %v3101_v16 }
 0x4ec   : > { %6118 = vst [vmem:[%s7391_s15 + $0xa0] sm:$0xff] %v6042_v44   ;;  %v3652_v43 = vpop.f32.mrf.mxu2  ;;  %v3947_v42 = vpack.c.bf16 %v3913_v35, %v3912_v14  ;;  %v2800_v60 = vpop.f32.mrf.mxu0 }
 0x4ed   : > { %v2969_v17 = vpop.f32.mrf.mxu1  ;;  %v2801_v29 = vadd.f32 %v2800_v60, %v2632_v30  ;;  %v3653_v3 = vadd.f32 %v7550_v41, %v3652_v43 }
 0x4ee   : > { %4167 = vmatmul.bf16.gmra.mxu3 %v3947_v42 }
 0x4ef   : > { %v2970_v33 = vadd.f32 %v2969_v17, %v2801_v29  ;;  %v3786_v2 = vmul.f32 0.01, %v3653_v3  ;;  %vm3722_vm8 = vcmp.gt.f32.partialorder %v3653_v3, 0.0 }
 0x4f1   : > { %v4128_v52 = vpop.f32.mrf.mxu3  ;;  %v3102_v40 = vmul.f32 0.01, %v2970_v33  ;;  %vm3038_vm10 = vcmp.gt.f32.partialorder %v2970_v33, 0.0  ;;  %v3850_v48 = vsel %vm3722_vm8, %v3653_v3, %v3786_v2 }
 0x4f2   : > { %v3914_v31 = vadd.f32 %v3850_v48, %v3165_v38 }
 0x4f3   : > { %v3166_v58 = vsel %vm3038_vm10, %v2970_v33, %v3102_v40 }
 0x4f4   : > { %v3654_v47 = vpop.f32.mrf.mxu2  ;;  %v2803_v12 = vpop.f32.mrf.mxu0 }
 0x4f5   : > { %v3655_v5 = vadd.f32 %v7550_v41, %v3654_v47  ;;  %v2972_v9 = vpop.f32.mrf.mxu1  ;;  %v2804_v22 = vadd.f32 %v2803_v12, %v7724_v55 }
 0x4f7   : > { %vm3723_vm11 = vcmp.gt.f32.partialorder %v3655_v5, 0.0  ;;  %v3787_v45 = vmul.f32 0.01, %v3655_v5  ;;  %v2973_v23 = vadd.f32 %v2972_v9, %v2804_v22 }
 0x4f9   : > { %v3851_v4 = vsel %vm3723_vm11, %v3655_v5, %v3787_v45  ;;  %v4130_v61 = vpop.f32.mrf.mxu3  ;;  %v3103_v53 = vmul.f32 0.01, %v2973_v23  ;;  %vm3039_vm13 = vcmp.gt.f32.partialorder %v2973_v23, 0.0 }
 0x4fa   : > { %v6047_v62 = vpack.c.bf16 %v4130_v61, %v4128_v52  ;;  %v3915_v26 = vadd.f32 %v3851_v4, %v3166_v58 }
 0x4fb   : > { %v3167_v20 = vsel %vm3039_vm13, %v2973_v23, %v3103_v53 }
 0x4fc   : > { %6119 = vst [vmem:[%s7391_s15 + $0xa8] sm:$0xff] %v6047_v62   ;;  %v3657_v7 = vpop.f32.mrf.mxu2  ;;  %v3948_v37 = vpack.c.bf16 %v3915_v26, %v3914_v31  ;;  %v2805_v32 = vpop.f32.mrf.mxu0 }
 0x4fd   : > { %v2806_v39 = vadd.f32 %v2805_v32, %v2637_v36  ;;  %v3658_v6 = vadd.f32 %v7550_v41, %v3657_v7  ;;  %v2974_v51 = vpop.f32.mrf.mxu1 }
 0x4fe   : > { %4172 = vmatmul.bf16.gmra.mxu3 %v3948_v37 }
 0x4ff   : > { %v2975_v28 = vadd.f32 %v2974_v51, %v2806_v39  ;;  %v3788_v25 = vmul.f32 0.01, %v3658_v6  ;;  %vm3724_vm12 = vcmp.gt.f32.partialorder %v3658_v6, 0.0 }
 0x501   : > { %v4133_v18 = vpop.f32.mrf.mxu3  ;;  %v3104_v54 = vmul.f32 0.01, %v2975_v28  ;;  %vm3040_vm14 = vcmp.gt.f32.partialorder %v2975_v28, 0.0  ;;  %v3852_v27 = vsel %vm3724_vm12, %v3658_v6, %v3788_v25 }
 0x502   : > { %v3916_v34 = vadd.f32 %v3852_v27, %v3167_v20 }
 0x503   : > { %v3168_v50 = vsel %vm3040_vm14, %v2975_v28, %v3104_v54 }
 0x504   : > { %v3659_v57 = vpop.f32.mrf.mxu2 }
 0x505   : > { %v3660_v59 = vadd.f32 %v7550_v41, %v3659_v57 }
 0x507   : > { %vm3725_vm15 = vcmp.gt.f32.partialorder %v3660_v59, 0.0  ;;  %v3789_v56 = vmul.f32 0.01, %v3660_v59 }
 0x509   : > { %v3853_v24 = vsel %vm3725_vm15, %v3660_v59, %v3789_v56  ;;  %v4135_v8 = vpop.f32.mrf.mxu3 }
 0x50a   : > { %v6052_v49 = vpack.c.bf16 %v4135_v8, %v4133_v18  ;;  %v3917_v19 = vadd.f32 %v3853_v24, %v3168_v50 }
 0x50c   : > { %6120 = vst [vmem:[%s7391_s15 + $0xb0] sm:$0xff] %v6052_v49   ;;  %v3949_v0 = vpack.c.bf16 %v3917_v19, %v3916_v34 }
 0x50e   : > { %4177 = vmatmul.bf16.gmra.mxu3 %v3949_v0 }
 0x511   : > { %v4138_v41 = vpop.f32.mrf.mxu3 }
 0x519   : > { %v4140_v10 = vpop.f32.mrf.mxu3 }
 0x51a   : > { %v6057_v63 = vpack.c.bf16 %v4140_v10, %v4138_v41 }
 0x51c   : > { %6121 = vst [vmem:[%s7391_s15 + $0xb8] sm:$0xff] %v6057_v63  }
 0x521   : > { %v4143_v44 = vpop.f32.mrf.mxu3 }
 0x529   : > { %v4145_v14 = vpop.f32.mrf.mxu3 }
 0x52a   : > { %v6062_v35 = vpack.c.bf16 %v4145_v14, %v4143_v44 }
 0x52c   : > { %6122 = vst [vmem:[%s7391_s15 + $0xc0] sm:$0xff] %v6062_v35  }
 0x531   : > { %v4148_v46 = vpop.f32.mrf.mxu3 }
 0x539   : > { %v4150_v21 = vpop.f32.mrf.mxu3 }
 0x53a   : > { %v6067_v30 = vpack.c.bf16 %v4150_v21, %v4148_v46 }
 0x53c   : > { %6123 = vst [vmem:[%s7391_s15 + $0xc8] sm:$0xff] %v6067_v30  }
 0x541   : > { %v4153_v43 = vpop.f32.mrf.mxu3 }
 0x549   : > { %v4155_v42 = vpop.f32.mrf.mxu3 }
 0x54a   : > { %v6072_v13 = vpack.c.bf16 %v4155_v42, %v4153_v43 }
 0x54c   : > { %6124 = vst [vmem:[%s7391_s15 + $0xd0] sm:$0xff] %v6072_v13  }
 0x551   : > { %v4158_v11 = vpop.f32.mrf.mxu3 }
 0x559   : > { %v4160_v60 = vpop.f32.mrf.mxu3 }
 0x55a   : > { %v6077_v17 = vpack.c.bf16 %v4160_v60, %v4158_v11 }
 0x55c   : > { %6125 = vst [vmem:[%s7391_s15 + $0xd8] sm:$0xff] %v6077_v17  }
 0x561   : > { %v4163_v29 = vpop.f32.mrf.mxu3 }
 0x569   : > { %v4165_v3 = vpop.f32.mrf.mxu3 }
 0x56a   : > { %v6082_v15 = vpack.c.bf16 %v4165_v3, %v4163_v29 }
 0x56c   : > { %6126 = vst [vmem:[%s7391_s15 + $0xe0] sm:$0xff] %v6082_v15  }
 0x571   : > { %v4168_v33 = vpop.f32.mrf.mxu3 }
 0x579   : > { %v4170_v52 = vpop.f32.mrf.mxu3 }
 0x57a   : > { %v6087_v2 = vpack.c.bf16 %v4170_v52, %v4168_v33 }
 0x57c   : > { %6127 = vst [vmem:[%s7391_s15 + $0xe8] sm:$0xff] %v6087_v2  }
 0x581   : > { %v4173_v47 = vpop.f32.mrf.mxu3 }
 0x589   : > { %v4175_v16 = vpop.f32.mrf.mxu3 }
 0x58a   : > { %v6092_v40 = vpack.c.bf16 %v4175_v16, %v4173_v47 }
 0x58c   : > { %6128 = vst [vmem:[%s7391_s15 + $0xf0] sm:$0xff] %v6092_v40  }
 0x591   : > { %v4178_v5 = vpop.f32.mrf.mxu3 }
 0x599   : > { %v4180_v12 = vpop.f32.mrf.mxu3 }
 0x59a   : > { %v6097_v9 = vpack.c.bf16 %v4180_v12, %v4178_v5 }
 0x59c   : > { %6129 = vst [vmem:[%s7391_s15 + $0xf8] sm:$0xff] %v6097_v9  }
 0x59d   : > { %6483 = shalt.err (!%p6480_p7)
}
 0x59e   : > { %s6549_s19 = smov 64   ;;  %s6550_s29 = smov 4  }
 0x59f   : > { %6157 = dma.vmem_to_hbm [thread:$0]  (%p6686_p0), %s4325_s16, 4096, %s4327_s21, %s4312_s12, %s6549_s19, %s6549_s19, %s6550_s29  }
 0x5a0 PF: > { %s4341_s3 = sand.u32 1, %s6526_s24   ;;  %p7725_p10 = scmp.ge.s32.totalorder %s6538_s27, 2 }
 0x5a1   : > { %s4342_s6 = scalar_lea.sflag [#allocation4], %s4341_s3 }
 0x5a2   : > { %p6183_p11 = pnand %p7725_p10, %p6694_p6 }
 0x5a4   : > { %p6184_p12 = pneg %p6183_p11 }
 0x5a6   : > { %6521 = dma.done.wait (%p6184_p12), %s4342_s6, 4096  }
 0x5a7   : > { %6523 = vsyncadd (%p6184_p12), %s4342_s6, 4294963200  ;;  %s7726_s9 = sld [smem:[#allocation21_spill]]  ;;  %p25_p2 = scmp.ge.s32.totalorder %s6666_s20, 4  }
 0x5a8   : > { %s7727_s24 = smov %s6530_s25  ;;  %s7728_s25 = smov %s6534_s26 }
 0x5a9   : > { %s7730_s27 = smov %s6666_s20  ;;  %27 = sbr.rel (!%p25_p2) target bundleno = 16 (0x10), region = 126 }
 0x5ad   : > { %s7729_s26 = smov %s7726_s9 }
 0x5ae   :  { %4348 = vsyncpa [#allocation3], 1 }
 0x5af   :  { %4350 = vsyncpa [#allocation3 + $0x1], 1 }
 0x5b0   :  { %4351 = vsyncpa [#allocation6], 1 }
 0x5b1   :  { %4353 = vsyncpa [#allocation6 + $0x1], 1 }
 0x5b2   :  { %4354 = vsyncpa [#allocation9], 1 }
 0x5b3   :  { %4355 = vsyncpa [#allocation12], 1 }
 0x5b4   :  { %4356 = vsyncpa [#allocation4], 1 }
 0x5b5   :  { %4358 = vsyncpa [#allocation4 + $0x1], 1 }

</bundles_post_ra>
